<compile_context>
chip_gen: v6e
topology: v6e:2x2x1
jax: 0.10.0
libtpu: 0.0.40
codegen_flags: <defaults>
</compile_context>

<pallas_src>
import jax
import jax.numpy as jnp
import numpy as np
from jax.experimental import pallas as pl
from jax.experimental.pallas import tpu as pltpu


# ----------------------------------------------------------------------------
# Fused forward kernel (wavefront LSTM + last-step select + fused heads)
# ----------------------------------------------------------------------------
def _make_fused_kernel(L, T, BP, H):
    G = 4 * H

    def kernel(x_ref, len_ref, wih0_ref, wrec_ref, brec_ref,
               hw1_ref, hb1_ref, hw2_ref, hb2_ref, out_ref, xp_scr):
        # Last valid timestep per row, clamped to [0, T-1].
        last_t = jnp.clip(len_ref[...] - 1, 0, T - 1)            # (BP, 1) i32

        # Hoisted layer-0 input projection for ALL timesteps: one MXU pass, off the
        # serial recurrence path.  Layer-1's input projection (h0 @ W_ih1) is fused
        # into the per-step recurrence matmul below, so no second hoist is needed.
        xp_scr[...] = jnp.dot(x_ref[...].astype(jnp.bfloat16), wih0_ref[...],
                              preferred_element_type=jnp.float32)

        h = [jnp.zeros((BP, H), jnp.float32) for _ in range(L)]
        c = [jnp.zeros((BP, H), jnp.float32) for _ in range(L)]
        last_h = jnp.zeros((BP, H), jnp.float32)

        def sigmoid(v):
            # EUP-cheap sigmoid: one tanh instead of exp + full-precision reciprocal.
            return 0.5 * jnp.tanh(0.5 * v) + 0.5

        # Wavefront over the layer/time diagonal: step d updates layer l at time
        # t = d - l.  One fused (BP, L*H) x (L*H, L*4H) bf16 matmul per step carries
        # every layer's recurrence and the next layer's input projection.
        for d in range(T + L - 1):
            if d == 0:
                # All carried h are zero at d=0 -> skip the matmul entirely.
                gates_all = jnp.broadcast_to(brec_ref[...], (BP, L * G))
            else:
                lhs = jnp.concatenate(h, axis=1).astype(jnp.bfloat16)   # (BP, L*H)
                gates_all = (jnp.dot(lhs, wrec_ref[...],
                                     preferred_element_type=jnp.float32)
                             + brec_ref[...])
            for l in range(L):
                t = d - l
                if t < 0 or t >= T:
                    continue
                g = gates_all[:, l * G:(l + 1) * G]
                if l == 0:
                    g = g + xp_scr[t * BP:(t + 1) * BP, :]
                sg = sigmoid(g[:, :3 * H])            # contiguous [i | f | o]
                gg = jnp.tanh(g[:, 3 * H:])           # [g]
                c[l] = sg[:, H:2 * H] * c[l] + sg[:, :H] * gg
                h[l] = sg[:, 2 * H:3 * H] * jnp.tanh(c[l])
                if l == L - 1:
                    # in-kernel "last valid hidden state" selection
                    last_h = jnp.where(last_t == t, h[l], last_h)

        # Fused decoder heads (bf16 MXU, f32 accumulate): one wide Linear+ReLU with
        # lane-dense 256-wide hidden, then a block-diagonal W2 into one output slab.
        hid = jnp.maximum(
            jnp.dot(last_h.astype(jnp.bfloat16), hw1_ref[...],
                    preferred_element_type=jnp.float32) + hb1_ref[...], 0.0)
        out_ref[...] = (jnp.dot(hid.astype(jnp.bfloat16), hw2_ref[...],
                                preferred_element_type=jnp.float32)
                        + hb2_ref[...])

    return kernel


def _full_spec(shape):
    nd = len(shape)
    return pl.BlockSpec(shape, lambda i, _nd=nd: (0,) * _nd)


# ----------------------------------------------------------------------------
# Full forward (mirrors Seq_Classifier_RNN.forward)
# ----------------------------------------------------------------------------
def seq_classifier_forward(x_padded, lengths, lstm_params, head_params):
    """x_padded: (T, B, F) f32, zero past each row's length; lengths: (B,) int."""
    # TODO(synk): pack_sequence/pad_packed_sequence have no Pallas equivalent; the
    # dense padded LSTM + in-kernel last-valid-step select is equivalent since only
    # h[len-1] is consumed downstream.
    T, B, F = x_padded.shape
    H = lstm_params[0][1].shape[0]
    L = len(lstm_params)
    G = 4 * H

    # Pad batch to sublane width; padded rows get length 1 (results sliced away).
    BP = max(8, -(-B // 8) * 8)
    x_flat = jnp.pad(x_padded.astype(jnp.float32),
                     ((0, 0), (0, BP - B), (0, 0))).reshape(T * BP, F)
    len_col = jnp.pad(lengths.astype(jnp.int32), (0, BP - B),
                      constant_values=1).reshape(BP, 1)

    # ---- fused recurrence weights (one-time packing; constant-folded under jit) ----
    #   wrec = [[W_hh0, W_ih1], [0, W_hh1]]  (L*H, L*4H), bf16
    #   brec = [b0 | b1 | ...]               (1, L*4H),   f32
    wih0 = lstm_params[0][0].astype(jnp.bfloat16)                 # (F, 4H)
    wrec = jnp.zeros((L * H, L * G), jnp.float32)
    brec = jnp.zeros((1, L * G), jnp.float32)
    for l, (w_ih, w_hh, b) in enumerate(lstm_params):
        wrec = wrec.at[l * H:(l + 1) * H, l * G:(l + 1) * G].set(w_hh)
        if l + 1 < L:
            wrec = wrec.at[l * H:(l + 1) * H,
                           (l + 1) * G:(l + 2) * G].set(lstm_params[l + 1][0])
        brec = brec.at[:, l * G:(l + 1) * G].set(b)
    wrec = wrec.astype(jnp.bfloat16)

    # ---- fused, lane-dense decoder heads (hidden padded to a multiple of 128) ----
    names = list(head_params.keys())
    n_heads = len(names)
    HID = head_params[names[0]][0].shape[1]                       # 32
    total_c = sum(head_params[n][2].shape[1] for n in names)
    HP = max(128, -(-(HID * n_heads) // 128) * 128)               # 160 -> 256
    CP = max(128, -(-total_c // 128) * 128)
    hw1 = jnp.zeros((H, HP), jnp.float32)
    hb1 = jnp.zeros((1, HP), jnp.float32)
    hw2 = jnp.zeros((HP, CP), jnp.float32)
    hb2 = jnp.zeros((1, CP), jnp.float32)
    offsets = []
    off = 0
    for i, n in enumerate(names):
        w1, b1, w2, b2 = head_params[n]
        C = w2.shape[1]
        hw1 = hw1.at[:, i * HID:(i + 1) * HID].set(w1)
        hb1 = hb1.at[:, i * HID:(i + 1) * HID].set(b1)
        hw2 = hw2.at[i * HID:(i + 1) * HID, off:off + C].set(w2)
        hb2 = hb2.at[:, off:off + C].set(b2)
        offsets.append((n, off, C))
        off += C
    hw1 = hw1.astype(jnp.bfloat16)
    hw2 = hw2.astype(jnp.bfloat16)

    inputs = [x_flat, len_col, wih0, wrec, brec, hw1, hb1, hw2, hb2]
    kernel = _make_fused_kernel(L, T, BP, H)

    out = pl.pallas_call(
        kernel,
        out_shape=jax.ShapeDtypeStruct((BP, CP), jnp.float32),
        grid_spec=pltpu.PrefetchScalarGridSpec(
            num_scalar_prefetch=0,
            grid=(1,),
            in_specs=[_full_spec(a.shape) for a in inputs],
            out_specs=_full_spec((BP, CP)),
            scratch_shapes=[
                pltpu.VMEM((T * BP, G), jnp.float32),   # hoisted layer-0 projections
            ],
        ),
        compiler_params=pltpu.CompilerParams(
            dimension_semantics=("arbitrary",),
            vmem_limit_bytes=32 * 1024 * 1024,
        ),
    )(*inputs)

    return {n: out[:B, o:o + c] for (n, o, c) in offsets}


# ----------------------------------------------------------------------------
# Pure-JAX reference (same math / precision choices, sequential layers, no Pallas)
# ----------------------------------------------------------------------------
def _reference_forward(x_padded, lengths, lstm_params, head_params):
    T, B, _ = x_padded.shape
    seq = x_padded
    for (w_ih, w_hh, b) in lstm_params:
        H = w_hh.shape[0]
        xp = (jnp.dot(seq.reshape(T * B, -1).astype(jnp.bfloat16),
                      w_ih.astype(jnp.bfloat16),
                      preferred_element_type=jnp.float32) + b).reshape(T, B, 4 * H)
        h = jnp.zeros((B, H), jnp.float32)
        c = jnp.zeros((B, H), jnp.float32)
        outs = []
        for t in range(T):
            gates = xp[t] + jnp.dot(h.astype(jnp.bfloat16),
                                    w_hh.astype(jnp.bfloat16),
                                    preferred_element_type=jnp.float32)
            sg = jax.nn.sigmoid(gates[:, :3 * H])
            gg = jnp.tanh(gates[:, 3 * H:])
            c = sg[:, H:2 * H] * c + sg[:, :H] * gg
            h = sg[:, 2 * H:3 * H] * jnp.tanh(c)
            outs.append(h)
        seq = jnp.stack(outs, axis=0)
    seq_out = seq[lengths - 1, jnp.arange(B), :]
    pre = {}
    for name, (w1, b1, w2, b2) in head_params.items():
        hid = jnp.maximum(
            jnp.dot(seq_out.astype(jnp.bfloat16), w1.astype(jnp.bfloat16),
                    preferred_element_type=jnp.float32) + b1, 0.0)
        pre[name] = jnp.dot(hid.astype(jnp.bfloat16), w2.astype(jnp.bfloat16),
                            preferred_element_type=jnp.float32) + b2
    return pre


# ----------------------------------------------------------------------------
# Parameter construction (deterministic, PyTorch-style uniform init).
# Gate column order is [i, f, o, g] (kernel layout).
# ----------------------------------------------------------------------------
def init_lstm_params(key, input_size, hidden_size, num_layers):
    params = []
    bound = 1.0 / np.sqrt(hidden_size)
    for layer in range(num_layers):
        in_dim = input_size if layer == 0 else hidden_size
        key, k1, k2, k3, k4 = jax.random.split(key, 5)
        w_ih = jax.random.uniform(k1, (in_dim, 4 * hidden_size),
                                  minval=-bound, maxval=bound, dtype=jnp.float32)
        w_hh = jax.random.uniform(k2, (hidden_size, 4 * hidden_size),
                                  minval=-bound, maxval=bound, dtype=jnp.float32)
        b_ih = jax.random.uniform(k3, (1, 4 * hidden_size),
                                  minval=-bound, maxval=bound, dtype=jnp.float32)
        b_hh = jax.random.uniform(k4, (1, 4 * hidden_size),
                                  minval=-bound, maxval=bound, dtype=jnp.float32)
        params.append((w_ih, w_hh, b_ih + b_hh))
    return key, params


def init_head_params(key, in_dim, hid_dim, out_dim):
    key, k1, k2, k3, k4 = jax.random.split(key, 5)
    b1lim = 1.0 / np.sqrt(in_dim)
    b2lim = 1.0 / np.sqrt(hid_dim)
    w1 = jax.random.uniform(k1, (in_dim, hid_dim), minval=-b1lim, maxval=b1lim,
                            dtype=jnp.float32)
    b1 = jax.random.uniform(k2, (1, hid_dim), minval=-b1lim, maxval=b1lim,
                            dtype=jnp.float32)
    w2 = jax.random.uniform(k3, (hid_dim, out_dim), minval=-b2lim, maxval=b2lim,
                            dtype=jnp.float32)
    b2 = jax.random.uniform(k4, (1, out_dim), minval=-b2lim, maxval=b2lim,
                            dtype=jnp.float32)
    return key, (w1, b1, w2, b2)


if __name__ == "__main__":
    kargs = {
        "feature_dim": 16,
        "hidden_size": 128,          # decoders require Linear(128, 32)
        "lstm_layer_num": 2,
        "gesture_class_nums": 6,
        "location_class_num": 5,
        "room_class_num": 3,
        "orientation_class_num": 4,
        "user_class_num": 8,
    }

    T, B, F = 8, 4, kargs["feature_dim"]
    H = kargs["hidden_size"]

    key = jax.random.PRNGKey(0)
    key, lstm_params = init_lstm_params(key, F, H, kargs["lstm_layer_num"])

    head_cfg = [
        ("pre_ges", kargs["gesture_class_nums"]),
        ("pre_loc", kargs["location_class_num"]),
        ("pre_room", kargs["room_class_num"]),
        ("pre_ori", kargs["orientation_class_num"]),
        ("pre_user", kargs["user_class_num"]),
    ]
    head_params = {}
    for name, num_classes in head_cfg:
        if num_classes != 0:
            key, p = init_head_params(key, 128, 32, num_classes)
            head_params[name] = p

    # Variable-length input list -> padded dense tensor + lengths (all >= 1)
    lengths = jnp.array([8, 6, 7, 5], dtype=jnp.int32)
    key, kx = jax.random.split(key)
    x_padded = jax.random.normal(kx, (T, B, F), dtype=jnp.float32)
    time_idx = jnp.arange(T)[:, None, None]
    x_padded = jnp.where(time_idx < lengths[None, :, None], x_padded, 0.0)

    fwd = jax.jit(lambda x, l: seq_classifier_forward(x, l, lstm_params, head_params))
    pre = fwd(x_padded, lengths)
    pre = jax.tree_util.tree_map(jax.block_until_ready, pre)

    ref = _reference_forward(x_padded, lengths, lstm_params, head_params)
    for name, c in head_cfg:
        if c == 0:
            continue
        assert pre[name].shape == (B, c), (name, pre[name].shape)
        assert bool(jnp.all(jnp.isfinite(pre[name])))
        np.testing.assert_allclose(np.asarray(pre[name]), np.asarray(ref[name]),
                                   rtol=2e-2, atol=2e-2)

    print("KERNEL_OK")
</pallas_src>

<mosaic_0001>
module attributes {stable_mosaic.version = 11 : i64} {
  func.func @kernel(%arg0: i32, %arg1: memref<64x16xf32, #tpu.memory_space<vmem>>, %arg2: memref<8x1xi32, #tpu.memory_space<vmem>>, %arg3: memref<16x512xbf16, #tpu.memory_space<vmem>>, %arg4: memref<256x1024xbf16, #tpu.memory_space<vmem>>, %arg5: memref<1x1024xf32, #tpu.memory_space<vmem>>, %arg6: memref<128x256xbf16, #tpu.memory_space<vmem>>, %arg7: memref<1x256xf32, #tpu.memory_space<vmem>>, %arg8: memref<256x128xbf16, #tpu.memory_space<vmem>>, %arg9: memref<1x128xf32, #tpu.memory_space<vmem>>, %arg10: memref<8x128xf32, #tpu.memory_space<vmem>>, %arg11: memref<64x512xf32, #tpu.memory_space<vmem>>) attributes {dimension_semantics = [#tpu.dimension_semantics<arbitrary>], iteration_bounds = array<i64: 1>, scalar_prefetch = 0 : i64, scratch_operands = 1 : i64, tpu.core_type = #tpu.core_type<tc>, window_params = [{pipeline_mode = #tpu.pipeline_mode<synchronous>, transform_indices = @transform_0, window_bounds = array<i64: 64, 16>}, {pipeline_mode = #tpu.pipeline_mode<synchronous>, transform_indices = @transform_1, window_bounds = array<i64: 8, 1>}, {pipeline_mode = #tpu.pipeline_mode<synchronous>, transform_indices = @transform_2, window_bounds = array<i64: 16, 512>}, {pipeline_mode = #tpu.pipeline_mode<synchronous>, transform_indices = @transform_3, window_bounds = array<i64: 256, 1024>}, {pipeline_mode = #tpu.pipeline_mode<synchronous>, transform_indices = @transform_4, window_bounds = array<i64: 1, 1024>}, {pipeline_mode = #tpu.pipeline_mode<synchronous>, transform_indices = @transform_5, window_bounds = array<i64: 128, 256>}, {pipeline_mode = #tpu.pipeline_mode<synchronous>, transform_indices = @transform_6, window_bounds = array<i64: 1, 256>}, {pipeline_mode = #tpu.pipeline_mode<synchronous>, transform_indices = @transform_7, window_bounds = array<i64: 256, 128>}, {pipeline_mode = #tpu.pipeline_mode<synchronous>, transform_indices = @transform_8, window_bounds = array<i64: 1, 128>}, {pipeline_mode = #tpu.pipeline_mode<synchronous>, transform_indices = @transform_9, window_bounds = array<i64: 8, 128>}]} {
    %c0 = arith.constant 0 : index
    %c0_0 = arith.constant 0 : index
    %0 = vector.load %arg2[%c0, %c0_0] : memref<8x1xi32, #tpu.memory_space<vmem>>, vector<8x1xi32>
    %c1_i32 = arith.constant 1 : i32
    %1 = vector.broadcast %c1_i32 : i32 to vector<8x1xi32>
    %2 = arith.subi %0, %1 : vector<8x1xi32>
    %c0_i32 = arith.constant 0 : i32
    %c7_i32 = arith.constant 7 : i32
    %3 = vector.broadcast %c0_i32 : i32 to vector<8x1xi32>
    %4 = arith.maxsi %3, %2 : vector<8x1xi32>
    %5 = vector.broadcast %c7_i32 : i32 to vector<8x1xi32>
    %6 = arith.minsi %5, %4 : vector<8x1xi32>
    %c0_1 = arith.constant 0 : index
    %c0_2 = arith.constant 0 : index
    %7 = vector.load %arg1[%c0_1, %c0_2] : memref<64x16xf32, #tpu.memory_space<vmem>>, vector<64x16xf32>
    %8 = arith.truncf %7 : vector<64x16xf32> to vector<64x16xbf16>
    %c0_3 = arith.constant 0 : index
    %c0_4 = arith.constant 0 : index
    %9 = vector.load %arg3[%c0_3, %c0_4] : memref<16x512xbf16, #tpu.memory_space<vmem>>, vector<16x512xbf16>
    %cst = arith.constant dense<0.000000e+00> : vector<64x512xf32>
    %10 = tpu.matmul %8, %9, %cst {dimension_numbers = #tpu.dot_dimension_numbers<[1], [0], [0], [1], [0, 0, 1, 1], [], []>} : vector<64x16xbf16>, vector<16x512xbf16>, vector<64x512xf32> -> vector<64x512xf32>
    %c0_5 = arith.constant 0 : index
    %c0_6 = arith.constant 0 : index
    %11 = vector.load %arg11[%c0_5, %c0_6] : memref<64x512xf32, #tpu.memory_space<vmem>>, vector<64x512xf32>
    tpu.vector_store %arg11[%c0_5, %c0_6], %10 {strides = array<i32>} : memref<64x512xf32, #tpu.memory_space<vmem>>, vector<64x512xf32>,
    %cst_7 = arith.constant 0.000000e+00 : f32
    %12 = vector.broadcast %cst_7 : f32 to vector<8x128xf32>
    %cst_8 = arith.constant 0.000000e+00 : f32
    %13 = vector.broadcast %cst_8 : f32 to vector<8x128xf32>
    %cst_9 = arith.constant 0.000000e+00 : f32
    %14 = vector.broadcast %cst_9 : f32 to vector<8x128xf32>
    %cst_10 = arith.constant 0.000000e+00 : f32
    %15 = vector.broadcast %cst_10 : f32 to vector<8x128xf32>
    %c0_11 = arith.constant 0 : index
    %c0_12 = arith.constant 0 : index
    %16 = vector.load %arg5[%c0_11, %c0_12] : memref<1x1024xf32, #tpu.memory_space<vmem>>, vector<1x1024xf32>
    %17 = vector.shape_cast %16 : vector<1x1024xf32> to vector<1x1024xf32>
    %18 = vector.broadcast %17 : vector<1x1024xf32> to vector<8x1024xf32>
    %19 = vector.extract_strided_slice %18 {offsets = [0, 0], sizes = [8, 512], strides = [1, 1]} : vector<8x1024xf32> to vector<8x512xf32>
    %c0_13 = arith.constant 0 : index
    %c0_14 = arith.constant 0 : index
    %20 = vector.load %arg11[%c0_13, %c0_14] : memref<64x512xf32, #tpu.memory_space<vmem>>, vector<8x512xf32>
    %21 = arith.addf %19, %20 : vector<8x512xf32>
    %22 = vector.extract_strided_slice %21 {offsets = [0, 0], sizes = [8, 384], strides = [1, 1]} : vector<8x512xf32> to vector<8x384xf32>
    %cst_15 = arith.constant 5.000000e-01 : f32
    %23 = vector.broadcast %cst_15 : f32 to vector<8x384xf32>
    %24 = arith.mulf %23, %22 : vector<8x384xf32>
    %25 = math.tanh %24 : vector<8x384xf32>
    %cst_16 = arith.constant 5.000000e-01 : f32
    %26 = vector.broadcast %cst_16 : f32 to vector<8x384xf32>
    %27 = arith.mulf %26, %25 : vector<8x384xf32>
    %cst_17 = arith.constant 5.000000e-01 : f32
    %28 = vector.broadcast %cst_17 : f32 to vector<8x384xf32>
    %29 = arith.addf %27, %28 : vector<8x384xf32>
    %30 = vector.extract_strided_slice %21 {offsets = [0, 384], sizes = [8, 128], strides = [1, 1]} : vector<8x512xf32> to vector<8x128xf32>
    %31 = math.tanh %30 : vector<8x128xf32>
    %32 = vector.extract_strided_slice %29 {offsets = [0, 128], sizes = [8, 128], strides = [1, 1]} : vector<8x384xf32> to vector<8x128xf32>
    %33 = arith.mulf %32, %13 : vector<8x128xf32>
    %34 = vector.extract_strided_slice %29 {offsets = [0, 0], sizes = [8, 128], strides = [1, 1]} : vector<8x384xf32> to vector<8x128xf32>
    %35 = arith.mulf %34, %31 : vector<8x128xf32>
    %36 = arith.addf %33, %35 : vector<8x128xf32>
    %37 = vector.extract_strided_slice %29 {offsets = [0, 256], sizes = [8, 128], strides = [1, 1]} : vector<8x384xf32> to vector<8x128xf32>
    %38 = math.tanh %36 : vector<8x128xf32>
    %39 = arith.mulf %37, %38 : vector<8x128xf32>
    %40 = tpu.concatenate %39, %12 in 1 : vector<8x128xf32>, vector<8x128xf32> -> vector<8x256xf32>
    %41 = arith.truncf %40 : vector<8x256xf32> to vector<8x256xbf16>
    %c0_18 = arith.constant 0 : index
    %c0_19 = arith.constant 0 : index
    %42 = vector.load %arg4[%c0_18, %c0_19] : memref<256x1024xbf16, #tpu.memory_space<vmem>>, vector<256x1024xbf16>
    %cst_20 = arith.constant dense<0.000000e+00> : vector<8x1024xf32>
    %43 = tpu.matmul %41, %42, %cst_20 {dimension_numbers = #tpu.dot_dimension_numbers<[1], [0], [0], [1], [0, 0, 1, 1], [], []>} : vector<8x256xbf16>, vector<256x1024xbf16>, vector<8x1024xf32> -> vector<8x1024xf32>
    %c0_21 = arith.constant 0 : index
    %c0_22 = arith.constant 0 : index
    %44 = vector.load %arg5[%c0_21, %c0_22] : memref<1x1024xf32, #tpu.memory_space<vmem>>, vector<1x1024xf32>
    %45 = vector.broadcast %44 : vector<1x1024xf32> to vector<8x1024xf32>
    %46 = arith.addf %43, %45 : vector<8x1024xf32>
    %47 = vector.extract_strided_slice %46 {offsets = [0, 0], sizes = [8, 512], strides = [1, 1]} : vector<8x1024xf32> to vector<8x512xf32>
    %c8 = arith.constant 8 : index
    %c0_23 = arith.constant 0 : index
    %48 = vector.load %arg11[%c8, %c0_23] : memref<64x512xf32, #tpu.memory_space<vmem>>, vector<8x512xf32>
    %49 = arith.addf %47, %48 : vector<8x512xf32>
    %50 = vector.extract_strided_slice %49 {offsets = [0, 0], sizes = [8, 384], strides = [1, 1]} : vector<8x512xf32> to vector<8x384xf32>
    %cst_24 = arith.constant 5.000000e-01 : f32
    %51 = vector.broadcast %cst_24 : f32 to vector<8x384xf32>
    %52 = arith.mulf %51, %50 : vector<8x384xf32>
    %53 = math.tanh %52 : vector<8x384xf32>
    %cst_25 = arith.constant 5.000000e-01 : f32
    %54 = vector.broadcast %cst_25 : f32 to vector<8x384xf32>
    %55 = arith.mulf %54, %53 : vector<8x384xf32>
    %cst_26 = arith.constant 5.000000e-01 : f32
    %56 = vector.broadcast %cst_26 : f32 to vector<8x384xf32>
    %57 = arith.addf %55, %56 : vector<8x384xf32>
    %58 = vector.extract_strided_slice %49 {offsets = [0, 384], sizes = [8, 128], strides = [1, 1]} : vector<8x512xf32> to vector<8x128xf32>
    %59 = math.tanh %58 : vector<8x128xf32>
    %60 = vector.extract_strided_slice %57 {offsets = [0, 128], sizes = [8, 128], strides = [1, 1]} : vector<8x384xf32> to vector<8x128xf32>
    %61 = arith.mulf %60, %36 : vector<8x128xf32>
    %62 = vector.extract_strided_slice %57 {offsets = [0, 0], sizes = [8, 128], strides = [1, 1]} : vector<8x384xf32> to vector<8x128xf32>
    %63 = arith.mulf %62, %59 : vector<8x128xf32>
    %64 = arith.addf %61, %63 : vector<8x128xf32>
    %65 = vector.extract_strided_slice %57 {offsets = [0, 256], sizes = [8, 128], strides = [1, 1]} : vector<8x384xf32> to vector<8x128xf32>
    %66 = math.tanh %64 : vector<8x128xf32>
    %67 = arith.mulf %65, %66 : vector<8x128xf32>
    %68 = vector.extract_strided_slice %46 {offsets = [0, 512], sizes = [8, 512], strides = [1, 1]} : vector<8x1024xf32> to vector<8x512xf32>
    %69 = vector.extract_strided_slice %68 {offsets = [0, 0], sizes = [8, 384], strides = [1, 1]} : vector<8x512xf32> to vector<8x384xf32>
    %cst_27 = arith.constant 5.000000e-01 : f32
    %70 = vector.broadcast %cst_27 : f32 to vector<8x384xf32>
    %71 = arith.mulf %70, %69 : vector<8x384xf32>
    %72 = math.tanh %71 : vector<8x384xf32>
    %cst_28 = arith.constant 5.000000e-01 : f32
    %73 = vector.broadcast %cst_28 : f32 to vector<8x384xf32>
    %74 = arith.mulf %73, %72 : vector<8x384xf32>
    %cst_29 = arith.constant 5.000000e-01 : f32
    %75 = vector.broadcast %cst_29 : f32 to vector<8x384xf32>
    %76 = arith.addf %74, %75 : vector<8x384xf32>
    %77 = vector.extract_strided_slice %68 {offsets = [0, 384], sizes = [8, 128], strides = [1, 1]} : vector<8x512xf32> to vector<8x128xf32>
    %78 = math.tanh %77 : vector<8x128xf32>
    %79 = vector.extract_strided_slice %76 {offsets = [0, 128], sizes = [8, 128], strides = [1, 1]} : vector<8x384xf32> to vector<8x128xf32>
    %80 = arith.mulf %79, %14 : vector<8x128xf32>
    %81 = vector.extract_strided_slice %76 {offsets = [0, 0], sizes = [8, 128], strides = [1, 1]} : vector<8x384xf32> to vector<8x128xf32>
    %82 = arith.mulf %81, %78 : vector<8x128xf32>
    %83 = arith.addf %80, %82 : vector<8x128xf32>
    %84 = vector.extract_strided_slice %76 {offsets = [0, 256], sizes = [8, 128], strides = [1, 1]} : vector<8x384xf32> to vector<8x128xf32>
    %85 = math.tanh %83 : vector<8x128xf32>
    %86 = arith.mulf %84, %85 : vector<8x128xf32>
    %c0_i32_30 = arith.constant 0 : i32
    %87 = vector.broadcast %c0_i32_30 : i32 to vector<8x1xi32>
    %88 = arith.cmpi eq, %6, %87 : vector<8x1xi32>
    %89 = vector.shape_cast %88 : vector<8x1xi1> to vector<8x1xi1>
    %90 = vector.broadcast %89 : vector<8x1xi1> to vector<8x128xi1>
    %91 = arith.select %90, %86, %15 : vector<8x128xi1>, vector<8x128xf32>
    %92 = tpu.concatenate %67, %86 in 1 : vector<8x128xf32>, vector<8x128xf32> -> vector<8x256xf32>
    %93 = arith.truncf %92 : vector<8x256xf32> to vector<8x256xbf16>
    %c0_31 = arith.constant 0 : index
    %c0_32 = arith.constant 0 : index
    %94 = vector.load %arg4[%c0_31, %c0_32] : memref<256x1024xbf16, #tpu.memory_space<vmem>>, vector<256x1024xbf16>
    %cst_33 = arith.constant dense<0.000000e+00> : vector<8x1024xf32>
    %95 = tpu.matmul %93, %94, %cst_33 {dimension_numbers = #tpu.dot_dimension_numbers<[1], [0], [0], [1], [0, 0, 1, 1], [], []>} : vector<8x256xbf16>, vector<256x1024xbf16>, vector<8x1024xf32> -> vector<8x1024xf32>
    %c0_34 = arith.constant 0 : index
    %c0_35 = arith.constant 0 : index
    %96 = vector.load %arg5[%c0_34, %c0_35] : memref<1x1024xf32, #tpu.memory_space<vmem>>, vector<1x1024xf32>
    %97 = vector.broadcast %96 : vector<1x1024xf32> to vector<8x1024xf32>
    %98 = arith.addf %95, %97 : vector<8x1024xf32>
    %99 = vector.extract_strided_slice %98 {offsets = [0, 0], sizes = [8, 512], strides = [1, 1]} : vector<8x1024xf32> to vector<8x512xf32>
    %c16 = arith.constant 16 : index
    %c0_36 = arith.constant 0 : index
    %100 = vector.load %arg11[%c16, %c0_36] : memref<64x512xf32, #tpu.memory_space<vmem>>, vector<8x512xf32>
    %101 = arith.addf %99, %100 : vector<8x512xf32>
    %102 = vector.extract_strided_slice %101 {offsets = [0, 0], sizes = [8, 384], strides = [1, 1]} : vector<8x512xf32> to vector<8x384xf32>
    %cst_37 = arith.constant 5.000000e-01 : f32
    %103 = vector.broadcast %cst_37 : f32 to vector<8x384xf32>
    %104 = arith.mulf %103, %102 : vector<8x384xf32>
    %105 = math.tanh %104 : vector<8x384xf32>
    %cst_38 = arith.constant 5.000000e-01 : f32
    %106 = vector.broadcast %cst_38 : f32 to vector<8x384xf32>
    %107 = arith.mulf %106, %105 : vector<8x384xf32>
    %cst_39 = arith.constant 5.000000e-01 : f32
    %108 = vector.broadcast %cst_39 : f32 to vector<8x384xf32>
    %109 = arith.addf %107, %108 : vector<8x384xf32>
    %110 = vector.extract_strided_slice %101 {offsets = [0, 384], sizes = [8, 128], strides = [1, 1]} : vector<8x512xf32> to vector<8x128xf32>
    %111 = math.tanh %110 : vector<8x128xf32>
    %112 = vector.extract_strided_slice %109 {offsets = [0, 128], sizes = [8, 128], strides = [1, 1]} : vector<8x384xf32> to vector<8x128xf32>
    %113 = arith.mulf %112, %64 : vector<8x128xf32>
    %114 = vector.extract_strided_slice %109 {offsets = [0, 0], sizes = [8, 128], strides = [1, 1]} : vector<8x384xf32> to vector<8x128xf32>
    %115 = arith.mulf %114, %111 : vector<8x128xf32>
    %116 = arith.addf %113, %115 : vector<8x128xf32>
    %117 = vector.extract_strided_slice %109 {offsets = [0, 256], sizes = [8, 128], strides = [1, 1]} : vector<8x384xf32> to vector<8x128xf32>
    %118 = math.tanh %116 : vector<8x128xf32>
    %119 = arith.mulf %117, %118 : vector<8x128xf32>
    %120 = vector.extract_strided_slice %98 {offsets = [0, 512], sizes = [8, 512], strides = [1, 1]} : vector<8x1024xf32> to vector<8x512xf32>
    %121 = vector.extract_strided_slice %120 {offsets = [0, 0], sizes = [8, 384], strides = [1, 1]} : vector<8x512xf32> to vector<8x384xf32>
    %cst_40 = arith.constant 5.000000e-01 : f32
    %122 = vector.broadcast %cst_40 : f32 to vector<8x384xf32>
    %123 = arith.mulf %122, %121 : vector<8x384xf32>
    %124 = math.tanh %123 : vector<8x384xf32>
    %cst_41 = arith.constant 5.000000e-01 : f32
    %125 = vector.broadcast %cst_41 : f32 to vector<8x384xf32>
    %126 = arith.mulf %125, %124 : vector<8x384xf32>
    %cst_42 = arith.constant 5.000000e-01 : f32
    %127 = vector.broadcast %cst_42 : f32 to vector<8x384xf32>
    %128 = arith.addf %126, %127 : vector<8x384xf32>
    %129 = vector.extract_strided_slice %120 {offsets = [0, 384], sizes = [8, 128], strides = [1, 1]} : vector<8x512xf32> to vector<8x128xf32>
    %130 = math.tanh %129 : vector<8x128xf32>
    %131 = vector.extract_strided_slice %128 {offsets = [0, 128], sizes = [8, 128], strides = [1, 1]} : vector<8x384xf32> to vector<8x128xf32>
    %132 = arith.mulf %131, %83 : vector<8x128xf32>
    %133 = vector.extract_strided_slice %128 {offsets = [0, 0], sizes = [8, 128], strides = [1, 1]} : vector<8x384xf32> to vector<8x128xf32>
    %134 = arith.mulf %133, %130 : vector<8x128xf32>
    %135 = arith.addf %132, %134 : vector<8x128xf32>
    %136 = vector.extract_strided_slice %128 {offsets = [0, 256], sizes = [8, 128], strides = [1, 1]} : vector<8x384xf32> to vector<8x128xf32>
    %137 = math.tanh %135 : vector<8x128xf32>
    %138 = arith.mulf %136, %137 : vector<8x128xf32>
    %c1_i32_43 = arith.constant 1 : i32
    %139 = vector.broadcast %c1_i32_43 : i32 to vector<8x1xi32>
    %140 = arith.cmpi eq, %6, %139 : vector<8x1xi32>
    %141 = vector.shape_cast %140 : vector<8x1xi1> to vector<8x1xi1>
    %142 = vector.broadcast %141 : vector<8x1xi1> to vector<8x128xi1>
    %143 = arith.select %142, %138, %91 : vector<8x128xi1>, vector<8x128xf32>
    %144 = tpu.concatenate %119, %138 in 1 : vector<8x128xf32>, vector<8x128xf32> -> vector<8x256xf32>
    %145 = arith.truncf %144 : vector<8x256xf32> to vector<8x256xbf16>
    %c0_44 = arith.constant 0 : index
    %c0_45 = arith.constant 0 : index
    %146 = vector.load %arg4[%c0_44, %c0_45] : memref<256x1024xbf16, #tpu.memory_space<vmem>>, vector<256x1024xbf16>
    %cst_46 = arith.constant dense<0.000000e+00> : vector<8x1024xf32>
    %147 = tpu.matmul %145, %146, %cst_46 {dimension_numbers = #tpu.dot_dimension_numbers<[1], [0], [0], [1], [0, 0, 1, 1], [], []>} : vector<8x256xbf16>, vector<256x1024xbf16>, vector<8x1024xf32> -> vector<8x1024xf32>
    %c0_47 = arith.constant 0 : index
    %c0_48 = arith.constant 0 : index
    %148 = vector.load %arg5[%c0_47, %c0_48] : memref<1x1024xf32, #tpu.memory_space<vmem>>, vector<1x1024xf32>
    %149 = vector.broadcast %148 : vector<1x1024xf32> to vector<8x1024xf32>
    %150 = arith.addf %147, %149 : vector<8x1024xf32>
    %151 = vector.extract_strided_slice %150 {offsets = [0, 0], sizes = [8, 512], strides = [1, 1]} : vector<8x1024xf32> to vector<8x512xf32>
    %c24 = arith.constant 24 : index
    %c0_49 = arith.constant 0 : index
    %152 = vector.load %arg11[%c24, %c0_49] : memref<64x512xf32, #tpu.memory_space<vmem>>, vector<8x512xf32>
    %153 = arith.addf %151, %152 : vector<8x512xf32>
    %154 = vector.extract_strided_slice %153 {offsets = [0, 0], sizes = [8, 384], strides = [1, 1]} : vector<8x512xf32> to vector<8x384xf32>
    %cst_50 = arith.constant 5.000000e-01 : f32
    %155 = vector.broadcast %cst_50 : f32 to vector<8x384xf32>
    %156 = arith.mulf %155, %154 : vector<8x384xf32>
    %157 = math.tanh %156 : vector<8x384xf32>
    %cst_51 = arith.constant 5.000000e-01 : f32
    %158 = vector.broadcast %cst_51 : f32 to vector<8x384xf32>
    %159 = arith.mulf %158, %157 : vector<8x384xf32>
    %cst_52 = arith.constant 5.000000e-01 : f32
    %160 = vector.broadcast %cst_52 : f32 to vector<8x384xf32>
    %161 = arith.addf %159, %160 : vector<8x384xf32>
    %162 = vector.extract_strided_slice %153 {offsets = [0, 384], sizes = [8, 128], strides = [1, 1]} : vector<8x512xf32> to vector<8x128xf32>
    %163 = math.tanh %162 : vector<8x128xf32>
    %164 = vector.extract_strided_slice %161 {offsets = [0, 128], sizes = [8, 128], strides = [1, 1]} : vector<8x384xf32> to vector<8x128xf32>
    %165 = arith.mulf %164, %116 : vector<8x128xf32>
    %166 = vector.extract_strided_slice %161 {offsets = [0, 0], sizes = [8, 128], strides = [1, 1]} : vector<8x384xf32> to vector<8x128xf32>
    %167 = arith.mulf %166, %163 : vector<8x128xf32>
    %168 = arith.addf %165, %167 : vector<8x128xf32>
    %169 = vector.extract_strided_slice %161 {offsets = [0, 256], sizes = [8, 128], strides = [1, 1]} : vector<8x384xf32> to vector<8x128xf32>
    %170 = math.tanh %168 : vector<8x128xf32>
    %171 = arith.mulf %169, %170 : vector<8x128xf32>
    %172 = vector.extract_strided_slice %150 {offsets = [0, 512], sizes = [8, 512], strides = [1, 1]} : vector<8x1024xf32> to vector<8x512xf32>
    %173 = vector.extract_strided_slice %172 {offsets = [0, 0], sizes = [8, 384], strides = [1, 1]} : vector<8x512xf32> to vector<8x384xf32>
    %cst_53 = arith.constant 5.000000e-01 : f32
    %174 = vector.broadcast %cst_53 : f32 to vector<8x384xf32>
    %175 = arith.mulf %174, %173 : vector<8x384xf32>
    %176 = math.tanh %175 : vector<8x384xf32>
    %cst_54 = arith.constant 5.000000e-01 : f32
    %177 = vector.broadcast %cst_54 : f32 to vector<8x384xf32>
    %178 = arith.mulf %177, %176 : vector<8x384xf32>
    %cst_55 = arith.constant 5.000000e-01 : f32
    %179 = vector.broadcast %cst_55 : f32 to vector<8x384xf32>
    %180 = arith.addf %178, %179 : vector<8x384xf32>
    %181 = vector.extract_strided_slice %172 {offsets = [0, 384], sizes = [8, 128], strides = [1, 1]} : vector<8x512xf32> to vector<8x128xf32>
    %182 = math.tanh %181 : vector<8x128xf32>
    %183 = vector.extract_strided_slice %180 {offsets = [0, 128], sizes = [8, 128], strides = [1, 1]} : vector<8x384xf32> to vector<8x128xf32>
    %184 = arith.mulf %183, %135 : vector<8x128xf32>
    %185 = vector.extract_strided_slice %180 {offsets = [0, 0], sizes = [8, 128], strides = [1, 1]} : vector<8x384xf32> to vector<8x128xf32>
    %186 = arith.mulf %185, %182 : vector<8x128xf32>
    %187 = arith.addf %184, %186 : vector<8x128xf32>
    %188 = vector.extract_strided_slice %180 {offsets = [0, 256], sizes = [8, 128], strides = [1, 1]} : vector<8x384xf32> to vector<8x128xf32>
    %189 = math.tanh %187 : vector<8x128xf32>
    %190 = arith.mulf %188, %189 : vector<8x128xf32>
    %c2_i32 = arith.constant 2 : i32
    %191 = vector.broadcast %c2_i32 : i32 to vector<8x1xi32>
    %192 = arith.cmpi eq, %6, %191 : vector<8x1xi32>
    %193 = vector.shape_cast %192 : vector<8x1xi1> to vector<8x1xi1>
    %194 = vector.broadcast %193 : vector<8x1xi1> to vector<8x128xi1>
    %195 = arith.select %194, %190, %143 : vector<8x128xi1>, vector<8x128xf32>
    %196 = tpu.concatenate %171, %190 in 1 : vector<8x128xf32>, vector<8x128xf32> -> vector<8x256xf32>
    %197 = arith.truncf %196 : vector<8x256xf32> to vector<8x256xbf16>
    %c0_56 = arith.constant 0 : index
    %c0_57 = arith.constant 0 : index
    %198 = vector.load %arg4[%c0_56, %c0_57] : memref<256x1024xbf16, #tpu.memory_space<vmem>>, vector<256x1024xbf16>
    %cst_58 = arith.constant dense<0.000000e+00> : vector<8x1024xf32>
    %199 = tpu.matmul %197, %198, %cst_58 {dimension_numbers = #tpu.dot_dimension_numbers<[1], [0], [0], [1], [0, 0, 1, 1], [], []>} : vector<8x256xbf16>, vector<256x1024xbf16>, vector<8x1024xf32> -> vector<8x1024xf32>
    %c0_59 = arith.constant 0 : index
    %c0_60 = arith.constant 0 : index
    %200 = vector.load %arg5[%c0_59, %c0_60] : memref<1x1024xf32, #tpu.memory_space<vmem>>, vector<1x1024xf32>
    %201 = vector.broadcast %200 : vector<1x1024xf32> to vector<8x1024xf32>
    %202 = arith.addf %199, %201 : vector<8x1024xf32>
    %203 = vector.extract_strided_slice %202 {offsets = [0, 0], sizes = [8, 512], strides = [1, 1]} : vector<8x1024xf32> to vector<8x512xf32>
    %c32 = arith.constant 32 : index
    %c0_61 = arith.constant 0 : index
    %204 = vector.load %arg11[%c32, %c0_61] : memref<64x512xf32, #tpu.memory_space<vmem>>, vector<8x512xf32>
    %205 = arith.addf %203, %204 : vector<8x512xf32>
    %206 = vector.extract_strided_slice %205 {offsets = [0, 0], sizes = [8, 384], strides = [1, 1]} : vector<8x512xf32> to vector<8x384xf32>
    %cst_62 = arith.constant 5.000000e-01 : f32
    %207 = vector.broadcast %cst_62 : f32 to vector<8x384xf32>
    %208 = arith.mulf %207, %206 : vector<8x384xf32>
    %209 = math.tanh %208 : vector<8x384xf32>
    %cst_63 = arith.constant 5.000000e-01 : f32
    %210 = vector.broadcast %cst_63 : f32 to vector<8x384xf32>
    %211 = arith.mulf %210, %209 : vector<8x384xf32>
    %cst_64 = arith.constant 5.000000e-01 : f32
    %212 = vector.broadcast %cst_64 : f32 to vector<8x384xf32>
    %213 = arith.addf %211, %212 : vector<8x384xf32>
    %214 = vector.extract_strided_slice %205 {offsets = [0, 384], sizes = [8, 128], strides = [1, 1]} : vector<8x512xf32> to vector<8x128xf32>
    %215 = math.tanh %214 : vector<8x128xf32>
    %216 = vector.extract_strided_slice %213 {offsets = [0, 128], sizes = [8, 128], strides = [1, 1]} : vector<8x384xf32> to vector<8x128xf32>
    %217 = arith.mulf %216, %168 : vector<8x128xf32>
    %218 = vector.extract_strided_slice %213 {offsets = [0, 0], sizes = [8, 128], strides = [1, 1]} : vector<8x384xf32> to vector<8x128xf32>
    %219 = arith.mulf %218, %215 : vector<8x128xf32>
    %220 = arith.addf %217, %219 : vector<8x128xf32>
    %221 = vector.extract_strided_slice %213 {offsets = [0, 256], sizes = [8, 128], strides = [1, 1]} : vector<8x384xf32> to vector<8x128xf32>
    %222 = math.tanh %220 : vector<8x128xf32>
    %223 = arith.mulf %221, %222 : vector<8x128xf32>
    %224 = vector.extract_strided_slice %202 {offsets = [0, 512], sizes = [8, 512], strides = [1, 1]} : vector<8x1024xf32> to vector<8x512xf32>
    %225 = vector.extract_strided_slice %224 {offsets = [0, 0], sizes = [8, 384], strides = [1, 1]} : vector<8x512xf32> to vector<8x384xf32>
    %cst_65 = arith.constant 5.000000e-01 : f32
    %226 = vector.broadcast %cst_65 : f32 to vector<8x384xf32>
    %227 = arith.mulf %226, %225 : vector<8x384xf32>
    %228 = math.tanh %227 : vector<8x384xf32>
    %cst_66 = arith.constant 5.000000e-01 : f32
    %229 = vector.broadcast %cst_66 : f32 to vector<8x384xf32>
    %230 = arith.mulf %229, %228 : vector<8x384xf32>
    %cst_67 = arith.constant 5.000000e-01 : f32
    %231 = vector.broadcast %cst_67 : f32 to vector<8x384xf32>
    %232 = arith.addf %230, %231 : vector<8x384xf32>
    %233 = vector.extract_strided_slice %224 {offsets = [0, 384], sizes = [8, 128], strides = [1, 1]} : vector<8x512xf32> to vector<8x128xf32>
    %234 = math.tanh %233 : vector<8x128xf32>
    %235 = vector.extract_strided_slice %232 {offsets = [0, 128], sizes = [8, 128], strides = [1, 1]} : vector<8x384xf32> to vector<8x128xf32>
    %236 = arith.mulf %235, %187 : vector<8x128xf32>
    %237 = vector.extract_strided_slice %232 {offsets = [0, 0], sizes = [8, 128], strides = [1, 1]} : vector<8x384xf32> to vector<8x128xf32>
    %238 = arith.mulf %237, %234 : vector<8x128xf32>
    %239 = arith.addf %236, %238 : vector<8x128xf32>
    %240 = vector.extract_strided_slice %232 {offsets = [0, 256], sizes = [8, 128], strides = [1, 1]} : vector<8x384xf32> to vector<8x128xf32>
    %241 = math.tanh %239 : vector<8x128xf32>
    %242 = arith.mulf %240, %241 : vector<8x128xf32>
    %c3_i32 = arith.constant 3 : i32
    %243 = vector.broadcast %c3_i32 : i32 to vector<8x1xi32>
    %244 = arith.cmpi eq, %6, %243 : vector<8x1xi32>
    %245 = vector.shape_cast %244 : vector<8x1xi1> to vector<8x1xi1>
    %246 = vector.broadcast %245 : vector<8x1xi1> to vector<8x128xi1>
    %247 = arith.select %246, %242, %195 : vector<8x128xi1>, vector<8x128xf32>
    %248 = tpu.concatenate %223, %242 in 1 : vector<8x128xf32>, vector<8x128xf32> -> vector<8x256xf32>
    %249 = arith.truncf %248 : vector<8x256xf32> to vector<8x256xbf16>
    %c0_68 = arith.constant 0 : index
    %c0_69 = arith.constant 0 : index
    %250 = vector.load %arg4[%c0_68, %c0_69] : memref<256x1024xbf16, #tpu.memory_space<vmem>>, vector<256x1024xbf16>
    %cst_70 = arith.constant dense<0.000000e+00> : vector<8x1024xf32>
    %251 = tpu.matmul %249, %250, %cst_70 {dimension_numbers = #tpu.dot_dimension_numbers<[1], [0], [0], [1], [0, 0, 1, 1], [], []>} : vector<8x256xbf16>, vector<256x1024xbf16>, vector<8x1024xf32> -> vector<8x1024xf32>
    %c0_71 = arith.constant 0 : index
    %c0_72 = arith.constant 0 : index
    %252 = vector.load %arg5[%c0_71, %c0_72] : memref<1x1024xf32, #tpu.memory_space<vmem>>, vector<1x1024xf32>
    %253 = vector.broadcast %252 : vector<1x1024xf32> to vector<8x1024xf32>
    %254 = arith.addf %251, %253 : vector<8x1024xf32>
    %255 = vector.extract_strided_slice %254 {offsets = [0, 0], sizes = [8, 512], strides = [1, 1]} : vector<8x1024xf32> to vector<8x512xf32>
    %c40 = arith.constant 40 : index
    %c0_73 = arith.constant 0 : index
    %256 = vector.load %arg11[%c40, %c0_73] : memref<64x512xf32, #tpu.memory_space<vmem>>, vector<8x512xf32>
    %257 = arith.addf %255, %256 : vector<8x512xf32>
    %258 = vector.extract_strided_slice %257 {offsets = [0, 0], sizes = [8, 384], strides = [1, 1]} : vector<8x512xf32> to vector<8x384xf32>
    %cst_74 = arith.constant 5.000000e-01 : f32
    %259 = vector.broadcast %cst_74 : f32 to vector<8x384xf32>
    %260 = arith.mulf %259, %258 : vector<8x384xf32>
    %261 = math.tanh %260 : vector<8x384xf32>
    %cst_75 = arith.constant 5.000000e-01 : f32
    %262 = vector.broadcast %cst_75 : f32 to vector<8x384xf32>
    %263 = arith.mulf %262, %261 : vector<8x384xf32>
    %cst_76 = arith.constant 5.000000e-01 : f32
    %264 = vector.broadcast %cst_76 : f32 to vector<8x384xf32>
    %265 = arith.addf %263, %264 : vector<8x384xf32>
    %266 = vector.extract_strided_slice %257 {offsets = [0, 384], sizes = [8, 128], strides = [1, 1]} : vector<8x512xf32> to vector<8x128xf32>
    %267 = math.tanh %266 : vector<8x128xf32>
    %268 = vector.extract_strided_slice %265 {offsets = [0, 128], sizes = [8, 128], strides = [1, 1]} : vector<8x384xf32> to vector<8x128xf32>
    %269 = arith.mulf %268, %220 : vector<8x128xf32>
    %270 = vector.extract_strided_slice %265 {offsets = [0, 0], sizes = [8, 128], strides = [1, 1]} : vector<8x384xf32> to vector<8x128xf32>
    %271 = arith.mulf %270, %267 : vector<8x128xf32>
    %272 = arith.addf %269, %271 : vector<8x128xf32>
    %273 = vector.extract_strided_slice %265 {offsets = [0, 256], sizes = [8, 128], strides = [1, 1]} : vector<8x384xf32> to vector<8x128xf32>
    %274 = math.tanh %272 : vector<8x128xf32>
    %275 = arith.mulf %273, %274 : vector<8x128xf32>
    %276 = vector.extract_strided_slice %254 {offsets = [0, 512], sizes = [8, 512], strides = [1, 1]} : vector<8x1024xf32> to vector<8x512xf32>
    %277 = vector.extract_strided_slice %276 {offsets = [0, 0], sizes = [8, 384], strides = [1, 1]} : vector<8x512xf32> to vector<8x384xf32>
    %cst_77 = arith.constant 5.000000e-01 : f32
    %278 = vector.broadcast %cst_77 : f32 to vector<8x384xf32>
    %279 = arith.mulf %278, %277 : vector<8x384xf32>
    %280 = math.tanh %279 : vector<8x384xf32>
    %cst_78 = arith.constant 5.000000e-01 : f32
    %281 = vector.broadcast %cst_78 : f32 to vector<8x384xf32>
    %282 = arith.mulf %281, %280 : vector<8x384xf32>
    %cst_79 = arith.constant 5.000000e-01 : f32
    %283 = vector.broadcast %cst_79 : f32 to vector<8x384xf32>
    %284 = arith.addf %282, %283 : vector<8x384xf32>
    %285 = vector.extract_strided_slice %276 {offsets = [0, 384], sizes = [8, 128], strides = [1, 1]} : vector<8x512xf32> to vector<8x128xf32>
    %286 = math.tanh %285 : vector<8x128xf32>
    %287 = vector.extract_strided_slice %284 {offsets = [0, 128], sizes = [8, 128], strides = [1, 1]} : vector<8x384xf32> to vector<8x128xf32>
    %288 = arith.mulf %287, %239 : vector<8x128xf32>
    %289 = vector.extract_strided_slice %284 {offsets = [0, 0], sizes = [8, 128], strides = [1, 1]} : vector<8x384xf32> to vector<8x128xf32>
    %290 = arith.mulf %289, %286 : vector<8x128xf32>
    %291 = arith.addf %288, %290 : vector<8x128xf32>
    %292 = vector.extract_strided_slice %284 {offsets = [0, 256], sizes = [8, 128], strides = [1, 1]} : vector<8x384xf32> to vector<8x128xf32>
    %293 = math.tanh %291 : vector<8x128xf32>
    %294 = arith.mulf %292, %293 : vector<8x128xf32>
    %c4_i32 = arith.constant 4 : i32
    %295 = vector.broadcast %c4_i32 : i32 to vector<8x1xi32>
    %296 = arith.cmpi eq, %6, %295 : vector<8x1xi32>
    %297 = vector.shape_cast %296 : vector<8x1xi1> to vector<8x1xi1>
    %298 = vector.broadcast %297 : vector<8x1xi1> to vector<8x128xi1>
    %299 = arith.select %298, %294, %247 : vector<8x128xi1>, vector<8x128xf32>
    %300 = tpu.concatenate %275, %294 in 1 : vector<8x128xf32>, vector<8x128xf32> -> vector<8x256xf32>
    %301 = arith.truncf %300 : vector<8x256xf32> to vector<8x256xbf16>
    %c0_80 = arith.constant 0 : index
    %c0_81 = arith.constant 0 : index
    %302 = vector.load %arg4[%c0_80, %c0_81] : memref<256x1024xbf16, #tpu.memory_space<vmem>>, vector<256x1024xbf16>
    %cst_82 = arith.constant dense<0.000000e+00> : vector<8x1024xf32>
    %303 = tpu.matmul %301, %302, %cst_82 {dimension_numbers = #tpu.dot_dimension_numbers<[1], [0], [0], [1], [0, 0, 1, 1], [], []>} : vector<8x256xbf16>, vector<256x1024xbf16>, vector<8x1024xf32> -> vector<8x1024xf32>
    %c0_83 = arith.constant 0 : index
    %c0_84 = arith.constant 0 : index
    %304 = vector.load %arg5[%c0_83, %c0_84] : memref<1x1024xf32, #tpu.memory_space<vmem>>, vector<1x1024xf32>
    %305 = vector.broadcast %304 : vector<1x1024xf32> to vector<8x1024xf32>
    %306 = arith.addf %303, %305 : vector<8x1024xf32>
    %307 = vector.extract_strided_slice %306 {offsets = [0, 0], sizes = [8, 512], strides = [1, 1]} : vector<8x1024xf32> to vector<8x512xf32>
    %c48 = arith.constant 48 : index
    %c0_85 = arith.constant 0 : index
    %308 = vector.load %arg11[%c48, %c0_85] : memref<64x512xf32, #tpu.memory_space<vmem>>, vector<8x512xf32>
    %309 = arith.addf %307, %308 : vector<8x512xf32>
    %310 = vector.extract_strided_slice %309 {offsets = [0, 0], sizes = [8, 384], strides = [1, 1]} : vector<8x512xf32> to vector<8x384xf32>
    %cst_86 = arith.constant 5.000000e-01 : f32
    %311 = vector.broadcast %cst_86 : f32 to vector<8x384xf32>
    %312 = arith.mulf %311, %310 : vector<8x384xf32>
    %313 = math.tanh %312 : vector<8x384xf32>
    %cst_87 = arith.constant 5.000000e-01 : f32
    %314 = vector.broadcast %cst_87 : f32 to vector<8x384xf32>
    %315 = arith.mulf %314, %313 : vector<8x384xf32>
    %cst_88 = arith.constant 5.000000e-01 : f32
    %316 = vector.broadcast %cst_88 : f32 to vector<8x384xf32>
    %317 = arith.addf %315, %316 : vector<8x384xf32>
    %318 = vector.extract_strided_slice %309 {offsets = [0, 384], sizes = [8, 128], strides = [1, 1]} : vector<8x512xf32> to vector<8x128xf32>
    %319 = math.tanh %318 : vector<8x128xf32>
    %320 = vector.extract_strided_slice %317 {offsets = [0, 128], sizes = [8, 128], strides = [1, 1]} : vector<8x384xf32> to vector<8x128xf32>
    %321 = arith.mulf %320, %272 : vector<8x128xf32>
    %322 = vector.extract_strided_slice %317 {offsets = [0, 0], sizes = [8, 128], strides = [1, 1]} : vector<8x384xf32> to vector<8x128xf32>
    %323 = arith.mulf %322, %319 : vector<8x128xf32>
    %324 = arith.addf %321, %323 : vector<8x128xf32>
    %325 = vector.extract_strided_slice %317 {offsets = [0, 256], sizes = [8, 128], strides = [1, 1]} : vector<8x384xf32> to vector<8x128xf32>
    %326 = math.tanh %324 : vector<8x128xf32>
    %327 = arith.mulf %325, %326 : vector<8x128xf32>
    %328 = vector.extract_strided_slice %306 {offsets = [0, 512], sizes = [8, 512], strides = [1, 1]} : vector<8x1024xf32> to vector<8x512xf32>
    %329 = vector.extract_strided_slice %328 {offsets = [0, 0], sizes = [8, 384], strides = [1, 1]} : vector<8x512xf32> to vector<8x384xf32>
    %cst_89 = arith.constant 5.000000e-01 : f32
    %330 = vector.broadcast %cst_89 : f32 to vector<8x384xf32>
    %331 = arith.mulf %330, %329 : vector<8x384xf32>
    %332 = math.tanh %331 : vector<8x384xf32>
    %cst_90 = arith.constant 5.000000e-01 : f32
    %333 = vector.broadcast %cst_90 : f32 to vector<8x384xf32>
    %334 = arith.mulf %333, %332 : vector<8x384xf32>
    %cst_91 = arith.constant 5.000000e-01 : f32
    %335 = vector.broadcast %cst_91 : f32 to vector<8x384xf32>
    %336 = arith.addf %334, %335 : vector<8x384xf32>
    %337 = vector.extract_strided_slice %328 {offsets = [0, 384], sizes = [8, 128], strides = [1, 1]} : vector<8x512xf32> to vector<8x128xf32>
    %338 = math.tanh %337 : vector<8x128xf32>
    %339 = vector.extract_strided_slice %336 {offsets = [0, 128], sizes = [8, 128], strides = [1, 1]} : vector<8x384xf32> to vector<8x128xf32>
    %340 = arith.mulf %339, %291 : vector<8x128xf32>
    %341 = vector.extract_strided_slice %336 {offsets = [0, 0], sizes = [8, 128], strides = [1, 1]} : vector<8x384xf32> to vector<8x128xf32>
    %342 = arith.mulf %341, %338 : vector<8x128xf32>
    %343 = arith.addf %340, %342 : vector<8x128xf32>
    %344 = vector.extract_strided_slice %336 {offsets = [0, 256], sizes = [8, 128], strides = [1, 1]} : vector<8x384xf32> to vector<8x128xf32>
    %345 = math.tanh %343 : vector<8x128xf32>
    %346 = arith.mulf %344, %345 : vector<8x128xf32>
    %c5_i32 = arith.constant 5 : i32
    %347 = vector.broadcast %c5_i32 : i32 to vector<8x1xi32>
    %348 = arith.cmpi eq, %6, %347 : vector<8x1xi32>
    %349 = vector.shape_cast %348 : vector<8x1xi1> to vector<8x1xi1>
    %350 = vector.broadcast %349 : vector<8x1xi1> to vector<8x128xi1>
    %351 = arith.select %350, %346, %299 : vector<8x128xi1>, vector<8x128xf32>
    %352 = tpu.concatenate %327, %346 in 1 : vector<8x128xf32>, vector<8x128xf32> -> vector<8x256xf32>
    %353 = arith.truncf %352 : vector<8x256xf32> to vector<8x256xbf16>
    %c0_92 = arith.constant 0 : index
    %c0_93 = arith.constant 0 : index
    %354 = vector.load %arg4[%c0_92, %c0_93] : memref<256x1024xbf16, #tpu.memory_space<vmem>>, vector<256x1024xbf16>
    %cst_94 = arith.constant dense<0.000000e+00> : vector<8x1024xf32>
    %355 = tpu.matmul %353, %354, %cst_94 {dimension_numbers = #tpu.dot_dimension_numbers<[1], [0], [0], [1], [0, 0, 1, 1], [], []>} : vector<8x256xbf16>, vector<256x1024xbf16>, vector<8x1024xf32> -> vector<8x1024xf32>
    %c0_95 = arith.constant 0 : index
    %c0_96 = arith.constant 0 : index
    %356 = vector.load %arg5[%c0_95, %c0_96] : memref<1x1024xf32, #tpu.memory_space<vmem>>, vector<1x1024xf32>
    %357 = vector.broadcast %356 : vector<1x1024xf32> to vector<8x1024xf32>
    %358 = arith.addf %355, %357 : vector<8x1024xf32>
    %359 = vector.extract_strided_slice %358 {offsets = [0, 0], sizes = [8, 512], strides = [1, 1]} : vector<8x1024xf32> to vector<8x512xf32>
    %c56 = arith.constant 56 : index
    %c0_97 = arith.constant 0 : index
    %360 = vector.load %arg11[%c56, %c0_97] : memref<64x512xf32, #tpu.memory_space<vmem>>, vector<8x512xf32>
    %361 = arith.addf %359, %360 : vector<8x512xf32>
    %362 = vector.extract_strided_slice %361 {offsets = [0, 0], sizes = [8, 384], strides = [1, 1]} : vector<8x512xf32> to vector<8x384xf32>
    %cst_98 = arith.constant 5.000000e-01 : f32
    %363 = vector.broadcast %cst_98 : f32 to vector<8x384xf32>
    %364 = arith.mulf %363, %362 : vector<8x384xf32>
    %365 = math.tanh %364 : vector<8x384xf32>
    %cst_99 = arith.constant 5.000000e-01 : f32
    %366 = vector.broadcast %cst_99 : f32 to vector<8x384xf32>
    %367 = arith.mulf %366, %365 : vector<8x384xf32>
    %cst_100 = arith.constant 5.000000e-01 : f32
    %368 = vector.broadcast %cst_100 : f32 to vector<8x384xf32>
    %369 = arith.addf %367, %368 : vector<8x384xf32>
    %370 = vector.extract_strided_slice %361 {offsets = [0, 384], sizes = [8, 128], strides = [1, 1]} : vector<8x512xf32> to vector<8x128xf32>
    %371 = math.tanh %370 : vector<8x128xf32>
    %372 = vector.extract_strided_slice %369 {offsets = [0, 128], sizes = [8, 128], strides = [1, 1]} : vector<8x384xf32> to vector<8x128xf32>
    %373 = arith.mulf %372, %324 : vector<8x128xf32>
    %374 = vector.extract_strided_slice %369 {offsets = [0, 0], sizes = [8, 128], strides = [1, 1]} : vector<8x384xf32> to vector<8x128xf32>
    %375 = arith.mulf %374, %371 : vector<8x128xf32>
    %376 = arith.addf %373, %375 : vector<8x128xf32>
    %377 = vector.extract_strided_slice %369 {offsets = [0, 256], sizes = [8, 128], strides = [1, 1]} : vector<8x384xf32> to vector<8x128xf32>
    %378 = math.tanh %376 : vector<8x128xf32>
    %379 = arith.mulf %377, %378 : vector<8x128xf32>
    %380 = vector.extract_strided_slice %358 {offsets = [0, 512], sizes = [8, 512], strides = [1, 1]} : vector<8x1024xf32> to vector<8x512xf32>
    %381 = vector.extract_strided_slice %380 {offsets = [0, 0], sizes = [8, 384], strides = [1, 1]} : vector<8x512xf32> to vector<8x384xf32>
    %cst_101 = arith.constant 5.000000e-01 : f32
    %382 = vector.broadcast %cst_101 : f32 to vector<8x384xf32>
    %383 = arith.mulf %382, %381 : vector<8x384xf32>
    %384 = math.tanh %383 : vector<8x384xf32>
    %cst_102 = arith.constant 5.000000e-01 : f32
    %385 = vector.broadcast %cst_102 : f32 to vector<8x384xf32>
    %386 = arith.mulf %385, %384 : vector<8x384xf32>
    %cst_103 = arith.constant 5.000000e-01 : f32
    %387 = vector.broadcast %cst_103 : f32 to vector<8x384xf32>
    %388 = arith.addf %386, %387 : vector<8x384xf32>
    %389 = vector.extract_strided_slice %380 {offsets = [0, 384], sizes = [8, 128], strides = [1, 1]} : vector<8x512xf32> to vector<8x128xf32>
    %390 = math.tanh %389 : vector<8x128xf32>
    %391 = vector.extract_strided_slice %388 {offsets = [0, 128], sizes = [8, 128], strides = [1, 1]} : vector<8x384xf32> to vector<8x128xf32>
    %392 = arith.mulf %391, %343 : vector<8x128xf32>
    %393 = vector.extract_strided_slice %388 {offsets = [0, 0], sizes = [8, 128], strides = [1, 1]} : vector<8x384xf32> to vector<8x128xf32>
    %394 = arith.mulf %393, %390 : vector<8x128xf32>
    %395 = arith.addf %392, %394 : vector<8x128xf32>
    %396 = vector.extract_strided_slice %388 {offsets = [0, 256], sizes = [8, 128], strides = [1, 1]} : vector<8x384xf32> to vector<8x128xf32>
    %397 = math.tanh %395 : vector<8x128xf32>
    %398 = arith.mulf %396, %397 : vector<8x128xf32>
    %c6_i32 = arith.constant 6 : i32
    %399 = vector.broadcast %c6_i32 : i32 to vector<8x1xi32>
    %400 = arith.cmpi eq, %6, %399 : vector<8x1xi32>
    %401 = vector.shape_cast %400 : vector<8x1xi1> to vector<8x1xi1>
    %402 = vector.broadcast %401 : vector<8x1xi1> to vector<8x128xi1>
    %403 = arith.select %402, %398, %351 : vector<8x128xi1>, vector<8x128xf32>
    %404 = tpu.concatenate %379, %398 in 1 : vector<8x128xf32>, vector<8x128xf32> -> vector<8x256xf32>
    %405 = arith.truncf %404 : vector<8x256xf32> to vector<8x256xbf16>
    %c0_104 = arith.constant 0 : index
    %c0_105 = arith.constant 0 : index
    %406 = vector.load %arg4[%c0_104, %c0_105] : memref<256x1024xbf16, #tpu.memory_space<vmem>>, vector<256x1024xbf16>
    %cst_106 = arith.constant dense<0.000000e+00> : vector<8x1024xf32>
    %407 = tpu.matmul %405, %406, %cst_106 {dimension_numbers = #tpu.dot_dimension_numbers<[1], [0], [0], [1], [0, 0, 1, 1], [], []>} : vector<8x256xbf16>, vector<256x1024xbf16>, vector<8x1024xf32> -> vector<8x1024xf32>
    %c0_107 = arith.constant 0 : index
    %c0_108 = arith.constant 0 : index
    %408 = vector.load %arg5[%c0_107, %c0_108] : memref<1x1024xf32, #tpu.memory_space<vmem>>, vector<1x1024xf32>
    %409 = vector.broadcast %408 : vector<1x1024xf32> to vector<8x1024xf32>
    %410 = arith.addf %407, %409 : vector<8x1024xf32>
    %411 = vector.extract_strided_slice %410 {offsets = [0, 512], sizes = [8, 512], strides = [1, 1]} : vector<8x1024xf32> to vector<8x512xf32>
    %412 = vector.extract_strided_slice %411 {offsets = [0, 0], sizes = [8, 384], strides = [1, 1]} : vector<8x512xf32> to vector<8x384xf32>
    %cst_109 = arith.constant 5.000000e-01 : f32
    %413 = vector.broadcast %cst_109 : f32 to vector<8x384xf32>
    %414 = arith.mulf %413, %412 : vector<8x384xf32>
    %415 = math.tanh %414 : vector<8x384xf32>
    %cst_110 = arith.constant 5.000000e-01 : f32
    %416 = vector.broadcast %cst_110 : f32 to vector<8x384xf32>
    %417 = arith.mulf %416, %415 : vector<8x384xf32>
    %cst_111 = arith.constant 5.000000e-01 : f32
    %418 = vector.broadcast %cst_111 : f32 to vector<8x384xf32>
    %419 = arith.addf %417, %418 : vector<8x384xf32>
    %420 = vector.extract_strided_slice %411 {offsets = [0, 384], sizes = [8, 128], strides = [1, 1]} : vector<8x512xf32> to vector<8x128xf32>
    %421 = math.tanh %420 : vector<8x128xf32>
    %422 = vector.extract_strided_slice %419 {offsets = [0, 128], sizes = [8, 128], strides = [1, 1]} : vector<8x384xf32> to vector<8x128xf32>
    %423 = arith.mulf %422, %395 : vector<8x128xf32>
    %424 = vector.extract_strided_slice %419 {offsets = [0, 0], sizes = [8, 128], strides = [1, 1]} : vector<8x384xf32> to vector<8x128xf32>
    %425 = arith.mulf %424, %421 : vector<8x128xf32>
    %426 = arith.addf %423, %425 : vector<8x128xf32>
    %427 = vector.extract_strided_slice %419 {offsets = [0, 256], sizes = [8, 128], strides = [1, 1]} : vector<8x384xf32> to vector<8x128xf32>
    %428 = math.tanh %426 : vector<8x128xf32>
    %429 = arith.mulf %427, %428 : vector<8x128xf32>
    %c7_i32_112 = arith.constant 7 : i32
    %430 = vector.broadcast %c7_i32_112 : i32 to vector<8x1xi32>
    %431 = arith.cmpi eq, %6, %430 : vector<8x1xi32>
    %432 = vector.shape_cast %431 : vector<8x1xi1> to vector<8x1xi1>
    %433 = vector.broadcast %432 : vector<8x1xi1> to vector<8x128xi1>
    %434 = arith.select %433, %429, %403 : vector<8x128xi1>, vector<8x128xf32>
    %435 = arith.truncf %434 : vector<8x128xf32> to vector<8x128xbf16>
    %c0_113 = arith.constant 0 : index
    %c0_114 = arith.constant 0 : index
    %436 = vector.load %arg6[%c0_113, %c0_114] : memref<128x256xbf16, #tpu.memory_space<vmem>>, vector<128x256xbf16>
    %cst_115 = arith.constant dense<0.000000e+00> : vector<8x256xf32>
    %437 = tpu.matmul %435, %436, %cst_115 {dimension_numbers = #tpu.dot_dimension_numbers<[1], [0], [0], [1], [0, 0, 1, 1], [], []>} : vector<8x128xbf16>, vector<128x256xbf16>, vector<8x256xf32> -> vector<8x256xf32>
    %c0_116 = arith.constant 0 : index
    %c0_117 = arith.constant 0 : index
    %438 = vector.load %arg7[%c0_116, %c0_117] : memref<1x256xf32, #tpu.memory_space<vmem>>, vector<1x256xf32>
    %439 = vector.broadcast %438 : vector<1x256xf32> to vector<8x256xf32>
    %440 = arith.addf %437, %439 : vector<8x256xf32>
    %cst_118 = arith.constant 0.000000e+00 : f32
    %441 = vector.broadcast %cst_118 : f32 to vector<8x256xf32>
    %442 = arith.maximumf %440, %441 : vector<8x256xf32>
    %443 = arith.truncf %442 : vector<8x256xf32> to vector<8x256xbf16>
    %c0_119 = arith.constant 0 : index
    %c0_120 = arith.constant 0 : index
    %444 = vector.load %arg8[%c0_119, %c0_120] : memref<256x128xbf16, #tpu.memory_space<vmem>>, vector<256x128xbf16>
    %cst_121 = arith.constant dense<0.000000e+00> : vector<8x128xf32>
    %445 = tpu.matmul %443, %444, %cst_121 {dimension_numbers = #tpu.dot_dimension_numbers<[1], [0], [0], [1], [0, 0, 1, 1], [], []>} : vector<8x256xbf16>, vector<256x128xbf16>, vector<8x128xf32> -> vector<8x128xf32>
    %c0_122 = arith.constant 0 : index
    %c0_123 = arith.constant 0 : index
    %446 = vector.load %arg9[%c0_122, %c0_123] : memref<1x128xf32, #tpu.memory_space<vmem>>, vector<1x128xf32>
    %447 = vector.broadcast %446 : vector<1x128xf32> to vector<8x128xf32>
    %448 = arith.addf %445, %447 : vector<8x128xf32>
    %c0_124 = arith.constant 0 : index
    %c0_125 = arith.constant 0 : index
    %449 = vector.load %arg10[%c0_124, %c0_125] : memref<8x128xf32, #tpu.memory_space<vmem>>, vector<8x128xf32>
    tpu.vector_store %arg10[%c0_124, %c0_125], %448 {strides = array<i32>} : memref<8x128xf32, #tpu.memory_space<vmem>>, vector<8x128xf32>,
    return
  }
  func.func @transform_0(%arg0: i32) -> (i32, i32) {
    %c0_i32 = arith.constant 0 : i32
    %c0_i32_0 = arith.constant 0 : i32
    %c0_i32_1 = arith.constant 0 : i32
    return %c0_i32, %c0_i32_0 : i32, i32
  }
  func.func @transform_1(%arg0: i32) -> (i32, i32) {
    %c0_i32 = arith.constant 0 : i32
    %c0_i32_0 = arith.constant 0 : i32
    %c0_i32_1 = arith.constant 0 : i32
    return %c0_i32, %c0_i32_0 : i32, i32
  }
  func.func @transform_2(%arg0: i32) -> (i32, i32) {
    %c0_i32 = arith.constant 0 : i32
    %c0_i32_0 = arith.constant 0 : i32
    %c0_i32_1 = arith.constant 0 : i32
    return %c0_i32, %c0_i32_0 : i32, i32
  }
  func.func @transform_3(%arg0: i32) -> (i32, i32) {
    %c0_i32 = arith.constant 0 : i32
    %c0_i32_0 = arith.constant 0 : i32
    %c0_i32_1 = arith.constant 0 : i32
    return %c0_i32, %c0_i32_0 : i32, i32
  }
  func.func @transform_4(%arg0: i32) -> (i32, i32) {
    %c0_i32 = arith.constant 0 : i32
    %c0_i32_0 = arith.constant 0 : i32
    %c0_i32_1 = arith.constant 0 : i32
    return %c0_i32, %c0_i32_0 : i32, i32
  }
  func.func @transform_5(%arg0: i32) -> (i32, i32) {
    %c0_i32 = arith.constant 0 : i32
    %c0_i32_0 = arith.constant 0 : i32
    %c0_i32_1 = arith.constant 0 : i32
    return %c0_i32, %c0_i32_0 : i32, i32
  }
  func.func @transform_6(%arg0: i32) -> (i32, i32) {
    %c0_i32 = arith.constant 0 : i32
    %c0_i32_0 = arith.constant 0 : i32
    %c0_i32_1 = arith.constant 0 : i32
    return %c0_i32, %c0_i32_0 : i32, i32
  }
  func.func @transform_7(%arg0: i32) -> (i32, i32) {
    %c0_i32 = arith.constant 0 : i32
    %c0_i32_0 = arith.constant 0 : i32
    %c0_i32_1 = arith.constant 0 : i32
    return %c0_i32, %c0_i32_0 : i32, i32
  }
  func.func @transform_8(%arg0: i32) -> (i32, i32) {
    %c0_i32 = arith.constant 0 : i32
    %c0_i32_0 = arith.constant 0 : i32
    %c0_i32_1 = arith.constant 0 : i32
    return %c0_i32, %c0_i32_0 : i32, i32
  }
  func.func @transform_9(%arg0: i32) -> (i32, i32) {
    %c0_i32 = arith.constant 0 : i32
    %c0_i32_0 = arith.constant 0 : i32
    %c0_i32_1 = arith.constant 0 : i32
    return %c0_i32, %c0_i32_0 : i32, i32
  }
}

</mosaic_0001>

<bundles_post_ra>
// kernel: _lambda_.1
= control target key start
LH: loop header
LB: loop body
LE: loop exit
PB: predicated region body
PF: predicated region fallthrough
CT: control target
= control target key end

     0   :  { %v5624_v1 = vmov 0   ;;  %vm75_vm0 = vcmask 130048   ;;  %s5614_s2 = inlined_call_operand.vmem [shape: bf16[16,512], index: 2, kind: input, shape index: {}]   ;;  %s5615_s0 = inlined_call_operand.vmem [shape: f32[64,16], index: 0, kind: input, shape index: {}]   ;;  %s5616_s3 = inlined_call_operand.vmem [shape: bf16[256,1024], index: 3, kind: input, shape index: {}]   ;;  %s5617_s1 = inlined_call_operand.vmem [shape: s32[8,1], index: 1, kind: input, shape index: {}]   ;;  %s5618_s4 = inlined_call_operand.vmem [shape: f32[1,1024], index: 4, kind: input, shape index: {}]   ;;  %s5619_s5 = inlined_call_operand.vmem [shape: bf16[128,256], index: 5, kind: input, shape index: {}]   ;;  %s5620_s7 = inlined_call_operand.vmem [shape: bf16[256,128], index: 7, kind: input, shape index: {}]   ;;  %s5621_s6 = inlined_call_operand.vmem [shape: f32[1,256], index: 6, kind: input, shape index: {}]   ;;  %s5622_s8 = inlined_call_operand.vmem [shape: f32[1,128], index: 8, kind: input, shape index: {}]   ;;  %s5623_s9 = inlined_call_operand.vmem [shape: f32[8,128], index: 9, kind: output, shape index: {}]  }
   0x1   :  { %v3264_v0 = vld [vmem:[%s5614_s2 + $0x4] ss:$16 sps:$4 sm:$0xff]   ;;  %120 = vmatprep.mubr.bf16.mxu0 %v5624_v1  ;;  %193 = vmatprep.mubr.bf16.mxu1 %v5624_v1  ;;  %v3266_v2 = vld [vmem:[%s5614_s2 + $0xc] ss:$16 sps:$4 sm:$0xff]   ;;  %v3268_v3 = vld [vmem:[%s5614_s2] ss:$16 sps:$4 sm:$0xff]  }
   0x2   :  { %3262 = vset.pattern.permute.xlu0 %v5624_v1  ;;  %3263 = vset.pattern.permute.xlu1 %v5624_v1  ;;  %v3269_v4 = vld [vmem:[%s5614_s2 + $0x8] ss:$16 sps:$4 sm:$0xff]   ;;  %v39_v5 = vld [vmem:[%s5615_s0] sm:$0xff] }
   0x3   :  { %102 = vmatprep.subr.bf16.mxu0 %v3264_v0  ;;  %175 = vmatprep.subr.bf16.mxu1 %v3266_v2  ;;  %v40_v6 = vld [vmem:[%s5615_s0 + $0x8] sm:$0xff]  ;;  %v372_v7 = vld [vmem:[%s5616_s3 + $0x1c0] sm:$0xff] }
   0x4   :  { %v376_v8 = vld [vmem:[%s5616_s3 + $0x1e0] sm:$0xff]  ;;  %103 = vmatpush1.bf16.msra.mxu0 %v3268_v3  ;;  %176 = vmatpush1.bf16.msra.mxu1 %v3269_v4  ;;  %v47_v9 = vpack.c.bf16 %v40_v6, %v39_v5  ;;  %v373_v11 = vld [vmem:[%s5616_s3 + $0x1c8] sm:$0xff] }
   0x5   :  { %v3550_v10 = vcombine.high %v372_v7, %v376_v8  ;;  %v377_v12 = vld [vmem:[%s5616_s3 + $0x1e8] sm:$0xff]  ;;  %v3558_v13 = vcombine.low %v372_v7, %v376_v8  ;;  %v364_v14 = vld [vmem:[%s5616_s3 + $0x180] sm:$0xff] }
   0x6   :  { %v3563_v15 = vcombine.high %v373_v11, %v377_v12  ;;  %v3565_v16 = vcombine.low %v373_v11, %v377_v12  ;;  %v368_v17 = vld [vmem:[%s5616_s3 + $0x1a0] sm:$0xff]  ;;  %v365_v18 = vld [vmem:[%s5616_s3 + $0x188] sm:$0xff] }
   0x7   :  { %5931 = vst [vmem:[#allocation3_spill] sm:$0xff] %v3550_v10  ;;  %5932 = vst [vmem:[#allocation4_spill] sm:$0xff] %v3558_v13  ;;  %v369_v19 = vld [vmem:[%s5616_s3 + $0x1a8] sm:$0xff]  ;;  %1104 = vmatprep.subr.bf16.mxu0 %v3550_v10  ;;  %v3577_v20 = vcombine.high %v364_v14, %v368_v17  ;;  %v356_v22 = vld [vmem:[%s5616_s3 + $0x140] sm:$0xff]  ;;  %3069 = vmatmul.mubr.msk.bf16.vlgmr.msra.gmra.mxu0 %vm75_vm0, %v47_v9  ;;  %v3597_v26 = vcombine.low %v364_v14, %v368_v17 }
   0x8   :  { %5933 = vst [vmem:[#allocation5_spill] sm:$0xff] %v3563_v15  ;;  %5934 = vst [vmem:[#allocation6_spill] sm:$0xff] %v3565_v16  ;;  %v3579_v21 = vcombine.high %v365_v18, %v369_v19  ;;  %v360_v23 = vld [vmem:[%s5616_s3 + $0x160] sm:$0xff]  ;;  %3073 = vmatmul.mubr.msk.bf16.vlgmr.msra.gmra.mxu1 %vm75_vm0, %v47_v9  ;;  %v357_v24 = vld [vmem:[%s5616_s3 + $0x148] sm:$0xff]  ;;  %1145 = vmatprep.subr.bf16.mxu1 %v3563_v15  ;;  %v3601_v27 = vcombine.low %v365_v18, %v369_v19 }
   0x9   :  { %5935 = vst [vmem:[#allocation7_spill] sm:$0xff] %v3577_v20  ;;  %v361_v25 = vld [vmem:[%s5616_s3 + $0x168] sm:$0xff]  ;;  %1105 = vmatpush1.bf16.msra.mxu0 %v3558_v13  ;;  %5937 = vst [vmem:[#allocation9_spill] sm:$0xff] %v3597_v26  ;;  %1146 = vmatpush1.bf16.msra.mxu1 %v3565_v16  ;;  %v3603_v28 = vcombine.high %v356_v22, %v360_v23  ;;  %v348_v30 = vld [vmem:[%s5616_s3 + $0x100] sm:$0xff]  ;;  %v3623_v34 = vcombine.low %v356_v22, %v360_v23 }
   0xa   :  { %5936 = vst [vmem:[#allocation8_spill] sm:$0xff] %v3579_v21  ;;  %1106 = vmatprep.subr.bf16.mxu0 %v3577_v20  ;;  %5938 = vst [vmem:[#allocation10_spill] sm:$0xff] %v3601_v27  ;;  %1147 = vmatprep.subr.bf16.mxu1 %v3579_v21  ;;  %v3606_v29 = vcombine.high %v357_v24, %v361_v25  ;;  %v352_v31 = vld [vmem:[%s5616_s3 + $0x120] sm:$0xff]  ;;  %v349_v32 = vld [vmem:[%s5616_s3 + $0x108] sm:$0xff]  ;;  %v3627_v35 = vcombine.low %v357_v24, %v361_v25 }
   0xb   :  { %5939 = vst [vmem:[#allocation11_spill] sm:$0xff] %v3603_v28  ;;  %v353_v33 = vld [vmem:[%s5616_s3 + $0x128] sm:$0xff]  ;;  %130 = vmatprep.mubr.bf16.mxu0 %v5624_v1  ;;  %203 = vmatprep.mubr.bf16.mxu1 %v5624_v1  ;;  %5941 = vst [vmem:[#allocation13_spill] sm:$0xff] %v3623_v34  ;;  %v3629_v36 = vcombine.high %v348_v30, %v352_v31  ;;  %v340_v38 = vld [vmem:[%s5616_s3 + $0xc0] sm:$0xff]  ;;  %v3647_v42 = vcombine.low %v348_v30, %v352_v31 }
   0xc   :  { %5940 = vst [vmem:[#allocation12_spill] sm:$0xff] %v3606_v29  ;;  %5942 = vst [vmem:[#allocation14_spill] sm:$0xff] %v3627_v35  ;;  %v3632_v37 = vcombine.high %v349_v32, %v353_v33  ;;  %v344_v39 = vld [vmem:[%s5616_s3 + $0xe0] sm:$0xff]  ;;  %v341_v40 = vld [vmem:[%s5616_s3 + $0xc8] sm:$0xff]  ;;  %v3651_v43 = vcombine.low %v349_v32, %v353_v33 }
   0xd   :  { %1107 = vmatpush1.bf16.msra.mxu0 %v3597_v26  ;;  %1148 = vmatpush1.bf16.msra.mxu1 %v3601_v27  ;;  %5943 = vst [vmem:[#allocation15_spill] sm:$0xff] %v3629_v36  ;;  %v345_v41 = vld [vmem:[%s5616_s3 + $0xe8] sm:$0xff]  ;;  %5945 = vst [vmem:[#allocation17_spill] sm:$0xff] %v3647_v42  ;;  %v3653_v44 = vcombine.high %v340_v38, %v344_v39  ;;  %v3659_v46 = vcombine.low %v340_v38, %v344_v39  ;;  %v332_v48 = vld [vmem:[%s5616_s3 + $0x80] sm:$0xff] }
   0xe   :  { %1108 = vmatprep.subr.bf16.mxu0 %v3603_v28  ;;  %1149 = vmatprep.subr.bf16.mxu1 %v3606_v29  ;;  %5944 = vst [vmem:[#allocation16_spill] sm:$0xff] %v3632_v37  ;;  %5946 = vst [vmem:[#allocation18_spill] sm:$0xff] %v3651_v43  ;;  %v3656_v45 = vcombine.high %v341_v40, %v345_v41  ;;  %v3663_v47 = vcombine.low %v341_v40, %v345_v41  ;;  %v336_v49 = vld [vmem:[%s5616_s3 + $0xa0] sm:$0xff]  ;;  %v333_v50 = vld [vmem:[%s5616_s3 + $0x88] sm:$0xff] }
   0xf   :  { %5947 = vst [vmem:[#allocation19_spill] sm:$0xff] %v3653_v44  ;;  %5949 = vst [vmem:[#allocation21_spill] sm:$0xff] %v3659_v46  ;;  %v3677_v51 = vcombine.high %v332_v48, %v336_v49  ;;  %v337_v52 = vld [vmem:[%s5616_s3 + $0xa8] sm:$0xff]  ;;  %v3684_v54 = vcombine.low %v332_v48, %v336_v49  ;;  %v324_v56 = vld [vmem:[%s5616_s3 + $0x40] sm:$0xff] }
  0x10   :  { %5948 = vst [vmem:[#allocation20_spill] sm:$0xff] %v3656_v45  ;;  %5950 = vst [vmem:[#allocation22_spill] sm:$0xff] %v3663_v47  ;;  %v3682_v53 = vcombine.high %v333_v50, %v337_v52  ;;  %v3686_v55 = vcombine.low %v333_v50, %v337_v52  ;;  %v328_v57 = vld [vmem:[%s5616_s3 + $0x60] sm:$0xff]  ;;  %v325_v58 = vld [vmem:[%s5616_s3 + $0x48] sm:$0xff] }
  0x11   :  { %1109 = vmatpush1.bf16.msra.mxu0 %v3623_v34  ;;  %1150 = vmatpush1.bf16.msra.mxu1 %v3627_v35  ;;  %5951 = vst [vmem:[#allocation23_spill] sm:$0xff] %v3677_v51  ;;  %5953 = vst [vmem:[#allocation25_spill] sm:$0xff] %v3684_v54  ;;  %v3701_v59 = vcombine.high %v324_v56, %v328_v57  ;;  %v329_v60 = vld [vmem:[%s5616_s3 + $0x68] sm:$0xff]  ;;  %v3708_v62 = vcombine.low %v324_v56, %v328_v57  ;;  %v316_v0 = vld [vmem:[%s5616_s3] sm:$0xff] }
  0x12   :  { %1110 = vmatprep.subr.bf16.mxu0 %v3629_v36  ;;  %1151 = vmatprep.subr.bf16.mxu1 %v3632_v37  ;;  %5952 = vst [vmem:[#allocation24_spill] sm:$0xff] %v3682_v53  ;;  %5954 = vst [vmem:[#allocation26_spill] sm:$0xff] %v3686_v55  ;;  %v3706_v61 = vcombine.high %v325_v58, %v329_v60  ;;  %v3711_v63 = vcombine.low %v325_v58, %v329_v60  ;;  %v320_v2 = vld [vmem:[%s5616_s3 + $0x20] sm:$0xff]  ;;  %v317_v3 = vld [vmem:[%s5616_s3 + $0x8] sm:$0xff] }
  0x13   :  { %5955 = vst [vmem:[#allocation27_spill] sm:$0xff] %v3701_v59  ;;  %5957 = vst [vmem:[#allocation29_spill] sm:$0xff] %v3708_v62  ;;  %v3725_v4 = vcombine.high %v316_v0, %v320_v2  ;;  %v321_v5 = vld [vmem:[%s5616_s3 + $0x28] sm:$0xff]  ;;  %v3732_v7 = vcombine.low %v316_v0, %v320_v2  ;;  %v436_v9 = vld [vmem:[%s5616_s3 + $0x3c0] sm:$0xff] }
  0x14   :  { %5956 = vst [vmem:[#allocation28_spill] sm:$0xff] %v3706_v61  ;;  %5958 = vst [vmem:[#allocation30_spill] sm:$0xff] %v3711_v63  ;;  %v3730_v6 = vcombine.high %v317_v3, %v321_v5  ;;  %v3734_v8 = vcombine.low %v317_v3, %v321_v5  ;;  %v440_v11 = vld [vmem:[%s5616_s3 + $0x3e0] sm:$0xff]  ;;  %v437_v12 = vld [vmem:[%s5616_s3 + $0x3c8] sm:$0xff] }
  0x15   :  { %1111 = vmatpush1.bf16.msra.mxu0 %v3647_v42  ;;  %1152 = vmatpush1.bf16.msra.mxu1 %v3651_v43  ;;  %5959 = vst [vmem:[#allocation31_spill] sm:$0xff] %v3725_v4  ;;  %5961 = vst [vmem:[#allocation33_spill] sm:$0xff] %v3732_v7  ;;  %v3749_v14 = vcombine.high %v436_v9, %v440_v11  ;;  %v441_v17 = vld [vmem:[%s5616_s3 + $0x3e8] sm:$0xff]  ;;  %v3756_v19 = vcombine.low %v436_v9, %v440_v11  ;;  %v41_v23 = vld [vmem:[%s5615_s0 + $0x10] sm:$0xff] }
  0x16   :  { %1112 = vmatprep.subr.bf16.mxu0 %v3653_v44  ;;  %1153 = vmatprep.subr.bf16.mxu1 %v3656_v45  ;;  %5960 = vst [vmem:[#allocation32_spill] sm:$0xff] %v3730_v6  ;;  %5962 = vst [vmem:[#allocation34_spill] sm:$0xff] %v3734_v8  ;;  %v3754_v18 = vcombine.high %v437_v12, %v441_v17  ;;  %v3758_v22 = vcombine.low %v437_v12, %v441_v17  ;;  %v42_v24 = vld [vmem:[%s5615_s0 + $0x18] sm:$0xff]  ;;  %v428_v30 = vld [vmem:[%s5616_s3 + $0x380] sm:$0xff] }
  0x17   :  { %5963 = vst [vmem:[#allocation35_spill] sm:$0xff] %v3749_v14  ;;  %5965 = vst [vmem:[#allocation37_spill] sm:$0xff] %v3756_v19  ;;  %v48_v25 = vpack.c.bf16 %v42_v24, %v41_v23  ;;  %v432_v31 = vld [vmem:[%s5616_s3 + $0x3a0] sm:$0xff]  ;;  %v429_v32 = vld [vmem:[%s5616_s3 + $0x388] sm:$0xff] }
  0x18   :  { %5964 = vst [vmem:[#allocation36_spill] sm:$0xff] %v3754_v18  ;;  %5966 = vst [vmem:[#allocation38_spill] sm:$0xff] %v3758_v22  ;;  %v3779_v33 = vcombine.high %v428_v30, %v432_v31  ;;  %v433_v38 = vld [vmem:[%s5616_s3 + $0x3a8] sm:$0xff]  ;;  %v3787_v40 = vcombine.low %v428_v30, %v432_v31  ;;  %v420_v48 = vld [vmem:[%s5616_s3 + $0x340] sm:$0xff] }
  0x19   :  { %1113 = vmatpush1.bf16.msra.mxu0 %v3659_v46  ;;  %1154 = vmatpush1.bf16.msra.mxu1 %v3663_v47  ;;  %v3785_v39 = vcombine.high %v429_v32, %v433_v38  ;;  %v3789_v41 = vcombine.low %v429_v32, %v433_v38  ;;  %v424_v49 = vld [vmem:[%s5616_s3 + $0x360] sm:$0xff]  ;;  %v421_v50 = vld [vmem:[%s5616_s3 + $0x348] sm:$0xff] }
  0x1a   :  { %1114 = vmatprep.subr.bf16.mxu0 %v3677_v51  ;;  %1155 = vmatprep.subr.bf16.mxu1 %v3682_v53  ;;  %5967 = vst [vmem:[#allocation39_spill] sm:$0xff] %v3779_v33  ;;  %5969 = vst [vmem:[#allocation41_spill] sm:$0xff] %v3787_v40  ;;  %v3806_v52 = vcombine.high %v420_v48, %v424_v49  ;;  %v425_v56 = vld [vmem:[%s5616_s3 + $0x368] sm:$0xff]  ;;  %v3814_v58 = vcombine.low %v420_v48, %v424_v49  ;;  %v43_v0 = vld [vmem:[%s5615_s0 + $0x20] sm:$0xff] }
  0x1b   :  { %3070 = vmatmul.mubr.msk.bf16.gmra.mxu0 %vm75_vm0, %v48_v25  ;;  %5968 = vst [vmem:[#allocation40_spill] sm:$0xff] %v3785_v39  ;;  %5970 = vst [vmem:[#allocation42_spill] sm:$0xff] %v3789_v41  ;;  %3074 = vmatmul.mubr.msk.bf16.gmra.mxu1 %vm75_vm0, %v48_v25  ;;  %v3812_v57 = vcombine.high %v421_v50, %v425_v56  ;;  %v3816_v60 = vcombine.low %v421_v50, %v425_v56  ;;  %v44_v2 = vld [vmem:[%s5615_s0 + $0x28] sm:$0xff]  ;;  %v412_v5 = vld [vmem:[%s5616_s3 + $0x300] sm:$0xff] }
  0x1c   :  { %140 = vmatprep.mubr.bf16.mxu0 %v5624_v1  ;;  %5971 = vst [vmem:[#allocation43_spill] sm:$0xff] %v3806_v52  ;;  %213 = vmatprep.mubr.bf16.mxu1 %v5624_v1  ;;  %5973 = vst [vmem:[#allocation45_spill] sm:$0xff] %v3814_v58  ;;  %v49_v3 = vpack.c.bf16 %v44_v2, %v43_v0  ;;  %v416_v9 = vld [vmem:[%s5616_s3 + $0x320] sm:$0xff]  ;;  %v413_v11 = vld [vmem:[%s5616_s3 + $0x308] sm:$0xff] }
  0x1d   :  { %1115 = vmatpush1.bf16.msra.mxu0 %v3684_v54  ;;  %1156 = vmatpush1.bf16.msra.mxu1 %v3686_v55  ;;  %5972 = vst [vmem:[#allocation44_spill] sm:$0xff] %v3812_v57  ;;  %5974 = vst [vmem:[#allocation46_spill] sm:$0xff] %v3816_v60  ;;  %v3837_v12 = vcombine.high %v412_v5, %v416_v9  ;;  %v417_v17 = vld [vmem:[%s5616_s3 + $0x328] sm:$0xff]  ;;  %v3845_v24 = vcombine.low %v412_v5, %v416_v9  ;;  %v404_v30 = vld [vmem:[%s5616_s3 + $0x2c0] sm:$0xff] }
  0x1e   :  { %1116 = vmatprep.subr.bf16.mxu0 %v3701_v59  ;;  %1157 = vmatprep.subr.bf16.mxu1 %v3706_v61  ;;  %v3843_v23 = vcombine.high %v413_v11, %v417_v17  ;;  %v3847_v25 = vcombine.low %v413_v11, %v417_v17  ;;  %v408_v31 = vld [vmem:[%s5616_s3 + $0x2e0] sm:$0xff]  ;;  %v405_v32 = vld [vmem:[%s5616_s3 + $0x2c8] sm:$0xff]  ;;  %v45_v0 = vld [vmem:[%s5615_s0 + $0x30] sm:$0xff] }
  0x1f   :  { %5975 = vst [vmem:[#allocation47_spill] sm:$0xff] %v3837_v12  ;;  %5977 = vst [vmem:[#allocation49_spill] sm:$0xff] %v3845_v24  ;;  %v3864_v38 = vcombine.high %v404_v30, %v408_v31  ;;  %v409_v48 = vld [vmem:[%s5616_s3 + $0x2e8] sm:$0xff]  ;;  %v3872_v50 = vcombine.low %v404_v30, %v408_v31  ;;  %v46_v2 = vld [vmem:[%s5615_s0 + $0x38] sm:$0xff] }
  0x20   :  { %5976 = vst [vmem:[#allocation48_spill] sm:$0xff] %v3843_v23  ;;  %5978 = vst [vmem:[#allocation50_spill] sm:$0xff] %v3847_v25  ;;  %v3870_v49 = vcombine.high %v405_v32, %v409_v48  ;;  %v3874_v56 = vcombine.low %v405_v32, %v409_v48  ;;  %v50_v5 = vpack.c.bf16 %v46_v2, %v45_v0  ;;  %v400_v9 = vld [vmem:[%s5616_s3 + $0x2a0] sm:$0xff]  ;;  %v397_v11 = vld [vmem:[%s5616_s3 + $0x288] sm:$0xff] }
  0x21   :  { %1117 = vmatpush1.bf16.msra.mxu0 %v3708_v62  ;;  %1158 = vmatpush1.bf16.msra.mxu1 %v3711_v63  ;;  %5979 = vst [vmem:[#allocation51_spill] sm:$0xff] %v3864_v38  ;;  %5981 = vst [vmem:[#allocation53_spill] sm:$0xff] %v3872_v50  ;;  %v401_v17 = vld [vmem:[%s5616_s3 + $0x2a8] sm:$0xff]  ;;  %v388_v48 = vld [vmem:[%s5616_s3 + $0x240] sm:$0xff] }
  0x22   :  { %1118 = vmatprep.subr.bf16.mxu0 %v3725_v4  ;;  %1159 = vmatprep.subr.bf16.mxu1 %v3730_v6  ;;  %5980 = vst [vmem:[#allocation52_spill] sm:$0xff] %v3870_v49  ;;  %5982 = vst [vmem:[#allocation54_spill] sm:$0xff] %v3874_v56  ;;  %v3899_v31 = vcombine.high %v397_v11, %v401_v17  ;;  %v392_v0 = vld [vmem:[%s5616_s3 + $0x260] sm:$0xff]  ;;  %v389_v2 = vld [vmem:[%s5616_s3 + $0x248] sm:$0xff] }
  0x23   :  { %3071 = vmatmul.mubr.msk.bf16.gmra.mxu0 %vm75_vm0, %v49_v3  ;;  %3075 = vmatmul.mubr.msk.bf16.gmra.mxu1 %vm75_vm0, %v49_v3  ;;  %v396_v3 = vld [vmem:[%s5616_s3 + $0x280] sm:$0xff] }
  0x24   :  { %150 = vmatprep.mubr.bf16.mxu0 %v5624_v1  ;;  %223 = vmatprep.mubr.bf16.mxu1 %v5624_v1  ;;  %v3897_v30 = vcombine.high %v396_v3, %v400_v9  ;;  %5984 = vst [vmem:[#allocation56_spill] sm:$0xff] %v3899_v31  ;;  %v3901_v32 = vcombine.low %v396_v3, %v400_v9  ;;  %v393_v3 = vld [vmem:[%s5616_s3 + $0x268] sm:$0xff] }
  0x25   :  { %1119 = vmatpush1.bf16.msra.mxu0 %v3732_v7  ;;  %1160 = vmatpush1.bf16.msra.mxu1 %v3734_v8  ;;  %v3913_v1 = vcombine.low %v397_v11, %v401_v17  ;;  %v3922_v9 = vcombine.high %v389_v2, %v393_v3  ;;  %v384_v11 = vld [vmem:[%s5616_s3 + $0x220] sm:$0xff]  ;;  %v381_v17 = vld [vmem:[%s5616_s3 + $0x208] sm:$0xff] }
  0x26   :  { %1120 = vmatprep.subr.bf16.mxu0 %v3749_v14  ;;  %1161 = vmatprep.subr.bf16.mxu1 %v3754_v18  ;;  %5983 = vst [vmem:[#allocation55_spill] sm:$0xff] %v3897_v30  ;;  %5985 = vst [vmem:[#allocation57_spill] sm:$0xff] %v3901_v32 }
  0x27   :  { %5986 = vst [vmem:[#allocation58_spill] sm:$0xff] %v3913_v1  ;;  %5988 = vst [vmem:[#allocation60_spill] sm:$0xff] %v3922_v9 }
  0x29   :  { %1121 = vmatpush2.bf16.msra.mxu0 %v3756_v19  ;;  %1162 = vmatpush2.bf16.msra.mxu1 %v3758_v22 }
  0x2a   :  { %1122 = vmatprep.subr.bf16.mxu0 %v3779_v33  ;;  %1163 = vmatprep.subr.bf16.mxu1 %v3785_v39 }
  0x2b   :  { %3072 = vmatmul.mubr.msk.bf16.gmra.mxu0 %vm75_vm0, %v50_v5  ;;  %3076 = vmatmul.mubr.msk.bf16.gmra.mxu1 %vm75_vm0, %v50_v5  ;;  %v3944_v5 = vcombine.low %v389_v2, %v393_v3  ;;  %v375_v2 = vld [vmem:[%s5616_s3 + $0x1d8] sm:$0xff] }
  0x2c   :  { %v379_v3 = vld [vmem:[%s5616_s3 + $0x1f8] sm:$0xff] }
  0x2d   :  { %1123 = vmatpush2.bf16.msra.mxu0 %v3787_v40  ;;  %1164 = vmatpush2.bf16.msra.mxu1 %v3789_v41  ;;  %5990 = vst [vmem:[#allocation62_spill] sm:$0xff] %v3944_v5 }
  0x2e   :  { %1124 = vmatprep.subr.bf16.mxu0 %v3806_v52  ;;  %1165 = vmatprep.subr.bf16.mxu1 %v3812_v57 }
  0x31   :  { %1125 = vmatpush2.bf16.msra.mxu0 %v3814_v58  ;;  %1166 = vmatpush2.bf16.msra.mxu1 %v3816_v60 }
  0x32   :  { %1126 = vmatprep.subr.bf16.mxu0 %v3837_v12  ;;  %1167 = vmatprep.subr.bf16.mxu1 %v3843_v23 }
  0x35   :  { %1127 = vmatpush2.bf16.msra.mxu0 %v3845_v24  ;;  %1168 = vmatpush2.bf16.msra.mxu1 %v3847_v25 }
  0x36   :  { %1128 = vmatprep.subr.bf16.mxu0 %v3864_v38  ;;  %1169 = vmatprep.subr.bf16.mxu1 %v3870_v49  ;;  %v380_v49 = vld [vmem:[%s5616_s3 + $0x200] sm:$0xff]  ;;  %v5642_v38 = vmov 0.0|0.0  }
  0x37   :  { %1136 = vmatprep.mubr.bf16.mxu0 %v5642_v38  ;;  %1177 = vmatprep.mubr.bf16.mxu1 %v5642_v38 }
  0x39   :  { %1129 = vmatpush2.bf16.msra.mxu0 %v3872_v50  ;;  %1170 = vmatpush2.bf16.msra.mxu1 %v3874_v56  ;;  %v3915_v50 = vcombine.high %v388_v48, %v392_v0  ;;  %v3939_v56 = vcombine.low %v388_v48, %v392_v0  ;;  %v374_v48 = vld [vmem:[%s5616_s3 + $0x1d0] sm:$0xff] }
  0x3a   :  { %1130 = vmatprep.subr.bf16.mxu0 %v3897_v30  ;;  %1171 = vmatprep.subr.bf16.mxu1 %v3899_v31  ;;  %v385_v30 = vld [vmem:[%s5616_s3 + $0x228] sm:$0xff]  ;;  %v3946_v31 = vcombine.high %v380_v49, %v384_v11  ;;  %v378_v0 = vld [vmem:[%s5616_s3 + $0x1f0] sm:$0xff] }
  0x3b   :  { %5987 = vst [vmem:[#allocation59_spill] sm:$0xff] %v3915_v50  ;;  %5989 = vst [vmem:[#allocation61_spill] sm:$0xff] %v3939_v56  ;;  %v3949_v25 = vcombine.high %v381_v17, %v385_v30  ;;  %v3969_v38 = vcombine.low %v381_v17, %v385_v30  ;;  %v33_v30 = vld [vmem:[%s5617_s1] sm:$0xff]  ;;  %v268_v17 = vlaneseq }
  0x3c   :  { %5991 = vst [vmem:[#allocation63_spill] sm:$0xff] %v3946_v31 }
  0x3d   :  { %1131 = vmatpush2.bf16.msra.mxu0 %v3901_v32  ;;  %1172 = vmatpush2.bf16.msra.mxu1 %v3913_v1  ;;  %5992 = vst [vmem:[#allocation64_spill] sm:$0xff] %v3949_v25  ;;  %5994 = vst [vmem:[#allocation66_spill] sm:$0xff] %v3969_v38  ;;  %v3974_v1 = vcombine.high %v375_v2, %v379_v3 }
  0x3e   :  { %1132 = vmatprep.subr.bf16.mxu0 %v3915_v50  ;;  %1173 = vmatprep.subr.bf16.mxu1 %v3922_v9  ;;  %v3965_v9 = vcombine.low %v380_v49, %v384_v11  ;;  %v3971_v50 = vcombine.high %v374_v48, %v378_v0  ;;  %v3980_v49 = vcombine.low %v374_v48, %v378_v0 }
  0x3f   :  { %5996 = vst [vmem:[#allocation68_spill] sm:$0xff] %v3974_v1  ;;  %v3982_v11 = vcombine.low %v375_v2, %v379_v3  ;;  %v3997_v2 = vld [vmem:[%s5618_s4] sm:$0xff] }
  0x40   :  { %5993 = vst [vmem:[#allocation65_spill] sm:$0xff] %v3965_v9  ;;  %5995 = vst [vmem:[#allocation67_spill] sm:$0xff] %v3971_v50 }
  0x41   :  { %1133 = vmatpush2.bf16.msra.mxu0 %v3939_v56  ;;  %1174 = vmatpush2.bf16.msra.mxu1 %v3944_v5  ;;  %5997 = vst [vmem:[#allocation69_spill] sm:$0xff] %v3980_v49  ;;  %5998 = vst [vmem:[#allocation70_spill] sm:$0xff] %v3982_v11  ;;  %v3987_v5 = vshrl.u32 %v268_v17, 7 }
  0x42   :  { %1134 = vmatprep.subr.bf16.mxu0 %v3946_v31  ;;  %1175 = vmatprep.subr.bf16.mxu1 %v3949_v25  ;;  %v3064_v25 = vadd.s32 4294967295, %v33_v30 }
  0x43   :  { %5999 = vst [vmem:[#allocation71_spill] sm:$0xff] %v3987_v5  ;;  %v5666_v0 = vsub.s32 0, %v3987_v5  ;;  %v5673_v3 = vsub.s32 1, %v3987_v5  ;;  %v278_v32 = vsub.s32 2, %v3987_v5 }
  0x44   :  { %vm35_vm1 = vcmp.gt.s32.totalorder %v3064_v25, 0 }
  0x45   :  { %1135 = vmatpush2.bf16.msra.mxu0 %v3965_v9  ;;  %1176 = vmatpush2.bf16.msra.mxu1 %v3969_v38  ;;  %v36_v31 = vsel %vm35_vm1, %v3064_v25, 0  ;;  %v4003_v25 = vrot.slane %v3997_v2, %v5666_v0  ;;  %v4009_v30 = vrot.slane %v3997_v2, %v5673_v3  ;;  %v4019_v3 = vrot.slane %v3997_v2, %v278_v32 }
  0x46   :  { %1186 = vmatprep.subr.bf16.mxu0 %v3971_v50  ;;  %1227 = vmatprep.subr.bf16.mxu1 %v3974_v1  ;;  %vm37_vm2 = vcmp.lt.s32.totalorder %v36_v31, 7  ;;  %v6001_v1 = vmov 0  }
  0x47   :  { %v3989_v38 = vsel %vm37_vm2, %v36_v31, 7  ;;  %6002 = vst [vmem:[#allocation73_spill] sm:$0xff] %v4003_v25  ;;  %v282_v31 = vsub.s32 3, %v3987_v5  ;;  %6003 = vst [vmem:[#allocation74_spill] sm:$0xff] %v4009_v30 }
  0x48   :  { %6000 = vst [vmem:[#allocation72_spill] sm:$0xff] %v3989_v38  ;;  %vm1312_vm3 = vcmp.eq.s32.totalorder %v3989_v38, 0  ;;  %6005 = vst [vmem:[#allocation76_spill] sm:$0xff] %v4019_v3 }
  0x49   :  { %v1313_v48 = vsel %vm1312_vm3, 1, %v6001_v1  ;;  %v4013_v38 = vrot.slane %v3997_v2, %v282_v31 }
  0x4a   :  { %1315 = vperm.xlu0 %3262, %v1313_v48  }
  0x4b   :  { %6004 = vst [vmem:[#allocation75_spill] sm:$0xff] %v4013_v38 }
  0xc7   :  { %v122_v17 = vpop.f32.mrf.mxu0 }
  0xc8   :  { %v195_v48 = vpop.f32.mrf.mxu1  ;;  %v292_v1 = vadd.f32 %v4003_v25, %v122_v17 }
  0xc9   :  { %v124_v50 = vpop.f32.mrf.mxu0  ;;  %v294_v17 = vadd.f32 %v4019_v3, %v195_v48 }
  0xca   :  { %v296_v9 = vmul.f32 0.5, %v292_v1  ;;  %v293_v56 = vadd.f32 %v4009_v30, %v124_v50  ;;  %v197_v0 = vpop.f32.mrf.mxu1 }
  0xcb   :  { %v295_v23 = vadd.f32 %v4013_v38, %v197_v0  ;;  %v298_v31 = vmul.f32 0.5, %v294_v17  ;;  %v366_v0 = vld [vmem:[%s5616_s3 + $0x190] sm:$0xff] }
  0xcc   :  { %3310 = vtanh.f32 %v296_v9  ;;  %v297_v24 = vmul.f32 0.5, %v293_v56 }
  0xce   :  { %3312 = vtanh.f32 %v297_v24 }
  0xcf   :  { %3314 = vtanh.f32 %v295_v23 }
  0xd0   :  { %3316 = vtanh.f32 %v298_v31 }
  0xd9   :  { %v3311_v25 = vpop.eup %3310 }
  0xda   :  { %v302_v12 = vmul.f32 0.5, %v3311_v25 }
  0xdb   :  { %v3313_v1 = vpop.eup %3312 }
  0xdc   :  { %v305_v60 = vadd.f32 0.5, %v302_v12  ;;  %v303_v50 = vmul.f32 0.5, %v3313_v1  ;;  %v3315_v9 = vpop.eup %3314  ;;  %v370_v12 = vld [vmem:[%s5616_s3 + $0x1b0] sm:$0xff] }
  0xdd   :  { %v3317_v24 = vpop.eup %3316  ;;  %v4039_v17 = vcombine.high %v366_v0, %v370_v12  ;;  %v358_v1 = vld [vmem:[%s5616_s3 + $0x150] sm:$0xff] }
  0xde   :  { %v306_v30 = vadd.f32 0.5, %v303_v50  ;;  %v310_v56 = vmul.f32 %v3315_v9, %v305_v60  ;;  %v304_v32 = vmul.f32 0.5, %v3317_v24  ;;  %v367_v60 = vld [vmem:[%s5616_s3 + $0x198] sm:$0xff]  ;;  %v362_v50 = vld [vmem:[%s5616_s3 + $0x170] sm:$0xff]  ;;  %v4059_v24 = vcombine.low %v366_v0, %v370_v12 }
  0xdf   :  { %6006 = vst [vmem:[#allocation77_spill] sm:$0xff] %v4039_v17  ;;  %v359_v9 = vld [vmem:[%s5616_s3 + $0x158] sm:$0xff] }
  0xe0   :  { %v309_v5 = vmul.f32 0.0, %v306_v30  ;;  %v307_v23 = vadd.f32 0.5, %v304_v32  ;;  %6008 = vst [vmem:[#allocation79_spill] sm:$0xff] %v4059_v24  ;;  %v351_v0 = vld [vmem:[%s5616_s3 + $0x118] sm:$0xff] }
  0xe1   :  { %v355_v12 = vld [vmem:[%s5616_s3 + $0x138] sm:$0xff] }
  0xe2   :  { %v4022_v58 = vadd.f32 %v310_v56, %v309_v5  ;;  %v371_v5 = vld [vmem:[%s5616_s3 + $0x1b8] sm:$0xff] }
  0xe3   :  { %v4041_v31 = vcombine.high %v367_v60, %v371_v5  ;;  %v363_v56 = vld [vmem:[%s5616_s3 + $0x178] sm:$0xff]  ;;  %v4061_v32 = vcombine.low %v367_v60, %v371_v5  ;;  %v6012_v60 = vmov 0.0|0.0   ;;  %v4085_v5 = vcombine.low %v358_v1, %v362_v50 }
  0xe4   :  { %3318 = vtanh.f32 %v4022_v58 }
  0xe5   :  { %6007 = vst [vmem:[#allocation78_spill] sm:$0xff] %v4041_v31  ;;  %6009 = vst [vmem:[#allocation80_spill] sm:$0xff] %v4061_v32 }
  0xe6   :  { %6013 = vst [vmem:[#allocation83_spill] sm:$0xff] %v4085_v5 }
  0xf1   :  { %v3319_v25 = vpop.eup %3318 }
  0xf2   :  { %v313_v30 = vmul.f32 %v3319_v25, %v307_v23  ;;  %v4065_v23 = vcombine.high %v358_v1, %v362_v50  ;;  %v4067_v25 = vcombine.high %v359_v9, %v363_v56  ;;  %v343_v1 = vld [vmem:[%s5616_s3 + $0xd8] sm:$0xff] }
  0xf3   :  { %v347_v50 = vld [vmem:[%s5616_s3 + $0xf8] sm:$0xff] }
  0xf4   :  { %v4037_v48 = vpack.c.bf16 %v313_v30, %v313_v30  ;;  %6010 = vst [vmem:[#allocation81_spill] sm:$0xff] %v4065_v23  ;;  %6011 = vst [vmem:[#allocation82_spill] sm:$0xff] %v4067_v25  ;;  %v350_v30 = vld [vmem:[%s5616_s3 + $0x110] sm:$0xff] }
  0xf6   :  { %1137 = vmatmul.mubr.bf16.vlgmr.msra.gmra.mxu0 %v4037_v48  ;;  %1178 = vmatmul.mubr.bf16.vlgmr.msra.gmra.mxu1 %v4037_v48 }
  0xf7   :  { %1187 = vmatpush1.bf16.msra.mxu0 %v3980_v49  ;;  %1228 = vmatpush1.bf16.msra.mxu1 %v3982_v11  ;;  %v354_v11 = vld [vmem:[%s5616_s3 + $0x130] sm:$0xff]  ;;  %v4093_v49 = vcombine.high %v351_v0, %v355_v12 }
  0xf8   :  { %1188 = vmatprep.subr.bf16.mxu0 %v4039_v17  ;;  %1229 = vmatprep.subr.bf16.mxu1 %v4041_v31  ;;  %v4087_v31 = vcombine.low %v359_v9, %v363_v56  ;;  %v4091_v17 = vcombine.high %v350_v30, %v354_v11  ;;  %v4109_v9 = vcombine.low %v350_v30, %v354_v11  ;;  %v335_v11 = vld [vmem:[%s5616_s3 + $0x98] sm:$0xff] }
  0xf9   :  { %1218 = vmatprep.mubr.bf16.mxu0 %v6012_v60  ;;  %1259 = vmatprep.mubr.bf16.mxu1 %v6012_v60  ;;  %6016 = vst [vmem:[#allocation86_spill] sm:$0xff] %v4093_v49  ;;  %v342_v60 = vld [vmem:[%s5616_s3 + $0xd0] sm:$0xff]  ;;  %v4111_v56 = vcombine.low %v351_v0, %v355_v12  ;;  %v339_v30 = vld [vmem:[%s5616_s3 + $0xb8] sm:$0xff]  ;;  %v4135_v12 = vcombine.low %v343_v1, %v347_v50 }
  0xfa   :  { %6014 = vst [vmem:[#allocation84_spill] sm:$0xff] %v4087_v31  ;;  %6015 = vst [vmem:[#allocation85_spill] sm:$0xff] %v4091_v17 }
  0xfb   :  { %1189 = vmatpush1.bf16.msra.mxu0 %v4059_v24  ;;  %1230 = vmatpush1.bf16.msra.mxu1 %v4061_v32  ;;  %v346_v32 = vld [vmem:[%s5616_s3 + $0xf0] sm:$0xff]  ;;  %6017 = vst [vmem:[#allocation87_spill] sm:$0xff] %v4109_v9  ;;  %6018 = vst [vmem:[#allocation88_spill] sm:$0xff] %v4111_v56 }
  0xfc   :  { %1190 = vmatprep.subr.bf16.mxu0 %v4065_v23  ;;  %1231 = vmatprep.subr.bf16.mxu1 %v4067_v25  ;;  %v4115_v25 = vcombine.high %v342_v60, %v346_v32  ;;  %v4117_v23 = vcombine.high %v343_v1, %v347_v50  ;;  %v334_v24 = vld [vmem:[%s5616_s3 + $0x90] sm:$0xff]  ;;  %v4133_v0 = vcombine.low %v342_v60, %v346_v32  ;;  %v327_v32 = vld [vmem:[%s5616_s3 + $0x58] sm:$0xff] }
  0xfd   :  { %6022 = vst [vmem:[#allocation92_spill] sm:$0xff] %v4135_v12  ;;  %v331_v60 = vld [vmem:[%s5616_s3 + $0x78] sm:$0xff]  ;;  %v4159_v50 = vcombine.low %v335_v11, %v339_v30 }
  0xfe   :  { %6019 = vst [vmem:[#allocation89_spill] sm:$0xff] %v4115_v25  ;;  %6020 = vst [vmem:[#allocation90_spill] sm:$0xff] %v4117_v23 }
  0xff   :  { %1191 = vmatpush1.bf16.msra.mxu0 %v4085_v5  ;;  %1232 = vmatpush1.bf16.msra.mxu1 %v4087_v31  ;;  %v338_v31 = vld [vmem:[%s5616_s3 + $0xb0] sm:$0xff]  ;;  %6021 = vst [vmem:[#allocation91_spill] sm:$0xff] %v4133_v0  ;;  %6026 = vst [vmem:[#allocation96_spill] sm:$0xff] %v4159_v50 }
 0x100   :  { %1192 = vmatprep.subr.bf16.mxu0 %v4091_v17  ;;  %1233 = vmatprep.subr.bf16.mxu1 %v4093_v49  ;;  %v4139_v49 = vcombine.high %v334_v24, %v338_v31  ;;  %v4141_v17 = vcombine.high %v335_v11, %v339_v30  ;;  %v326_v5 = vld [vmem:[%s5616_s3 + $0x50] sm:$0xff]  ;;  %v4157_v1 = vcombine.low %v334_v24, %v338_v31  ;;  %v319_v31 = vld [vmem:[%s5616_s3 + $0x18] sm:$0xff] }
 0x101   :  { %v323_v24 = vld [vmem:[%s5616_s3 + $0x38] sm:$0xff]  ;;  %v4183_v30 = vcombine.low %v327_v32, %v331_v60 }
 0x102   :  { %6023 = vst [vmem:[#allocation93_spill] sm:$0xff] %v4139_v49  ;;  %6024 = vst [vmem:[#allocation94_spill] sm:$0xff] %v4141_v17 }
 0x103   :  { %1193 = vmatpush1.bf16.msra.mxu0 %v4109_v9  ;;  %1234 = vmatpush1.bf16.msra.mxu1 %v4111_v56  ;;  %v330_v56 = vld [vmem:[%s5616_s3 + $0x70] sm:$0xff]  ;;  %6025 = vst [vmem:[#allocation95_spill] sm:$0xff] %v4157_v1  ;;  %6030 = vst [vmem:[#allocation100_spill] sm:$0xff] %v4183_v30 }
 0x104   :  { %1194 = vmatprep.subr.bf16.mxu0 %v4115_v25  ;;  %1235 = vmatprep.subr.bf16.mxu1 %v4117_v23  ;;  %v4163_v23 = vcombine.high %v326_v5, %v330_v56  ;;  %v4165_v25 = vcombine.high %v327_v32, %v331_v60  ;;  %v318_v9 = vld [vmem:[%s5616_s3 + $0x10] sm:$0xff]  ;;  %v4181_v11 = vcombine.low %v326_v5, %v330_v56  ;;  %v439_v5 = vld [vmem:[%s5616_s3 + $0x3d8] sm:$0xff] }
 0x105   :  { %v443_v56 = vld [vmem:[%s5616_s3 + $0x3f8] sm:$0xff]  ;;  %v4207_v60 = vcombine.low %v319_v31, %v323_v24 }
 0x106   :  { %6027 = vst [vmem:[#allocation97_spill] sm:$0xff] %v4163_v23  ;;  %6028 = vst [vmem:[#allocation98_spill] sm:$0xff] %v4165_v25 }
 0x107   :  { %1195 = vmatpush1.bf16.msra.mxu0 %v4133_v0  ;;  %1236 = vmatpush1.bf16.msra.mxu1 %v4135_v12  ;;  %v322_v12 = vld [vmem:[%s5616_s3 + $0x30] sm:$0xff]  ;;  %6029 = vst [vmem:[#allocation99_spill] sm:$0xff] %v4181_v11  ;;  %6034 = vst [vmem:[#allocation104_spill] sm:$0xff] %v4207_v60 }
 0x108   :  { %1196 = vmatprep.subr.bf16.mxu0 %v4139_v49  ;;  %1237 = vmatprep.subr.bf16.mxu1 %v4141_v17  ;;  %v4187_v17 = vcombine.high %v318_v9, %v322_v12  ;;  %v4189_v49 = vcombine.high %v319_v31, %v323_v24  ;;  %v438_v0 = vld [vmem:[%s5616_s3 + $0x3d0] sm:$0xff]  ;;  %v4205_v32 = vcombine.low %v318_v9, %v322_v12  ;;  %v431_v9 = vld [vmem:[%s5616_s3 + $0x398] sm:$0xff] }
 0x109   :  { %v435_v12 = vld [vmem:[%s5616_s3 + $0x3b8] sm:$0xff]  ;;  %v4231_v24 = vcombine.low %v439_v5, %v443_v56 }
 0x10a   :  { %6031 = vst [vmem:[#allocation101_spill] sm:$0xff] %v4187_v17  ;;  %6032 = vst [vmem:[#allocation102_spill] sm:$0xff] %v4189_v49 }
 0x10b   :  { %1197 = vmatpush1.bf16.msra.mxu0 %v4157_v1  ;;  %1238 = vmatpush1.bf16.msra.mxu1 %v4159_v50  ;;  %v442_v50 = vld [vmem:[%s5616_s3 + $0x3f0] sm:$0xff]  ;;  %6033 = vst [vmem:[#allocation103_spill] sm:$0xff] %v4205_v32  ;;  %6038 = vst [vmem:[#allocation108_spill] sm:$0xff] %v4231_v24 }
 0x10c   :  { %1198 = vmatprep.subr.bf16.mxu0 %v4163_v23  ;;  %1239 = vmatprep.subr.bf16.mxu1 %v4165_v25  ;;  %v4211_v25 = vcombine.high %v438_v0, %v442_v50  ;;  %v4213_v23 = vcombine.high %v439_v5, %v443_v56  ;;  %v430_v1 = vld [vmem:[%s5616_s3 + $0x390] sm:$0xff]  ;;  %v4229_v31 = vcombine.low %v438_v0, %v442_v50  ;;  %v423_v0 = vld [vmem:[%s5616_s3 + $0x358] sm:$0xff] }
 0x10d   :  { %v427_v50 = vld [vmem:[%s5616_s3 + $0x378] sm:$0xff]  ;;  %v4255_v56 = vcombine.low %v431_v9, %v435_v12 }
 0x10e   :  { %6035 = vst [vmem:[#allocation105_spill] sm:$0xff] %v4211_v25  ;;  %6036 = vst [vmem:[#allocation106_spill] sm:$0xff] %v4213_v23 }
 0x10f   :  { %1199 = vmatpush1.bf16.msra.mxu0 %v4181_v11  ;;  %1240 = vmatpush1.bf16.msra.mxu1 %v4183_v30  ;;  %v434_v30 = vld [vmem:[%s5616_s3 + $0x3b0] sm:$0xff]  ;;  %6037 = vst [vmem:[#allocation107_spill] sm:$0xff] %v4229_v31  ;;  %6042 = vst [vmem:[#allocation112_spill] sm:$0xff] %v4255_v56 }
 0x110   :  { %1200 = vmatprep.subr.bf16.mxu0 %v4187_v17  ;;  %1241 = vmatprep.subr.bf16.mxu1 %v4189_v49  ;;  %v4235_v49 = vcombine.high %v430_v1, %v434_v30  ;;  %v4237_v17 = vcombine.high %v431_v9, %v435_v12  ;;  %v422_v11 = vld [vmem:[%s5616_s3 + $0x350] sm:$0xff]  ;;  %v4253_v5 = vcombine.low %v430_v1, %v434_v30  ;;  %v415_v1 = vld [vmem:[%s5616_s3 + $0x318] sm:$0xff] }
 0x111   :  { %v419_v30 = vld [vmem:[%s5616_s3 + $0x338] sm:$0xff]  ;;  %v4279_v12 = vcombine.low %v423_v0, %v427_v50 }
 0x112   :  { %6039 = vst [vmem:[#allocation109_spill] sm:$0xff] %v4235_v49  ;;  %6040 = vst [vmem:[#allocation110_spill] sm:$0xff] %v4237_v17 }
 0x113   :  { %1201 = vmatpush1.bf16.msra.mxu0 %v4205_v32  ;;  %1242 = vmatpush1.bf16.msra.mxu1 %v4207_v60  ;;  %v426_v60 = vld [vmem:[%s5616_s3 + $0x370] sm:$0xff]  ;;  %6041 = vst [vmem:[#allocation111_spill] sm:$0xff] %v4253_v5  ;;  %6046 = vst [vmem:[#allocation116_spill] sm:$0xff] %v4279_v12 }
 0x114   :  { %1202 = vmatprep.subr.bf16.mxu0 %v4211_v25  ;;  %1243 = vmatprep.subr.bf16.mxu1 %v4213_v23  ;;  %v4259_v23 = vcombine.high %v422_v11, %v426_v60  ;;  %v4261_v25 = vcombine.high %v423_v0, %v427_v50  ;;  %v414_v32 = vld [vmem:[%s5616_s3 + $0x310] sm:$0xff]  ;;  %v4277_v9 = vcombine.low %v422_v11, %v426_v60  ;;  %v407_v11 = vld [vmem:[%s5616_s3 + $0x2d8] sm:$0xff] }
 0x115   :  { %v411_v60 = vld [vmem:[%s5616_s3 + $0x2f8] sm:$0xff]  ;;  %v4303_v50 = vcombine.low %v415_v1, %v419_v30 }
 0x116   :  { %6043 = vst [vmem:[#allocation113_spill] sm:$0xff] %v4259_v23  ;;  %6044 = vst [vmem:[#allocation114_spill] sm:$0xff] %v4261_v25 }
 0x117   :  { %1203 = vmatpush2.bf16.msra.mxu0 %v4229_v31  ;;  %1244 = vmatpush2.bf16.msra.mxu1 %v4231_v24  ;;  %v418_v24 = vld [vmem:[%s5616_s3 + $0x330] sm:$0xff]  ;;  %6045 = vst [vmem:[#allocation115_spill] sm:$0xff] %v4277_v9  ;;  %6050 = vst [vmem:[#allocation120_spill] sm:$0xff] %v4303_v50 }
 0x118   :  { %1204 = vmatprep.subr.bf16.mxu0 %v4235_v49  ;;  %1245 = vmatprep.subr.bf16.mxu1 %v4237_v17  ;;  %v4283_v17 = vcombine.high %v414_v32, %v418_v24  ;;  %v4285_v49 = vcombine.high %v415_v1, %v419_v30  ;;  %v406_v31 = vld [vmem:[%s5616_s3 + $0x2d0] sm:$0xff]  ;;  %v4301_v0 = vcombine.low %v414_v32, %v418_v24  ;;  %v399_v32 = vld [vmem:[%s5616_s3 + $0x298] sm:$0xff] }
 0x119   :  { %v403_v24 = vld [vmem:[%s5616_s3 + $0x2b8] sm:$0xff]  ;;  %v4327_v30 = vcombine.low %v407_v11, %v411_v60 }
 0x11a   :  { %6047 = vst [vmem:[#allocation117_spill] sm:$0xff] %v4283_v17  ;;  %6048 = vst [vmem:[#allocation118_spill] sm:$0xff] %v4285_v49 }
 0x11b   :  { %1205 = vmatpush2.bf16.msra.mxu0 %v4253_v5  ;;  %1246 = vmatpush2.bf16.msra.mxu1 %v4255_v56  ;;  %v410_v56 = vld [vmem:[%s5616_s3 + $0x2f0] sm:$0xff]  ;;  %6049 = vst [vmem:[#allocation119_spill] sm:$0xff] %v4301_v0  ;;  %6054 = vst [vmem:[#allocation124_spill] sm:$0xff] %v4327_v30 }
 0x11c   :  { %1206 = vmatprep.subr.bf16.mxu0 %v4259_v23  ;;  %1247 = vmatprep.subr.bf16.mxu1 %v4261_v25  ;;  %v4307_v25 = vcombine.high %v406_v31, %v410_v56  ;;  %v4309_v23 = vcombine.high %v407_v11, %v411_v60  ;;  %v398_v5 = vld [vmem:[%s5616_s3 + $0x290] sm:$0xff]  ;;  %v4325_v1 = vcombine.low %v406_v31, %v410_v56  ;;  %v391_v31 = vld [vmem:[%s5616_s3 + $0x258] sm:$0xff] }
 0x11d   :  { %v395_v56 = vld [vmem:[%s5616_s3 + $0x278] sm:$0xff]  ;;  %v4351_v60 = vcombine.low %v399_v32, %v403_v24 }
 0x11e   :  { %6051 = vst [vmem:[#allocation121_spill] sm:$0xff] %v4307_v25  ;;  %6052 = vst [vmem:[#allocation122_spill] sm:$0xff] %v4309_v23 }
 0x11f   :  { %1207 = vmatpush2.bf16.msra.mxu0 %v4277_v9  ;;  %1248 = vmatpush2.bf16.msra.mxu1 %v4279_v12  ;;  %v402_v12 = vld [vmem:[%s5616_s3 + $0x2b0] sm:$0xff]  ;;  %6053 = vst [vmem:[#allocation123_spill] sm:$0xff] %v4325_v1  ;;  %6058 = vst [vmem:[#allocation128_spill] sm:$0xff] %v4351_v60 }
 0x120   :  { %1208 = vmatprep.subr.bf16.mxu0 %v4283_v17  ;;  %1249 = vmatprep.subr.bf16.mxu1 %v4285_v49  ;;  %v4331_v49 = vcombine.high %v398_v5, %v402_v12  ;;  %v4333_v17 = vcombine.high %v399_v32, %v403_v24  ;;  %v390_v9 = vld [vmem:[%s5616_s3 + $0x250] sm:$0xff]  ;;  %v4349_v11 = vcombine.low %v398_v5, %v402_v12  ;;  %v383_v5 = vld [vmem:[%s5616_s3 + $0x218] sm:$0xff] }
 0x121   :  { %v387_v12 = vld [vmem:[%s5616_s3 + $0x238] sm:$0xff]  ;;  %v4375_v24 = vcombine.low %v391_v31, %v395_v56 }
 0x122   :  { %6055 = vst [vmem:[#allocation125_spill] sm:$0xff] %v4331_v49  ;;  %6056 = vst [vmem:[#allocation126_spill] sm:$0xff] %v4333_v17 }
 0x123   :  { %1209 = vmatpush2.bf16.msra.mxu0 %v4301_v0  ;;  %1250 = vmatpush2.bf16.msra.mxu1 %v4303_v50  ;;  %v394_v50 = vld [vmem:[%s5616_s3 + $0x270] sm:$0xff]  ;;  %6057 = vst [vmem:[#allocation127_spill] sm:$0xff] %v4349_v11  ;;  %6062 = vst [vmem:[#allocation132_spill] sm:$0xff] %v4375_v24 }
 0x124   :  { %1210 = vmatprep.subr.bf16.mxu0 %v4307_v25  ;;  %1251 = vmatprep.subr.bf16.mxu1 %v4309_v23  ;;  %v4355_v23 = vcombine.high %v390_v9, %v394_v50  ;;  %v4357_v25 = vcombine.high %v391_v31, %v395_v56  ;;  %v382_v0 = vld [vmem:[%s5616_s3 + $0x210] sm:$0xff]  ;;  %v4373_v32 = vcombine.low %v390_v9, %v394_v50  ;;  %v6068_v9 = vld [vmem:[#allocation46_spill] sm:$0xff]  ;;  %v6070_v50 = vld [vmem:[#allocation48_spill] sm:$0xff] }
 0x125   :  { %v6072_v31 = vld [vmem:[#allocation50_spill] sm:$0xff]  ;;  %v6073_v56 = vld [vmem:[#allocation51_spill] sm:$0xff] }
 0x126   :  { %6059 = vst [vmem:[#allocation129_spill] sm:$0xff] %v4355_v23  ;;  %6060 = vst [vmem:[#allocation130_spill] sm:$0xff] %v4357_v25 }
 0x127   :  { %1211 = vmatpush2.bf16.msra.mxu0 %v4325_v1  ;;  %1252 = vmatpush2.bf16.msra.mxu1 %v4327_v30  ;;  %v386_v30 = vld [vmem:[%s5616_s3 + $0x230] sm:$0xff]  ;;  %6061 = vst [vmem:[#allocation131_spill] sm:$0xff] %v4373_v32 }
 0x128   :  { %1212 = vmatprep.subr.bf16.mxu0 %v4331_v49  ;;  %1253 = vmatprep.subr.bf16.mxu1 %v4333_v17  ;;  %v4379_v17 = vcombine.high %v382_v0, %v386_v30  ;;  %v4381_v49 = vcombine.high %v383_v5, %v387_v12  ;;  %v4385_v1 = vcombine.low %v382_v0, %v386_v30  ;;  %v6069_v0 = vld [vmem:[#allocation47_spill] sm:$0xff]  ;;  %v6071_v30 = vld [vmem:[#allocation49_spill] sm:$0xff] }
 0x12a   :  { %6063 = vst [vmem:[#allocation133_spill] sm:$0xff] %v4379_v17  ;;  %6064 = vst [vmem:[#allocation134_spill] sm:$0xff] %v4381_v49 }
 0x12b   :  { %1213 = vmatpush2.bf16.msra.mxu0 %v4349_v11  ;;  %1254 = vmatpush2.bf16.msra.mxu1 %v4351_v60  ;;  %6065 = vst [vmem:[#allocation135_spill] sm:$0xff] %v4385_v1  ;;  %v4387_v11 = vcombine.low %v383_v5, %v387_v12  ;;  %v6074_v5 = vld [vmem:[#allocation52_spill] sm:$0xff]  ;;  %v6075_v12 = vld [vmem:[#allocation53_spill] sm:$0xff] }
 0x12c   :  { %1214 = vmatprep.subr.bf16.mxu0 %v4355_v23  ;;  %1255 = vmatprep.subr.bf16.mxu1 %v4357_v25 }
 0x12d   :  { %6066 = vst [vmem:[#allocation136_spill] sm:$0xff] %v4387_v11 }
 0x12f   :  { %1215 = vmatpush2.bf16.msra.mxu0 %v4373_v32  ;;  %1256 = vmatpush2.bf16.msra.mxu1 %v4375_v24 }
 0x130   :  { %1216 = vmatprep.subr.bf16.mxu0 %v4379_v17  ;;  %1257 = vmatprep.subr.bf16.mxu1 %v4381_v49 }
 0x133   :  { %1217 = vmatpush2.bf16.msra.mxu0 %v4385_v1  ;;  %1258 = vmatpush2.bf16.msra.mxu1 %v4387_v11 }
 0x134   :  { %1321 = vmatprep.subr.bf16.mxu0 %v3550_v10  ;;  %1362 = vmatprep.subr.bf16.mxu1 %v3563_v15 }
 0x136   :  { %1219 = vmatmul.mubr.bf16.vlgmr.msra.gmra.mxu0 %v4037_v48  ;;  %1260 = vmatmul.mubr.bf16.vlgmr.msra.gmra.mxu1 %v4037_v48  ;;  %v6067_v48 = vld [vmem:[#allocation45_spill] sm:$0xff] }
 0x137   :  { %1322 = vmatpush1.bf16.msra.mxu0 %v3558_v13  ;;  %1363 = vmatpush1.bf16.msra.mxu1 %v3565_v16 }
 0x138   :  { %1323 = vmatprep.subr.bf16.mxu0 %v3577_v20  ;;  %1364 = vmatprep.subr.bf16.mxu1 %v3579_v21 }
 0x13b   :  { %1324 = vmatpush1.bf16.msra.mxu0 %v3597_v26  ;;  %1365 = vmatpush1.bf16.msra.mxu1 %v3601_v27 }
 0x13c   :  { %1325 = vmatprep.subr.bf16.mxu0 %v3603_v28  ;;  %1366 = vmatprep.subr.bf16.mxu1 %v3606_v29 }
 0x13f   :  { %1326 = vmatpush1.bf16.msra.mxu0 %v3623_v34  ;;  %1367 = vmatpush1.bf16.msra.mxu1 %v3627_v35 }
 0x140   :  { %1327 = vmatprep.subr.bf16.mxu0 %v3629_v36  ;;  %1368 = vmatprep.subr.bf16.mxu1 %v3632_v37 }
 0x143   :  { %1328 = vmatpush1.bf16.msra.mxu0 %v3647_v42  ;;  %1369 = vmatpush1.bf16.msra.mxu1 %v3651_v43 }
 0x144   :  { %1329 = vmatprep.subr.bf16.mxu0 %v3653_v44  ;;  %1370 = vmatprep.subr.bf16.mxu1 %v3656_v45 }
 0x147   :  { %1330 = vmatpush1.bf16.msra.mxu0 %v3659_v46  ;;  %1371 = vmatpush1.bf16.msra.mxu1 %v3663_v47 }
 0x148   :  { %1331 = vmatprep.subr.bf16.mxu0 %v3677_v51  ;;  %1372 = vmatprep.subr.bf16.mxu1 %v3682_v53 }
 0x14b   :  { %1332 = vmatpush1.bf16.msra.mxu0 %v3684_v54  ;;  %1373 = vmatpush1.bf16.msra.mxu1 %v3686_v55 }
 0x14c   :  { %1333 = vmatprep.subr.bf16.mxu0 %v3701_v59  ;;  %1374 = vmatprep.subr.bf16.mxu1 %v3706_v61 }
 0x14f   :  { %1334 = vmatpush1.bf16.msra.mxu0 %v3708_v62  ;;  %1375 = vmatpush1.bf16.msra.mxu1 %v3711_v63  ;;  %v6116_v63 = vld [vmem:[#allocation74_spill] sm:$0xff] }
 0x150   :  { %1335 = vmatprep.subr.bf16.mxu0 %v3725_v4  ;;  %1376 = vmatprep.subr.bf16.mxu1 %v3730_v6 }
 0x153   :  { %1336 = vmatpush1.bf16.msra.mxu0 %v3732_v7  ;;  %1377 = vmatpush1.bf16.msra.mxu1 %v3734_v8 }
 0x154   :  { %1337 = vmatprep.subr.bf16.mxu0 %v3749_v14  ;;  %1378 = vmatprep.subr.bf16.mxu1 %v3754_v18 }
 0x157   :  { %1338 = vmatpush2.bf16.msra.mxu0 %v3756_v19  ;;  %1379 = vmatpush2.bf16.msra.mxu1 %v3758_v22  ;;  %v6115_v22 = vld [vmem:[#allocation73_spill] sm:$0xff] }
 0x158   :  { %1339 = vmatprep.subr.bf16.mxu0 %v3779_v33  ;;  %1380 = vmatprep.subr.bf16.mxu1 %v3785_v39 }
 0x15b   :  { %1340 = vmatpush2.bf16.msra.mxu0 %v3787_v40  ;;  %1381 = vmatpush2.bf16.msra.mxu1 %v3789_v41 }
 0x15c   :  { %1341 = vmatprep.subr.bf16.mxu0 %v3806_v52  ;;  %1382 = vmatprep.subr.bf16.mxu1 %v3812_v57  ;;  %v6076_v52 = vld [vmem:[#allocation54_spill] sm:$0xff]  ;;  %v6077_v57 = vld [vmem:[#allocation55_spill] sm:$0xff] }
 0x15f   :  { %1342 = vmatpush2.bf16.msra.mxu0 %v6067_v48  ;;  %1383 = vmatpush2.bf16.msra.mxu1 %v6068_v9  ;;  %v6078_v48 = vld [vmem:[#allocation56_spill] sm:$0xff]  ;;  %v6079_v9 = vld [vmem:[#allocation57_spill] sm:$0xff] }
 0x160   :  { %1343 = vmatprep.subr.bf16.mxu0 %v6069_v0  ;;  %1384 = vmatprep.subr.bf16.mxu1 %v6070_v50  ;;  %v6080_v0 = vld [vmem:[#allocation58_spill] sm:$0xff]  ;;  %v6081_v50 = vld [vmem:[#allocation59_spill] sm:$0xff] }
 0x163   :  { %1344 = vmatpush2.bf16.msra.mxu0 %v6071_v30  ;;  %1385 = vmatpush2.bf16.msra.mxu1 %v6072_v31  ;;  %v6082_v30 = vld [vmem:[#allocation60_spill] sm:$0xff]  ;;  %v6083_v31 = vld [vmem:[#allocation61_spill] sm:$0xff] }
 0x164   :  { %1345 = vmatprep.subr.bf16.mxu0 %v6073_v56  ;;  %1386 = vmatprep.subr.bf16.mxu1 %v6074_v5  ;;  %v6084_v56 = vld [vmem:[#allocation62_spill] sm:$0xff]  ;;  %v6085_v5 = vld [vmem:[#allocation63_spill] sm:$0xff] }
 0x167   :  { %1346 = vmatpush2.bf16.msra.mxu0 %v6075_v12  ;;  %1387 = vmatpush2.bf16.msra.mxu1 %v6076_v52  ;;  %v6086_v12 = vld [vmem:[#allocation64_spill] sm:$0xff]  ;;  %v6087_v52 = vld [vmem:[#allocation65_spill] sm:$0xff] }
 0x168   :  { %1347 = vmatprep.subr.bf16.mxu0 %v6077_v57  ;;  %1388 = vmatprep.subr.bf16.mxu1 %v6078_v48  ;;  %v6088_v57 = vld [vmem:[#allocation66_spill] sm:$0xff]  ;;  %v6089_v48 = vld [vmem:[#allocation67_spill] sm:$0xff] }
 0x16b   :  { %1348 = vmatpush2.bf16.msra.mxu0 %v6079_v9  ;;  %1389 = vmatpush2.bf16.msra.mxu1 %v6080_v0  ;;  %v6090_v9 = vld [vmem:[#allocation68_spill] sm:$0xff]  ;;  %v4461_v0 = vpop.f32.mrf.mxu1 }
 0x16c   :  { %1349 = vmatprep.subr.bf16.mxu0 %v6081_v50  ;;  %1390 = vmatprep.subr.bf16.mxu1 %v6082_v30  ;;  %v126_v50 = vpop.f32.mrf.mxu0 }
 0x16d   :  { %v201_v30 = vpop.f32.mrf.mxu1 }
 0x16e   :  { %v128_v41 = vpop.f32.mrf.mxu0 }
 0x16f   :  { %1350 = vmatpush2.bf16.msra.mxu0 %v6083_v31  ;;  %1391 = vmatpush2.bf16.msra.mxu1 %v6084_v56  ;;  %v4463_v31 = vpop.f32.mrf.mxu1 }
 0x170   :  { %1351 = vmatprep.subr.bf16.mxu0 %v6085_v5  ;;  %1392 = vmatprep.subr.bf16.mxu1 %v6086_v12  ;;  %6091 = vst [vmem:[#allocation137_spill] sm:$0xff] %v4463_v31  ;;  %v4465_v56 = vpop.f32.mrf.mxu0 }
 0x171   :  { %6092 = vst [vmem:[#allocation138_spill] sm:$0xff] %v4465_v56  ;;  %v4467_v5 = vpop.f32.mrf.mxu1 }
 0x172   :  { %6093 = vst [vmem:[#allocation139_spill] sm:$0xff] %v4467_v5  ;;  %v4469_v12 = vpop.f32.mrf.mxu0 }
 0x173   :  { %1352 = vmatpush2.bf16.msra.mxu0 %v6087_v52  ;;  %1393 = vmatpush2.bf16.msra.mxu1 %v6088_v57  ;;  %6094 = vst [vmem:[#allocation140_spill] sm:$0xff] %v4469_v12  ;;  %v4471_v52 = vpop.f32.mrf.mxu1 }
 0x174   :  { %1403 = vmatprep.subr.bf16.mxu0 %v6089_v48  ;;  %1444 = vmatprep.subr.bf16.mxu1 %v6090_v9  ;;  %6095 = vst [vmem:[#allocation141_spill] sm:$0xff] %v4471_v52  ;;  %v4473_v57 = vpop.f32.mrf.mxu0 }
 0x175   :  { %6096 = vst [vmem:[#allocation142_spill] sm:$0xff] %v4473_v57  ;;  %v4475_v48 = vpop.f32.mrf.mxu1 }
 0x176   :  { %6097 = vst [vmem:[#allocation143_spill] sm:$0xff] %v4475_v48  ;;  %v4477_v9 = vpop.f32.mrf.mxu0 }
 0x177   :  { %6098 = vst [vmem:[#allocation144_spill] sm:$0xff] %v4477_v9  ;;  %v4479_v40 = vpop.f32.mrf.mxu1 }
 0x178   :  { %6099 = vst [vmem:[#allocation145_spill] sm:$0xff] %v4479_v40  ;;  %v4481_v39 = vpop.f32.mrf.mxu0 }
 0x179   :  { %6100 = vst [vmem:[#allocation146_spill] sm:$0xff] %v4481_v39  ;;  %v4483_v33 = vpop.f32.mrf.mxu1 }
 0x17a   :  { %6101 = vst [vmem:[#allocation147_spill] sm:$0xff] %v4483_v33  ;;  %v4485_v31 = vpop.f32.mrf.mxu0 }
 0x17b   :  { %6102 = vst [vmem:[#allocation148_spill] sm:$0xff] %v4485_v31  ;;  %v4487_v56 = vpop.f32.mrf.mxu1 }
 0x17c   :  { %6103 = vst [vmem:[#allocation149_spill] sm:$0xff] %v4487_v56  ;;  %v4489_v5 = vpop.f32.mrf.mxu0 }
 0x17d   :  { %6104 = vst [vmem:[#allocation150_spill] sm:$0xff] %v4489_v5  ;;  %v4491_v12 = vpop.f32.mrf.mxu1 }
 0x17e   :  { %6105 = vst [vmem:[#allocation151_spill] sm:$0xff] %v4491_v12  ;;  %v4493_v52 = vpop.f32.mrf.mxu0 }
 0x17f   :  { %6106 = vst [vmem:[#allocation152_spill] sm:$0xff] %v4493_v52  ;;  %v4495_v57 = vpop.f32.mrf.mxu1 }
 0x180   :  { %6107 = vst [vmem:[#allocation153_spill] sm:$0xff] %v4495_v57  ;;  %v4497_v48 = vpop.f32.mrf.mxu0 }
 0x181   :  { %6108 = vst [vmem:[#allocation154_spill] sm:$0xff] %v4497_v48  ;;  %v4499_v9 = vpop.f32.mrf.mxu1 }
 0x182   :  { %6109 = vst [vmem:[#allocation155_spill] sm:$0xff] %v4499_v9  ;;  %v4501_v40 = vpop.f32.mrf.mxu0 }
 0x183   :  { %6110 = vst [vmem:[#allocation156_spill] sm:$0xff] %v4501_v40  ;;  %v4503_v39 = vpop.f32.mrf.mxu1 }
 0x184   :  { %6111 = vst [vmem:[#allocation157_spill] sm:$0xff] %v4503_v39  ;;  %v4505_v33 = vpop.f32.mrf.mxu0 }
 0x185   :  { %6112 = vst [vmem:[#allocation158_spill] sm:$0xff] %v4505_v33  ;;  %v4507_v31 = vpop.f32.mrf.mxu1 }
 0x186   :  { %6113 = vst [vmem:[#allocation159_spill] sm:$0xff] %v4507_v31  ;;  %v4509_v56 = vpop.f32.mrf.mxu0 }
 0x187   :  { %6114 = vst [vmem:[#allocation160_spill] sm:$0xff] %v4509_v56 }
 0x1b6   :  { %v1138_v5 = vpop.f32.mrf.mxu0  ;;  %v1179_v12 = vpop.f32.mrf.mxu1 }
 0x1b7   :  { %v1139_v52 = vadd.f32 %v1138_v5, %v6115_v22  ;;  %v6117_v22 = vld [vmem:[#allocation72_spill] sm:$0xff] }
 0x1b8   :  { %v1140_v19 = vpop.f32.mrf.mxu0  ;;  %v1181_v57 = vpop.f32.mrf.mxu1  ;;  %vm1529_vm4 = vcmp.eq.s32.totalorder %v6117_v22, 1  ;;  %vm1746_vm5 = vcmp.eq.s32.totalorder %v6117_v22, 2 }
 0x1b9   :  { %v1272_v18 = vadd.f32 %v1139_v52, %v126_v50  ;;  %v1182_v48 = vadd.f32 %v1181_v57, %v4013_v38  ;;  %v1141_v5 = vadd.f32 %v1140_v19, %v6116_v63  ;;  %v6118_v52 = vmov 0  }
 0x1ba   :  { %v1142_v9 = vpop.f32.mrf.mxu0  ;;  %v1183_v14 = vpop.f32.mrf.mxu1  ;;  %v1530_v50 = vsel %vm1529_vm4, 1, %v6118_v52 }
 0x1bb   :  { %v1276_v40 = vmul.f32 0.5, %v1272_v18  ;;  %v1275_v33 = vadd.f32 %v1182_v48, %v201_v30  ;;  %v1273_v57 = vadd.f32 %v1141_v5, %v128_v41  ;;  %1532 = vperm.xlu0 %3262, %v1530_v50   ;;  %v6119_v18 = vld [vmem:[#allocation71_spill] sm:$0xff] }
 0x1bc   :  { %v1143_v8 = vpop.f32.mrf.mxu0  ;;  %v1184_v39 = vpop.f32.mrf.mxu1 }
 0x1bd   :  { %3320 = vtanh.f32 %v1276_v40  ;;  %v1277_v14 = vmul.f32 0.5, %v1273_v57  ;;  %v446_v8 = vsub.s32 4, %v6119_v18  ;;  %v450_v39 = vsub.s32 5, %v6119_v18 }
 0x1be   :  { %3322 = vtanh.f32 %v1275_v33  ;;  %v454_v57 = vsub.s32 6, %v6119_v18 }
 0x1bf   :  { %3324 = vtanh.f32 %v1277_v14  ;;  %v4519_v33 = vrot.slane %v3997_v2, %v446_v8 }
 0x1c1   :  { %6120 = vst [vmem:[#allocation161_spill] sm:$0xff] %v4519_v33 }
 0x1ca   :  { %v3321_v31 = vpop.eup %3320 }
 0x1cb   :  { %v1282_v7 = vmul.f32 0.5, %v3321_v31  ;;  %v3323_v6 = vpop.eup %3322 }
 0x1cc   :  { %v3325_v52 = vpop.eup %3324 }
 0x1cd   :  { %v1285_v56 = vadd.f32 0.5, %v1282_v7  ;;  %v4522_v7 = vrot.slane %v3997_v2, %v450_v39 }
 0x1cf   :  { %v1290_v4 = vmul.f32 %v3323_v6, %v1285_v56  ;;  %6121 = vst [vmem:[#allocation162_spill] sm:$0xff] %v4522_v7  ;;  %v458_v6 = vsub.s32 7, %v6119_v18 }
 0x1d1   :  { %v4528_v56 = vrot.slane %v3997_v2, %v458_v6 }
 0x1d3   :  { %6122 = vst [vmem:[#allocation163_spill] sm:$0xff] %v4528_v56 }
 0x1f6   :  { %v1220_v19 = vpop.f32.mrf.mxu0  ;;  %v1261_v40 = vpop.f32.mrf.mxu1 }
 0x1f7   :  { %v1221_v48 = vadd.f32 %v1220_v19, %v4519_v33  ;;  %v1180_v33 = vadd.f32 %v1179_v12, %v4019_v3 }
 0x1f8   :  { %v1222_v41 = vpop.f32.mrf.mxu0  ;;  %v1263_v9 = vpop.f32.mrf.mxu1 }
 0x1f9   :  { %v1294_v30 = vmul.f32 0.5, %v1221_v48  ;;  %v1223_v31 = vadd.f32 %v1222_v41, %v4522_v7  ;;  %v1264_v19 = vadd.f32 %v1263_v9, %v4528_v56  ;;  %v4534_v48 = vrot.slane %v3997_v2, %v454_v57 }
 0x1fa   :  { %v1224_v5 = vpop.f32.mrf.mxu0  ;;  %v1265_v50 = vpop.f32.mrf.mxu1  ;;  %v1283_v41 = vmul.f32 0.5, %v3325_v52  ;;  %v1274_v6 = vadd.f32 %v1180_v33, %v4461_v0 }
 0x1fb   :  { %3326 = vtanh.f32 %v1294_v30  ;;  %v1295_v14 = vmul.f32 0.5, %v1223_v31  ;;  %6123 = vst [vmem:[#allocation164_spill] sm:$0xff] %v4534_v48  ;;  %v1262_v30 = vadd.f32 %v1261_v40, %v4534_v48 }
 0x1fc   :  { %v1225_v8 = vpop.f32.mrf.mxu0  ;;  %v1266_v39 = vpop.f32.mrf.mxu1  ;;  %v1286_v5 = vadd.f32 0.5, %v1283_v41  ;;  %v1278_v50 = vmul.f32 0.5, %v1274_v6 }
 0x1fd   :  { %3328 = vtanh.f32 %v1295_v14  ;;  %v1296_v31 = vmul.f32 0.5, %v1262_v30 }
 0x1fe   :  { %3330 = vtanh.f32 %v1264_v19  ;;  %v1289_v39 = vmul.f32 %v1286_v5, %v4022_v58 }
 0x1ff   :  { %3332 = vtanh.f32 %v1278_v50 }
 0x200   :  { %3334 = vtanh.f32 %v1296_v31  ;;  %v4539_v2 = vadd.f32 %v1290_v4, %v1289_v39 }
 0x202   :  { %3336 = vtanh.f32 %v4539_v2 }
 0x208   :  { %v3327_v8 = vpop.eup %3326 }
 0x209   :  { %v1300_v14 = vmul.f32 0.5, %v3327_v8 }
 0x20a   :  { %v3329_v18 = vpop.eup %3328 }
 0x20b   :  { %v1303_v9 = vadd.f32 0.5, %v1300_v14  ;;  %v1301_v12 = vmul.f32 0.5, %v3329_v18  ;;  %v3331_v57 = vpop.eup %3330  ;;  %v6124_v14 = vld [vmem:[#allocation69_spill] sm:$0xff] }
 0x20c   :  { %v3333_v40 = vpop.eup %3332 }
 0x20d   :  { %v1304_v52 = vadd.f32 0.5, %v1301_v12  ;;  %v1308_v0 = vmul.f32 %v3331_v57, %v1303_v9  ;;  %v3335_v58 = vpop.eup %3334  ;;  %v1284_v41 = vmul.f32 0.5, %v3333_v40  ;;  %v6125_v9 = vld [vmem:[#allocation70_spill] sm:$0xff]  ;;  %v6126_v12 = vld [vmem:[#allocation77_spill] sm:$0xff]  ;;  %v6128_v57 = vld [vmem:[#allocation79_spill] sm:$0xff] }
 0x20e   :  { %v1302_v6 = vmul.f32 0.5, %v3335_v58  ;;  %v6131_v40 = vld [vmem:[#allocation82_spill] sm:$0xff]  ;;  %v6132_v58 = vld [vmem:[#allocation83_spill] sm:$0xff] }
 0x20f   :  { %v1307_v19 = vmul.f32 0.0, %v1304_v52  ;;  %v3337_v30 = vpop.eup %3336  ;;  %v1287_v5 = vadd.f32 0.5, %v1284_v41  ;;  %v6127_v52 = vld [vmem:[#allocation78_spill] sm:$0xff]  ;;  %v6133_v41 = vld [vmem:[#allocation84_spill] sm:$0xff] }
 0x210   :  { %v1305_v50 = vadd.f32 0.5, %v1302_v6  ;;  %v6134_v6 = vld [vmem:[#allocation85_spill] sm:$0xff] }
 0x211   :  { %v4542_v33 = vadd.f32 %v1308_v0, %v1307_v19  ;;  %v1293_v4 = vmul.f32 %v3337_v30, %v1287_v5  ;;  %v6129_v19 = vld [vmem:[#allocation80_spill] sm:$0xff]  ;;  %v6130_v0 = vld [vmem:[#allocation81_spill] sm:$0xff]  ;;  %v6135_v30 = vld [vmem:[#allocation86_spill] sm:$0xff] }
 0x212   :  { %v6136_v5 = vld [vmem:[#allocation87_spill] sm:$0xff] }
 0x213   :  { %3338 = vtanh.f32 %v4542_v33  ;;  %v4549_v39 = vpack.c.bf16 %v1293_v4, %v1293_v4  ;;  %v6139_v4 = vld [vmem:[#allocation90_spill] sm:$0xff] }
 0x220   :  { %v3339_v18 = vpop.eup %3338 }
 0x221   :  { %v4545_v31 = vmul.f32 %v3339_v18, %v1305_v50  ;;  %v6137_v50 = vld [vmem:[#allocation88_spill] sm:$0xff]  ;;  %v6138_v18 = vld [vmem:[#allocation89_spill] sm:$0xff] }
 0x223   :  { %v1320_v8 = vpack.c.bf16 %v4545_v31, %v4545_v31 }
 0x225   :  { %1353 = vmatprep.mubr.bf16.mxu0 %v1320_v8  ;;  %1394 = vmatprep.mubr.bf16.mxu1 %v1320_v8 }
 0x226   :  { %1354 = vmatmul.mubr.bf16.vlgmr.msra.gmra.mxu0 %v4549_v39  ;;  %1395 = vmatmul.mubr.bf16.vlgmr.msra.gmra.mxu1 %v4549_v39 }
 0x227   :  { %1404 = vmatpush1.bf16.msra.mxu0 %v6124_v14  ;;  %1445 = vmatpush1.bf16.msra.mxu1 %v6125_v9 }
 0x228   :  { %1435 = vmatprep.mubr.bf16.mxu0 %v1320_v8  ;;  %1476 = vmatprep.mubr.bf16.mxu1 %v1320_v8  ;;  %v6140_v8 = vld [vmem:[#allocation91_spill] sm:$0xff] }
 0x229   :  { %1405 = vmatprep.subr.bf16.mxu0 %v6126_v12  ;;  %1446 = vmatprep.subr.bf16.mxu1 %v6127_v52 }
 0x22b   :  { %1406 = vmatpush1.bf16.msra.mxu0 %v6128_v57  ;;  %1447 = vmatpush1.bf16.msra.mxu1 %v6129_v19 }
 0x22c   :  { %1407 = vmatprep.subr.bf16.mxu0 %v6130_v0  ;;  %1448 = vmatprep.subr.bf16.mxu1 %v6131_v40  ;;  %v6141_v0 = vld [vmem:[#allocation92_spill] sm:$0xff]  ;;  %v6142_v40 = vld [vmem:[#allocation93_spill] sm:$0xff] }
 0x22f   :  { %1408 = vmatpush1.bf16.msra.mxu0 %v6132_v58  ;;  %1449 = vmatpush1.bf16.msra.mxu1 %v6133_v41  ;;  %v6143_v58 = vld [vmem:[#allocation94_spill] sm:$0xff]  ;;  %v6144_v41 = vld [vmem:[#allocation95_spill] sm:$0xff] }
 0x230   :  { %1409 = vmatprep.subr.bf16.mxu0 %v6134_v6  ;;  %1450 = vmatprep.subr.bf16.mxu1 %v6135_v30  ;;  %v6145_v6 = vld [vmem:[#allocation96_spill] sm:$0xff]  ;;  %v6146_v30 = vld [vmem:[#allocation97_spill] sm:$0xff] }
 0x233   :  { %1410 = vmatpush1.bf16.msra.mxu0 %v6136_v5  ;;  %1451 = vmatpush1.bf16.msra.mxu1 %v6137_v50  ;;  %v6147_v5 = vld [vmem:[#allocation98_spill] sm:$0xff]  ;;  %v6148_v50 = vld [vmem:[#allocation99_spill] sm:$0xff] }
 0x234   :  { %1411 = vmatprep.subr.bf16.mxu0 %v6138_v18  ;;  %1452 = vmatprep.subr.bf16.mxu1 %v6139_v4  ;;  %v6149_v18 = vld [vmem:[#allocation100_spill] sm:$0xff]  ;;  %v6150_v4 = vld [vmem:[#allocation101_spill] sm:$0xff] }
 0x237   :  { %1412 = vmatpush1.bf16.msra.mxu0 %v6140_v8  ;;  %1453 = vmatpush1.bf16.msra.mxu1 %v6141_v0  ;;  %v6151_v8 = vld [vmem:[#allocation102_spill] sm:$0xff]  ;;  %v6152_v0 = vld [vmem:[#allocation103_spill] sm:$0xff] }
 0x238   :  { %1413 = vmatprep.subr.bf16.mxu0 %v6142_v40  ;;  %1454 = vmatprep.subr.bf16.mxu1 %v6143_v58  ;;  %v6153_v40 = vld [vmem:[#allocation104_spill] sm:$0xff]  ;;  %v6154_v58 = vld [vmem:[#allocation105_spill] sm:$0xff] }
 0x23b   :  { %1414 = vmatpush1.bf16.msra.mxu0 %v6144_v41  ;;  %1455 = vmatpush1.bf16.msra.mxu1 %v6145_v6  ;;  %v6155_v41 = vld [vmem:[#allocation106_spill] sm:$0xff]  ;;  %v6156_v6 = vld [vmem:[#allocation107_spill] sm:$0xff] }
 0x23c   :  { %1415 = vmatprep.subr.bf16.mxu0 %v6146_v30  ;;  %1456 = vmatprep.subr.bf16.mxu1 %v6147_v5  ;;  %v6157_v30 = vld [vmem:[#allocation108_spill] sm:$0xff]  ;;  %v6158_v5 = vld [vmem:[#allocation109_spill] sm:$0xff] }
 0x23f   :  { %1416 = vmatpush1.bf16.msra.mxu0 %v6148_v50  ;;  %1457 = vmatpush1.bf16.msra.mxu1 %v6149_v18  ;;  %v6159_v50 = vld [vmem:[#allocation110_spill] sm:$0xff]  ;;  %v6160_v18 = vld [vmem:[#allocation111_spill] sm:$0xff] }
 0x240   :  { %1417 = vmatprep.subr.bf16.mxu0 %v6150_v4  ;;  %1458 = vmatprep.subr.bf16.mxu1 %v6151_v8  ;;  %v6161_v4 = vld [vmem:[#allocation112_spill] sm:$0xff]  ;;  %v6162_v8 = vld [vmem:[#allocation113_spill] sm:$0xff] }
 0x243   :  { %1418 = vmatpush1.bf16.msra.mxu0 %v6152_v0  ;;  %1459 = vmatpush1.bf16.msra.mxu1 %v6153_v40  ;;  %v6163_v0 = vld [vmem:[#allocation114_spill] sm:$0xff]  ;;  %v6164_v40 = vld [vmem:[#allocation115_spill] sm:$0xff] }
 0x244   :  { %1419 = vmatprep.subr.bf16.mxu0 %v6154_v58  ;;  %1460 = vmatprep.subr.bf16.mxu1 %v6155_v41  ;;  %v6165_v58 = vld [vmem:[#allocation116_spill] sm:$0xff]  ;;  %v6166_v41 = vld [vmem:[#allocation117_spill] sm:$0xff] }
 0x247   :  { %1420 = vmatpush2.bf16.msra.mxu0 %v6156_v6  ;;  %1461 = vmatpush2.bf16.msra.mxu1 %v6157_v30  ;;  %v6167_v6 = vld [vmem:[#allocation118_spill] sm:$0xff]  ;;  %v6168_v30 = vld [vmem:[#allocation119_spill] sm:$0xff] }
 0x248   :  { %1421 = vmatprep.subr.bf16.mxu0 %v6158_v5  ;;  %1462 = vmatprep.subr.bf16.mxu1 %v6159_v50  ;;  %v6169_v5 = vld [vmem:[#allocation120_spill] sm:$0xff]  ;;  %v6170_v50 = vld [vmem:[#allocation121_spill] sm:$0xff] }
 0x24b   :  { %1422 = vmatpush2.bf16.msra.mxu0 %v6160_v18  ;;  %1463 = vmatpush2.bf16.msra.mxu1 %v6161_v4  ;;  %v6171_v18 = vld [vmem:[#allocation122_spill] sm:$0xff]  ;;  %v6172_v4 = vld [vmem:[#allocation123_spill] sm:$0xff] }
 0x24c   :  { %1423 = vmatprep.subr.bf16.mxu0 %v6162_v8  ;;  %1464 = vmatprep.subr.bf16.mxu1 %v6163_v0  ;;  %v6173_v8 = vld [vmem:[#allocation124_spill] sm:$0xff]  ;;  %v6174_v0 = vld [vmem:[#allocation125_spill] sm:$0xff] }
 0x24f   :  { %1424 = vmatpush2.bf16.msra.mxu0 %v6164_v40  ;;  %1465 = vmatpush2.bf16.msra.mxu1 %v6165_v58  ;;  %v6175_v40 = vld [vmem:[#allocation126_spill] sm:$0xff]  ;;  %v6176_v58 = vld [vmem:[#allocation127_spill] sm:$0xff] }
 0x250   :  { %1425 = vmatprep.subr.bf16.mxu0 %v6166_v41  ;;  %1466 = vmatprep.subr.bf16.mxu1 %v6167_v6 }
 0x253   :  { %1426 = vmatpush2.bf16.msra.mxu0 %v6168_v30  ;;  %1467 = vmatpush2.bf16.msra.mxu1 %v6169_v5 }
 0x254   :  { %1427 = vmatprep.subr.bf16.mxu0 %v6170_v50  ;;  %1468 = vmatprep.subr.bf16.mxu1 %v6171_v18 }
 0x257   :  { %1428 = vmatpush2.bf16.msra.mxu0 %v6172_v4  ;;  %1469 = vmatpush2.bf16.msra.mxu1 %v6173_v8 }
 0x258   :  { %1429 = vmatprep.subr.bf16.mxu0 %v6174_v0  ;;  %1470 = vmatprep.subr.bf16.mxu1 %v6175_v40 }
 0x25b   :  { %1430 = vmatpush2.bf16.msra.mxu0 %v6176_v58  ;;  %1471 = vmatpush2.bf16.msra.mxu1 %v4351_v60 }
 0x25c   :  { %1431 = vmatprep.subr.bf16.mxu0 %v4355_v23  ;;  %1472 = vmatprep.subr.bf16.mxu1 %v4357_v25 }
 0x25f   :  { %1432 = vmatpush2.bf16.msra.mxu0 %v4373_v32  ;;  %1473 = vmatpush2.bf16.msra.mxu1 %v4375_v24 }
 0x260   :  { %1433 = vmatprep.subr.bf16.mxu0 %v4379_v17  ;;  %1474 = vmatprep.subr.bf16.mxu1 %v4381_v49 }
 0x263   :  { %1434 = vmatpush2.bf16.msra.mxu0 %v4385_v1  ;;  %1475 = vmatpush2.bf16.msra.mxu1 %v4387_v11 }
 0x264   :  { %1538 = vmatprep.subr.bf16.mxu0 %v3550_v10  ;;  %1579 = vmatprep.subr.bf16.mxu1 %v3563_v15 }
 0x266   :  { %1436 = vmatmul.mubr.bf16.vlgmr.msra.gmra.mxu0 %v4549_v39  ;;  %1477 = vmatmul.mubr.bf16.vlgmr.msra.gmra.mxu1 %v4549_v39  ;;  %v6177_v39 = vld [vmem:[#allocation30_spill] sm:$0xff] }
 0x267   :  { %1539 = vmatpush1.bf16.msra.mxu0 %v3558_v13  ;;  %1580 = vmatpush1.bf16.msra.mxu1 %v3565_v16 }
 0x268   :  { %1540 = vmatprep.subr.bf16.mxu0 %v3577_v20  ;;  %1581 = vmatprep.subr.bf16.mxu1 %v3579_v21 }
 0x26b   :  { %1541 = vmatpush1.bf16.msra.mxu0 %v3597_v26  ;;  %1582 = vmatpush1.bf16.msra.mxu1 %v3601_v27 }
 0x26c   :  { %1542 = vmatprep.subr.bf16.mxu0 %v3603_v28  ;;  %1583 = vmatprep.subr.bf16.mxu1 %v3606_v29 }
 0x26f   :  { %1543 = vmatpush1.bf16.msra.mxu0 %v3623_v34  ;;  %1584 = vmatpush1.bf16.msra.mxu1 %v3627_v35 }
 0x270   :  { %1544 = vmatprep.subr.bf16.mxu0 %v3629_v36  ;;  %1585 = vmatprep.subr.bf16.mxu1 %v3632_v37 }
 0x273   :  { %1545 = vmatpush1.bf16.msra.mxu0 %v3647_v42  ;;  %1586 = vmatpush1.bf16.msra.mxu1 %v3651_v43  ;;  %v6217_v42 = vld [vmem:[#allocation138_spill] sm:$0xff] }
 0x274   :  { %1546 = vmatprep.subr.bf16.mxu0 %v3653_v44  ;;  %1587 = vmatprep.subr.bf16.mxu1 %v3656_v45  ;;  %v6178_v45 = vld [vmem:[#allocation31_spill] sm:$0xff]  ;;  %v6216_v44 = vld [vmem:[#allocation73_spill] sm:$0xff] }
 0x277   :  { %1547 = vmatpush1.bf16.msra.mxu0 %v3659_v46  ;;  %1588 = vmatpush1.bf16.msra.mxu1 %v3663_v47  ;;  %v6179_v46 = vld [vmem:[#allocation32_spill] sm:$0xff]  ;;  %v6180_v47 = vld [vmem:[#allocation33_spill] sm:$0xff] }
 0x278   :  { %1548 = vmatprep.subr.bf16.mxu0 %v3677_v51  ;;  %1589 = vmatprep.subr.bf16.mxu1 %v3682_v53  ;;  %v6181_v51 = vld [vmem:[#allocation34_spill] sm:$0xff]  ;;  %v6182_v53 = vld [vmem:[#allocation35_spill] sm:$0xff] }
 0x27b   :  { %1549 = vmatpush1.bf16.msra.mxu0 %v3684_v54  ;;  %1590 = vmatpush1.bf16.msra.mxu1 %v3686_v55  ;;  %v6183_v54 = vld [vmem:[#allocation36_spill] sm:$0xff]  ;;  %v6184_v55 = vld [vmem:[#allocation37_spill] sm:$0xff] }
 0x27c   :  { %1550 = vmatprep.subr.bf16.mxu0 %v3701_v59  ;;  %1591 = vmatprep.subr.bf16.mxu1 %v3706_v61  ;;  %v6185_v59 = vld [vmem:[#allocation38_spill] sm:$0xff]  ;;  %v6186_v61 = vld [vmem:[#allocation39_spill] sm:$0xff] }
 0x27f   :  { %1551 = vmatpush1.bf16.msra.mxu0 %v3708_v62  ;;  %1592 = vmatpush1.bf16.msra.mxu1 %v6177_v39  ;;  %v6187_v62 = vld [vmem:[#allocation40_spill] sm:$0xff]  ;;  %v6188_v39 = vld [vmem:[#allocation41_spill] sm:$0xff] }
 0x280   :  { %1552 = vmatprep.subr.bf16.mxu0 %v6178_v45  ;;  %1593 = vmatprep.subr.bf16.mxu1 %v6179_v46  ;;  %v6189_v45 = vld [vmem:[#allocation42_spill] sm:$0xff]  ;;  %v6190_v46 = vld [vmem:[#allocation43_spill] sm:$0xff] }
 0x283   :  { %1553 = vmatpush1.bf16.msra.mxu0 %v6180_v47  ;;  %1594 = vmatpush1.bf16.msra.mxu1 %v6181_v51  ;;  %v6191_v47 = vld [vmem:[#allocation44_spill] sm:$0xff]  ;;  %v6192_v51 = vld [vmem:[#allocation45_spill] sm:$0xff] }
 0x284   :  { %1554 = vmatprep.subr.bf16.mxu0 %v6182_v53  ;;  %1595 = vmatprep.subr.bf16.mxu1 %v6183_v54  ;;  %v6193_v53 = vld [vmem:[#allocation46_spill] sm:$0xff]  ;;  %v6194_v54 = vld [vmem:[#allocation47_spill] sm:$0xff] }
 0x287   :  { %1555 = vmatpush2.bf16.msra.mxu0 %v6184_v55  ;;  %1596 = vmatpush2.bf16.msra.mxu1 %v6185_v59  ;;  %v6195_v55 = vld [vmem:[#allocation48_spill] sm:$0xff]  ;;  %v6196_v59 = vld [vmem:[#allocation49_spill] sm:$0xff] }
 0x288   :  { %1556 = vmatprep.subr.bf16.mxu0 %v6186_v61  ;;  %1597 = vmatprep.subr.bf16.mxu1 %v6187_v62  ;;  %v6197_v61 = vld [vmem:[#allocation50_spill] sm:$0xff]  ;;  %v6198_v62 = vld [vmem:[#allocation51_spill] sm:$0xff] }
 0x28b   :  { %1557 = vmatpush2.bf16.msra.mxu0 %v6188_v39  ;;  %1598 = vmatpush2.bf16.msra.mxu1 %v6189_v45  ;;  %v6199_v39 = vld [vmem:[#allocation52_spill] sm:$0xff]  ;;  %v6200_v45 = vld [vmem:[#allocation53_spill] sm:$0xff] }
 0x28c   :  { %1558 = vmatprep.subr.bf16.mxu0 %v6190_v46  ;;  %1599 = vmatprep.subr.bf16.mxu1 %v6191_v47  ;;  %v6201_v46 = vld [vmem:[#allocation54_spill] sm:$0xff]  ;;  %v6202_v47 = vld [vmem:[#allocation55_spill] sm:$0xff] }
 0x28f   :  { %1559 = vmatpush2.bf16.msra.mxu0 %v6192_v51  ;;  %1600 = vmatpush2.bf16.msra.mxu1 %v6193_v53  ;;  %v6203_v51 = vld [vmem:[#allocation56_spill] sm:$0xff]  ;;  %v6204_v53 = vld [vmem:[#allocation57_spill] sm:$0xff] }
 0x290   :  { %1560 = vmatprep.subr.bf16.mxu0 %v6194_v54  ;;  %1601 = vmatprep.subr.bf16.mxu1 %v6195_v55  ;;  %v6205_v54 = vld [vmem:[#allocation58_spill] sm:$0xff]  ;;  %v6206_v55 = vld [vmem:[#allocation59_spill] sm:$0xff] }
 0x293   :  { %1561 = vmatpush2.bf16.msra.mxu0 %v6196_v59  ;;  %1602 = vmatpush2.bf16.msra.mxu1 %v6197_v61  ;;  %v6207_v59 = vld [vmem:[#allocation60_spill] sm:$0xff]  ;;  %v6208_v61 = vld [vmem:[#allocation61_spill] sm:$0xff] }
 0x294   :  { %1562 = vmatprep.subr.bf16.mxu0 %v6198_v62  ;;  %1603 = vmatprep.subr.bf16.mxu1 %v6199_v39  ;;  %v6209_v62 = vld [vmem:[#allocation62_spill] sm:$0xff]  ;;  %v6210_v39 = vld [vmem:[#allocation63_spill] sm:$0xff] }
 0x297   :  { %1563 = vmatpush2.bf16.msra.mxu0 %v6200_v45  ;;  %1604 = vmatpush2.bf16.msra.mxu1 %v6201_v46  ;;  %v6211_v45 = vld [vmem:[#allocation64_spill] sm:$0xff]  ;;  %v6212_v46 = vld [vmem:[#allocation65_spill] sm:$0xff] }
 0x298   :  { %1564 = vmatprep.subr.bf16.mxu0 %v6202_v47  ;;  %1605 = vmatprep.subr.bf16.mxu1 %v6203_v51  ;;  %v6213_v47 = vld [vmem:[#allocation66_spill] sm:$0xff]  ;;  %v6214_v51 = vld [vmem:[#allocation67_spill] sm:$0xff] }
 0x29b   :  { %1565 = vmatpush2.bf16.msra.mxu0 %v6204_v53  ;;  %1606 = vmatpush2.bf16.msra.mxu1 %v6205_v54  ;;  %v6215_v53 = vld [vmem:[#allocation68_spill] sm:$0xff] }
 0x29c   :  { %1566 = vmatprep.subr.bf16.mxu0 %v6206_v55  ;;  %1607 = vmatprep.subr.bf16.mxu1 %v6207_v59 }
 0x29f   :  { %1567 = vmatpush2.bf16.msra.mxu0 %v6208_v61  ;;  %1608 = vmatpush2.bf16.msra.mxu1 %v6209_v62 }
 0x2a0   :  { %1568 = vmatprep.subr.bf16.mxu0 %v6210_v39  ;;  %1609 = vmatprep.subr.bf16.mxu1 %v6211_v45 }
 0x2a3   :  { %1569 = vmatpush2.bf16.msra.mxu0 %v6212_v46  ;;  %1610 = vmatpush2.bf16.msra.mxu1 %v6213_v47  ;;  %v6218_v47 = vld [vmem:[#allocation139_spill] sm:$0xff] }
 0x2a4   :  { %1620 = vmatprep.subr.bf16.mxu0 %v6214_v51  ;;  %1661 = vmatprep.subr.bf16.mxu1 %v6215_v53 }
 0x2e6   :  { %v1355_v54 = vpop.f32.mrf.mxu0  ;;  %v1396_v55 = vpop.f32.mrf.mxu1 }
 0x2e7   :  { %v1356_v59 = vadd.f32 %v1355_v54, %v6216_v44 }
 0x2e8   :  { %v1357_v43 = vpop.f32.mrf.mxu0  ;;  %v1398_v61 = vpop.f32.mrf.mxu1 }
 0x2e9   :  { %v1489_v62 = vadd.f32 %v1356_v59, %v6217_v42  ;;  %v1399_v39 = vadd.f32 %v1398_v61, %v4013_v38  ;;  %v1358_v44 = vadd.f32 %v1357_v43, %v6116_v63  ;;  %v6219_v42 = vmov 0  }
 0x2ea   :  { %v1359_v37 = vpop.f32.mrf.mxu0  ;;  %v1400_v45 = vpop.f32.mrf.mxu1  ;;  %v1747_v59 = vsel %vm1746_vm5, 1, %v6219_v42 }
 0x2eb   :  { %v1493_v36 = vmul.f32 0.5, %v1489_v62  ;;  %v1492_v51 = vadd.f32 %v1399_v39, %v6218_v47  ;;  %v6220_v37 = vld [vmem:[#allocation140_spill] sm:$0xff]  ;;  %1749 = vperm.xlu1 %3263, %v1747_v59   ;;  %v6221_v47 = vld [vmem:[#allocation161_spill] sm:$0xff]  ;;  %v1397_v59 = vadd.f32 %v1396_v55, %v4019_v3 }
 0x2ec   :  { %v1360_v46 = vpop.f32.mrf.mxu0  ;;  %v1401_v35 = vpop.f32.mrf.mxu1  ;;  %v1490_v45 = vadd.f32 %v1358_v44, %v6220_v37 }
 0x2ed   :  { %3340 = vtanh.f32 %v1493_v36 }
 0x2ee   :  { %3342 = vtanh.f32 %v1492_v51  ;;  %v1494_v46 = vmul.f32 0.5, %v1490_v45  ;;  %v6222_v45 = vld [vmem:[#allocation137_spill] sm:$0xff] }
 0x2f0   :  { %3344 = vtanh.f32 %v1494_v46  ;;  %v1491_v46 = vadd.f32 %v1397_v59, %v6222_v45  ;;  %v1316_v45 = vpop.permute.xlu0 %1315 }
 0x2f1   :  { %vm1317_vm6 = vcmp.eq.s32.totalorder %v1316_v45, 1  ;;  %v6230_v45 = vld [vmem:[#allocation88_spill] sm:$0xff] }
 0x2fa   :  { %v3341_v53 = vpop.eup %3340 }
 0x2fb   :  { %v1499_v34 = vmul.f32 0.5, %v3341_v53  ;;  %v3343_v28 = vpop.eup %3342 }
 0x2fd   :  { %v1502_v29 = vadd.f32 0.5, %v1499_v34  ;;  %v3345_v22 = vpop.eup %3344 }
 0x2fe   :  { %v1500_v37 = vmul.f32 0.5, %v3345_v22 }
 0x2ff   :  { %v1507_v54 = vmul.f32 %v3343_v28, %v1502_v29 }
 0x326   :  { %v1437_v35 = vpop.f32.mrf.mxu0  ;;  %v1478_v36 = vpop.f32.mrf.mxu1 }
 0x327   :  { %v1438_v51 = vadd.f32 %v1437_v35, %v6221_v47  ;;  %v1479_v35 = vadd.f32 %v1478_v36, %v4534_v48 }
 0x328   :  { %v1439_v61 = vpop.f32.mrf.mxu0  ;;  %v1480_v53 = vpop.f32.mrf.mxu1 }
 0x329   :  { %v1511_v34 = vmul.f32 0.5, %v1438_v51  ;;  %v1440_v28 = vadd.f32 %v1439_v61, %v4522_v7  ;;  %v1481_v44 = vadd.f32 %v1480_v53, %v4528_v56  ;;  %v1503_v51 = vadd.f32 0.5, %v1500_v37 }
 0x32a   :  { %v1441_v29 = vpop.f32.mrf.mxu0  ;;  %v1482_v43 = vpop.f32.mrf.mxu1  ;;  %v1495_v61 = vmul.f32 0.5, %v1491_v46 }
 0x32b   :  { %3346 = vtanh.f32 %v1511_v34  ;;  %v1512_v62 = vmul.f32 0.5, %v1440_v28  ;;  %v1513_v29 = vmul.f32 0.5, %v1479_v35  ;;  %v1506_v34 = vmul.f32 %v1503_v51, %v4539_v2 }
 0x32c   :  { %v1442_v39 = vpop.f32.mrf.mxu0  ;;  %v1483_v42 = vpop.f32.mrf.mxu1 }
 0x32d   :  { %3348 = vtanh.f32 %v1512_v62  ;;  %v4698_v39 = vadd.f32 %v1507_v54, %v1506_v34 }
 0x32e   :  { %3350 = vtanh.f32 %v1481_v44 }
 0x32f   :  { %3352 = vtanh.f32 %v1495_v61  ;;  %v1533_v61 = vpop.permute.xlu0 %1532 }
 0x330   :  { %3354 = vtanh.f32 %v1513_v29  ;;  %vm1534_vm7 = vcmp.eq.s32.totalorder %v1533_v61, 1  ;;  %v6234_v61 = vld [vmem:[#allocation92_spill] sm:$0xff] }
 0x331   :  { %3356 = vtanh.f32 %v4698_v39 }
 0x338   :  { %v3347_v43 = vpop.eup %3346 }
 0x339   :  { %v1517_v28 = vmul.f32 0.5, %v3347_v43 }
 0x33a   :  { %v3349_v42 = vpop.eup %3348 }
 0x33b   :  { %v1520_v62 = vadd.f32 0.5, %v1517_v28  ;;  %v1518_v53 = vmul.f32 0.5, %v3349_v42  ;;  %v3351_v22 = vpop.eup %3350  ;;  %v1318_v28 = vsel %vm1317_vm6, %v4545_v31, 0.0  ;;  %v6223_v31 = vld [vmem:[#allocation81_spill] sm:$0xff] }
 0x33c   :  { %v3353_v2 = vpop.eup %3352 }
 0x33d   :  { %v1521_v55 = vadd.f32 0.5, %v1518_v53  ;;  %v1525_v59 = vmul.f32 %v3351_v22, %v1520_v62  ;;  %v3355_v37 = vpop.eup %3354  ;;  %v1501_v46 = vmul.f32 0.5, %v3353_v2  ;;  %v6225_v22 = vld [vmem:[#allocation83_spill] sm:$0xff]  ;;  %v6228_v2 = vld [vmem:[#allocation86_spill] sm:$0xff] }
 0x33e   :  { %v1519_v35 = vmul.f32 0.5, %v3355_v37  ;;  %v3357_v51 = vpop.eup %3356  ;;  %v6229_v37 = vld [vmem:[#allocation87_spill] sm:$0xff] }
 0x33f   :  { %v1524_v44 = vmul.f32 %v1521_v55, %v4542_v33  ;;  %v1504_v54 = vadd.f32 0.5, %v1501_v46  ;;  %v6224_v55 = vld [vmem:[#allocation82_spill] sm:$0xff]  ;;  %v6231_v46 = vld [vmem:[#allocation89_spill] sm:$0xff] }
 0x340   :  { %v1522_v29 = vadd.f32 0.5, %v1519_v35  ;;  %v6232_v35 = vld [vmem:[#allocation90_spill] sm:$0xff] }
 0x341   :  { %v4702_v36 = vadd.f32 %v1525_v59, %v1524_v44  ;;  %v1510_v33 = vmul.f32 %v3357_v51, %v1504_v54  ;;  %v6226_v44 = vld [vmem:[#allocation84_spill] sm:$0xff]  ;;  %v6227_v59 = vld [vmem:[#allocation85_spill] sm:$0xff]  ;;  %v6233_v51 = vld [vmem:[#allocation91_spill] sm:$0xff] }
 0x342   :  { %v6235_v54 = vld [vmem:[#allocation93_spill] sm:$0xff] }
 0x343   :  { %3358 = vtanh.f32 %v4702_v36  ;;  %v4708_v53 = vpack.c.bf16 %v1510_v33, %v1510_v33  ;;  %v6238_v33 = vld [vmem:[#allocation96_spill] sm:$0xff] }
 0x350   :  { %v3359_v43 = vpop.eup %3358 }
 0x351   :  { %v1528_v34 = vmul.f32 %v3359_v43, %v1522_v29  ;;  %v6236_v29 = vld [vmem:[#allocation94_spill] sm:$0xff]  ;;  %v6237_v43 = vld [vmem:[#allocation95_spill] sm:$0xff] }
 0x353   :  { %v4706_v42 = vsel %vm1534_vm7, %v1528_v34, %v1318_v28  ;;  %v1537_v62 = vpack.c.bf16 %v1528_v34, %v1528_v34  ;;  %v6239_v34 = vld [vmem:[#allocation97_spill] sm:$0xff]  ;;  %v6240_v28 = vld [vmem:[#allocation98_spill] sm:$0xff] }
 0x355   :  { %1570 = vmatprep.mubr.bf16.mxu0 %v1537_v62  ;;  %1611 = vmatprep.mubr.bf16.mxu1 %v1537_v62 }
 0x356   :  { %1571 = vmatmul.mubr.bf16.vlgmr.msra.gmra.mxu0 %v4708_v53  ;;  %1612 = vmatmul.mubr.bf16.vlgmr.msra.gmra.mxu1 %v4708_v53 }
 0x357   :  { %1621 = vmatpush1.bf16.msra.mxu0 %v6124_v14  ;;  %1662 = vmatpush1.bf16.msra.mxu1 %v6125_v9 }
 0x358   :  { %1652 = vmatprep.mubr.bf16.mxu0 %v1537_v62  ;;  %1693 = vmatprep.mubr.bf16.mxu1 %v1537_v62  ;;  %v6241_v62 = vld [vmem:[#allocation99_spill] sm:$0xff] }
 0x359   :  { %1622 = vmatprep.subr.bf16.mxu0 %v6126_v12  ;;  %1663 = vmatprep.subr.bf16.mxu1 %v6127_v52 }
 0x35b   :  { %1623 = vmatpush1.bf16.msra.mxu0 %v6128_v57  ;;  %1664 = vmatpush1.bf16.msra.mxu1 %v6129_v19 }
 0x35c   :  { %1624 = vmatprep.subr.bf16.mxu0 %v6223_v31  ;;  %1665 = vmatprep.subr.bf16.mxu1 %v6224_v55 }
 0x35f   :  { %1625 = vmatpush1.bf16.msra.mxu0 %v6225_v22  ;;  %1666 = vmatpush1.bf16.msra.mxu1 %v6226_v44 }
 0x360   :  { %1626 = vmatprep.subr.bf16.mxu0 %v6227_v59  ;;  %1667 = vmatprep.subr.bf16.mxu1 %v6228_v2 }
 0x363   :  { %1627 = vmatpush1.bf16.msra.mxu0 %v6229_v37  ;;  %1668 = vmatpush1.bf16.msra.mxu1 %v6230_v45 }
 0x364   :  { %1628 = vmatprep.subr.bf16.mxu0 %v6231_v46  ;;  %1669 = vmatprep.subr.bf16.mxu1 %v6232_v35  ;;  %v6242_v46 = vld [vmem:[#allocation100_spill] sm:$0xff]  ;;  %v6243_v35 = vld [vmem:[#allocation101_spill] sm:$0xff] }
 0x367   :  { %1629 = vmatpush1.bf16.msra.mxu0 %v6233_v51  ;;  %1670 = vmatpush1.bf16.msra.mxu1 %v6234_v61  ;;  %v6244_v51 = vld [vmem:[#allocation102_spill] sm:$0xff]  ;;  %v6245_v61 = vld [vmem:[#allocation103_spill] sm:$0xff] }
 0x368   :  { %1630 = vmatprep.subr.bf16.mxu0 %v6235_v54  ;;  %1671 = vmatprep.subr.bf16.mxu1 %v6236_v29  ;;  %v6246_v54 = vld [vmem:[#allocation104_spill] sm:$0xff]  ;;  %v6247_v29 = vld [vmem:[#allocation105_spill] sm:$0xff] }
 0x36b   :  { %1631 = vmatpush1.bf16.msra.mxu0 %v6237_v43  ;;  %1672 = vmatpush1.bf16.msra.mxu1 %v6238_v33  ;;  %v6248_v43 = vld [vmem:[#allocation106_spill] sm:$0xff]  ;;  %v6249_v33 = vld [vmem:[#allocation107_spill] sm:$0xff] }
 0x36c   :  { %1632 = vmatprep.subr.bf16.mxu0 %v6239_v34  ;;  %1673 = vmatprep.subr.bf16.mxu1 %v6240_v28  ;;  %v6250_v34 = vld [vmem:[#allocation108_spill] sm:$0xff]  ;;  %v6251_v28 = vld [vmem:[#allocation109_spill] sm:$0xff] }
 0x36f   :  { %1633 = vmatpush1.bf16.msra.mxu0 %v6241_v62  ;;  %1674 = vmatpush1.bf16.msra.mxu1 %v6242_v46  ;;  %v6252_v62 = vld [vmem:[#allocation110_spill] sm:$0xff]  ;;  %v6253_v46 = vld [vmem:[#allocation111_spill] sm:$0xff] }
 0x370   :  { %1634 = vmatprep.subr.bf16.mxu0 %v6243_v35  ;;  %1675 = vmatprep.subr.bf16.mxu1 %v6244_v51  ;;  %v6254_v35 = vld [vmem:[#allocation112_spill] sm:$0xff]  ;;  %v6255_v51 = vld [vmem:[#allocation113_spill] sm:$0xff] }
 0x373   :  { %1635 = vmatpush1.bf16.msra.mxu0 %v6245_v61  ;;  %1676 = vmatpush1.bf16.msra.mxu1 %v6246_v54  ;;  %v6256_v61 = vld [vmem:[#allocation114_spill] sm:$0xff]  ;;  %v6257_v54 = vld [vmem:[#allocation115_spill] sm:$0xff] }
 0x374   :  { %1636 = vmatprep.subr.bf16.mxu0 %v6247_v29  ;;  %1677 = vmatprep.subr.bf16.mxu1 %v6248_v43  ;;  %v6258_v29 = vld [vmem:[#allocation116_spill] sm:$0xff] }
 0x377   :  { %1637 = vmatpush2.bf16.msra.mxu0 %v6249_v33  ;;  %1678 = vmatpush2.bf16.msra.mxu1 %v6250_v34 }
 0x378   :  { %1638 = vmatprep.subr.bf16.mxu0 %v6251_v28  ;;  %1679 = vmatprep.subr.bf16.mxu1 %v6252_v62 }
 0x37b   :  { %1639 = vmatpush2.bf16.msra.mxu0 %v6253_v46  ;;  %1680 = vmatpush2.bf16.msra.mxu1 %v6254_v35 }
 0x37c   :  { %1640 = vmatprep.subr.bf16.mxu0 %v6255_v51  ;;  %1681 = vmatprep.subr.bf16.mxu1 %v6256_v61 }
 0x37f   :  { %1641 = vmatpush2.bf16.msra.mxu0 %v6257_v54  ;;  %1682 = vmatpush2.bf16.msra.mxu1 %v6258_v29 }
 0x380   :  { %1642 = vmatprep.subr.bf16.mxu0 %v6166_v41  ;;  %1683 = vmatprep.subr.bf16.mxu1 %v6167_v6 }
 0x383   :  { %1643 = vmatpush2.bf16.msra.mxu0 %v6168_v30  ;;  %1684 = vmatpush2.bf16.msra.mxu1 %v6169_v5 }
 0x384   :  { %1644 = vmatprep.subr.bf16.mxu0 %v6170_v50  ;;  %1685 = vmatprep.subr.bf16.mxu1 %v6171_v18 }
 0x387   :  { %1645 = vmatpush2.bf16.msra.mxu0 %v6172_v4  ;;  %1686 = vmatpush2.bf16.msra.mxu1 %v6173_v8 }
 0x388   :  { %1646 = vmatprep.subr.bf16.mxu0 %v6174_v0  ;;  %1687 = vmatprep.subr.bf16.mxu1 %v6175_v40  ;;  %v6320_v0 = vld [vmem:[#allocation72_spill] sm:$0xff] }
 0x389   :  { %vm1963_vm8 = vcmp.eq.s32.totalorder %v6320_v0, 3  ;;  %vm2180_vm10 = vcmp.eq.s32.totalorder %v6320_v0, 4  ;;  %vm2397_vm12 = vcmp.eq.s32.totalorder %v6320_v0, 5  ;;  %vm2614_vm14 = vcmp.eq.s32.totalorder %v6320_v0, 6  ;;  %v6659_v0 = vld [vmem:[#allocation67_spill] sm:$0xff] }
 0x38b   :  { %1647 = vmatpush2.bf16.msra.mxu0 %v6176_v58  ;;  %1688 = vmatpush2.bf16.msra.mxu1 %v4351_v60 }
 0x38c   :  { %1648 = vmatprep.subr.bf16.mxu0 %v4355_v23  ;;  %1689 = vmatprep.subr.bf16.mxu1 %v4357_v25 }
 0x38f   :  { %1649 = vmatpush2.bf16.msra.mxu0 %v4373_v32  ;;  %1690 = vmatpush2.bf16.msra.mxu1 %v4375_v24  ;;  %v6318_v24 = vld [vmem:[#allocation142_spill] sm:$0xff] }
 0x390   :  { %1650 = vmatprep.subr.bf16.mxu0 %v4379_v17  ;;  %1691 = vmatprep.subr.bf16.mxu1 %v4381_v49  ;;  %v6317_v49 = vld [vmem:[#allocation73_spill] sm:$0xff] }
 0x393   :  { %1651 = vmatpush2.bf16.msra.mxu0 %v4385_v1  ;;  %1692 = vmatpush2.bf16.msra.mxu1 %v4387_v11  ;;  %v6259_v11 = vld [vmem:[#allocation11_spill] sm:$0xff]  ;;  %v6262_v1 = vld [vmem:[#allocation14_spill] sm:$0xff] }
 0x394   :  { %1755 = vmatprep.subr.bf16.mxu0 %v3550_v10  ;;  %1796 = vmatprep.subr.bf16.mxu1 %v3563_v15  ;;  %v6260_v10 = vld [vmem:[#allocation12_spill] sm:$0xff]  ;;  %v6261_v15 = vld [vmem:[#allocation13_spill] sm:$0xff] }
 0x396   :  { %1653 = vmatmul.mubr.bf16.vlgmr.msra.gmra.mxu0 %v4708_v53  ;;  %1694 = vmatmul.mubr.bf16.vlgmr.msra.gmra.mxu1 %v4708_v53  ;;  %v6263_v53 = vld [vmem:[#allocation15_spill] sm:$0xff] }
 0x397   :  { %1756 = vmatpush1.bf16.msra.mxu0 %v3558_v13  ;;  %1797 = vmatpush1.bf16.msra.mxu1 %v3565_v16  ;;  %v6264_v13 = vld [vmem:[#allocation16_spill] sm:$0xff]  ;;  %v6265_v16 = vld [vmem:[#allocation17_spill] sm:$0xff] }
 0x398   :  { %1757 = vmatprep.subr.bf16.mxu0 %v3577_v20  ;;  %1798 = vmatprep.subr.bf16.mxu1 %v3579_v21  ;;  %v6266_v20 = vld [vmem:[#allocation18_spill] sm:$0xff]  ;;  %v6267_v21 = vld [vmem:[#allocation19_spill] sm:$0xff] }
 0x39b   :  { %1758 = vmatpush1.bf16.msra.mxu0 %v3597_v26  ;;  %1799 = vmatpush1.bf16.msra.mxu1 %v3601_v27  ;;  %v6268_v26 = vld [vmem:[#allocation20_spill] sm:$0xff]  ;;  %v6269_v27 = vld [vmem:[#allocation21_spill] sm:$0xff] }
 0x39c   :  { %1759 = vmatprep.subr.bf16.mxu0 %v6259_v11  ;;  %1800 = vmatprep.subr.bf16.mxu1 %v6260_v10  ;;  %v6270_v11 = vld [vmem:[#allocation22_spill] sm:$0xff]  ;;  %v6271_v10 = vld [vmem:[#allocation23_spill] sm:$0xff] }
 0x39f   :  { %1760 = vmatpush1.bf16.msra.mxu0 %v6261_v15  ;;  %1801 = vmatpush1.bf16.msra.mxu1 %v6262_v1  ;;  %v6272_v15 = vld [vmem:[#allocation24_spill] sm:$0xff]  ;;  %v6273_v1 = vld [vmem:[#allocation25_spill] sm:$0xff] }
 0x3a0   :  { %1761 = vmatprep.subr.bf16.mxu0 %v6263_v53  ;;  %1802 = vmatprep.subr.bf16.mxu1 %v6264_v13  ;;  %v6274_v53 = vld [vmem:[#allocation26_spill] sm:$0xff]  ;;  %v6275_v13 = vld [vmem:[#allocation27_spill] sm:$0xff] }
 0x3a3   :  { %1762 = vmatpush1.bf16.msra.mxu0 %v6265_v16  ;;  %1803 = vmatpush1.bf16.msra.mxu1 %v6266_v20  ;;  %v6276_v16 = vld [vmem:[#allocation28_spill] sm:$0xff]  ;;  %v6277_v20 = vld [vmem:[#allocation29_spill] sm:$0xff] }
 0x3a4   :  { %1763 = vmatprep.subr.bf16.mxu0 %v6267_v21  ;;  %1804 = vmatprep.subr.bf16.mxu1 %v6268_v26  ;;  %v6278_v21 = vld [vmem:[#allocation30_spill] sm:$0xff]  ;;  %v6279_v26 = vld [vmem:[#allocation31_spill] sm:$0xff] }
 0x3a7   :  { %1764 = vmatpush1.bf16.msra.mxu0 %v6269_v27  ;;  %1805 = vmatpush1.bf16.msra.mxu1 %v6270_v11  ;;  %v6280_v27 = vld [vmem:[#allocation32_spill] sm:$0xff]  ;;  %v6281_v11 = vld [vmem:[#allocation33_spill] sm:$0xff] }
 0x3a8   :  { %1765 = vmatprep.subr.bf16.mxu0 %v6271_v10  ;;  %1806 = vmatprep.subr.bf16.mxu1 %v6272_v15  ;;  %v6282_v10 = vld [vmem:[#allocation34_spill] sm:$0xff]  ;;  %v6283_v15 = vld [vmem:[#allocation35_spill] sm:$0xff] }
 0x3ab   :  { %1766 = vmatpush1.bf16.msra.mxu0 %v6273_v1  ;;  %1807 = vmatpush1.bf16.msra.mxu1 %v6274_v53  ;;  %v6284_v1 = vld [vmem:[#allocation36_spill] sm:$0xff]  ;;  %v6285_v53 = vld [vmem:[#allocation37_spill] sm:$0xff] }
 0x3ac   :  { %1767 = vmatprep.subr.bf16.mxu0 %v6275_v13  ;;  %1808 = vmatprep.subr.bf16.mxu1 %v6276_v16  ;;  %v6286_v13 = vld [vmem:[#allocation38_spill] sm:$0xff]  ;;  %v6287_v16 = vld [vmem:[#allocation39_spill] sm:$0xff] }
 0x3af   :  { %1768 = vmatpush1.bf16.msra.mxu0 %v6277_v20  ;;  %1809 = vmatpush1.bf16.msra.mxu1 %v6278_v21  ;;  %v6288_v20 = vld [vmem:[#allocation40_spill] sm:$0xff]  ;;  %v6289_v21 = vld [vmem:[#allocation41_spill] sm:$0xff] }
 0x3b0   :  { %1769 = vmatprep.subr.bf16.mxu0 %v6279_v26  ;;  %1810 = vmatprep.subr.bf16.mxu1 %v6280_v27  ;;  %v6290_v26 = vld [vmem:[#allocation42_spill] sm:$0xff]  ;;  %v6291_v27 = vld [vmem:[#allocation43_spill] sm:$0xff] }
 0x3b3   :  { %1770 = vmatpush1.bf16.msra.mxu0 %v6281_v11  ;;  %1811 = vmatpush1.bf16.msra.mxu1 %v6282_v10  ;;  %v6292_v11 = vld [vmem:[#allocation44_spill] sm:$0xff]  ;;  %v6293_v10 = vld [vmem:[#allocation45_spill] sm:$0xff] }
 0x3b4   :  { %1771 = vmatprep.subr.bf16.mxu0 %v6283_v15  ;;  %1812 = vmatprep.subr.bf16.mxu1 %v6284_v1  ;;  %v6294_v15 = vld [vmem:[#allocation46_spill] sm:$0xff]  ;;  %v6295_v1 = vld [vmem:[#allocation47_spill] sm:$0xff] }
 0x3b7   :  { %1772 = vmatpush2.bf16.msra.mxu0 %v6285_v53  ;;  %1813 = vmatpush2.bf16.msra.mxu1 %v6286_v13  ;;  %v6296_v53 = vld [vmem:[#allocation48_spill] sm:$0xff]  ;;  %v6297_v13 = vld [vmem:[#allocation49_spill] sm:$0xff] }
 0x3b8   :  { %1773 = vmatprep.subr.bf16.mxu0 %v6287_v16  ;;  %1814 = vmatprep.subr.bf16.mxu1 %v6288_v20  ;;  %v6298_v16 = vld [vmem:[#allocation50_spill] sm:$0xff]  ;;  %v6299_v20 = vld [vmem:[#allocation51_spill] sm:$0xff] }
 0x3bb   :  { %1774 = vmatpush2.bf16.msra.mxu0 %v6289_v21  ;;  %1815 = vmatpush2.bf16.msra.mxu1 %v6290_v26  ;;  %v6300_v21 = vld [vmem:[#allocation52_spill] sm:$0xff]  ;;  %v6301_v26 = vld [vmem:[#allocation53_spill] sm:$0xff] }
 0x3bc   :  { %1775 = vmatprep.subr.bf16.mxu0 %v6291_v27  ;;  %1816 = vmatprep.subr.bf16.mxu1 %v6292_v11  ;;  %v6302_v27 = vld [vmem:[#allocation54_spill] sm:$0xff]  ;;  %v6303_v11 = vld [vmem:[#allocation55_spill] sm:$0xff] }
 0x3bf   :  { %1776 = vmatpush2.bf16.msra.mxu0 %v6293_v10  ;;  %1817 = vmatpush2.bf16.msra.mxu1 %v6294_v15  ;;  %v6304_v10 = vld [vmem:[#allocation56_spill] sm:$0xff]  ;;  %v6305_v15 = vld [vmem:[#allocation57_spill] sm:$0xff] }
 0x3c0   :  { %1777 = vmatprep.subr.bf16.mxu0 %v6295_v1  ;;  %1818 = vmatprep.subr.bf16.mxu1 %v6296_v53  ;;  %v6306_v1 = vld [vmem:[#allocation58_spill] sm:$0xff]  ;;  %v6307_v53 = vld [vmem:[#allocation59_spill] sm:$0xff] }
 0x3c3   :  { %1778 = vmatpush2.bf16.msra.mxu0 %v6297_v13  ;;  %1819 = vmatpush2.bf16.msra.mxu1 %v6298_v16  ;;  %v6308_v13 = vld [vmem:[#allocation60_spill] sm:$0xff]  ;;  %v6309_v16 = vld [vmem:[#allocation61_spill] sm:$0xff] }
 0x3c4   :  { %1779 = vmatprep.subr.bf16.mxu0 %v6299_v20  ;;  %1820 = vmatprep.subr.bf16.mxu1 %v6300_v21  ;;  %v6310_v20 = vld [vmem:[#allocation62_spill] sm:$0xff]  ;;  %v6311_v21 = vld [vmem:[#allocation63_spill] sm:$0xff] }
 0x3c7   :  { %1780 = vmatpush2.bf16.msra.mxu0 %v6301_v26  ;;  %1821 = vmatpush2.bf16.msra.mxu1 %v6302_v27  ;;  %v6312_v26 = vld [vmem:[#allocation64_spill] sm:$0xff]  ;;  %v6313_v27 = vld [vmem:[#allocation65_spill] sm:$0xff] }
 0x3c8   :  { %1781 = vmatprep.subr.bf16.mxu0 %v6303_v11  ;;  %1822 = vmatprep.subr.bf16.mxu1 %v6304_v10  ;;  %v6314_v11 = vld [vmem:[#allocation66_spill] sm:$0xff]  ;;  %v6315_v10 = vld [vmem:[#allocation67_spill] sm:$0xff] }
 0x3cb   :  { %1782 = vmatpush2.bf16.msra.mxu0 %v6305_v15  ;;  %1823 = vmatpush2.bf16.msra.mxu1 %v6306_v1  ;;  %v6316_v15 = vld [vmem:[#allocation68_spill] sm:$0xff] }
 0x3cc   :  { %1783 = vmatprep.subr.bf16.mxu0 %v6307_v53  ;;  %1824 = vmatprep.subr.bf16.mxu1 %v6308_v13 }
 0x3cf   :  { %1784 = vmatpush2.bf16.msra.mxu0 %v6309_v16  ;;  %1825 = vmatpush2.bf16.msra.mxu1 %v6310_v20 }
 0x3d0   :  { %1785 = vmatprep.subr.bf16.mxu0 %v6311_v21  ;;  %1826 = vmatprep.subr.bf16.mxu1 %v6312_v26 }
 0x3d3   :  { %1786 = vmatpush2.bf16.msra.mxu0 %v6313_v27  ;;  %1827 = vmatpush2.bf16.msra.mxu1 %v6314_v11  ;;  %v6319_v11 = vld [vmem:[#allocation143_spill] sm:$0xff] }
 0x3d4   :  { %1837 = vmatprep.subr.bf16.mxu0 %v6315_v10  ;;  %1878 = vmatprep.subr.bf16.mxu1 %v6316_v15 }
 0x416   :  { %v1572_v1 = vpop.f32.mrf.mxu0  ;;  %v1613_v53 = vpop.f32.mrf.mxu1 }
 0x417   :  { %v1573_v13 = vadd.f32 %v1572_v1, %v6317_v49 }
 0x418   :  { %v1574_v17 = vpop.f32.mrf.mxu0  ;;  %v1615_v16 = vpop.f32.mrf.mxu1 }
 0x419   :  { %v1706_v20 = vadd.f32 %v1573_v13, %v6318_v24  ;;  %v1616_v21 = vadd.f32 %v1615_v16, %v4013_v38  ;;  %v1575_v49 = vadd.f32 %v1574_v17, %v6116_v63  ;;  %v6321_v13 = vmov 0  }
 0x41a   :  { %v1576_v32 = vpop.f32.mrf.mxu0  ;;  %v1617_v26 = vpop.f32.mrf.mxu1  ;;  %v1964_v16 = vsel %vm1963_vm8, 1, %v6321_v13 }
 0x41b   :  { %v1710_v25 = vmul.f32 0.5, %v1706_v20  ;;  %v1709_v10 = vadd.f32 %v1616_v21, %v6319_v11  ;;  %v6322_v32 = vld [vmem:[#allocation144_spill] sm:$0xff]  ;;  %1966 = vperm.xlu1 %3263, %v1964_v16   ;;  %v1614_v16 = vadd.f32 %v1613_v53, %v4019_v3 }
 0x41c   :  { %v1577_v27 = vpop.f32.mrf.mxu0  ;;  %v1618_v23 = vpop.f32.mrf.mxu1  ;;  %v1707_v26 = vadd.f32 %v1575_v49, %v6322_v32 }
 0x41d   :  { %3360 = vtanh.f32 %v1710_v25 }
 0x41e   :  { %3362 = vtanh.f32 %v1709_v10  ;;  %v1711_v20 = vmul.f32 0.5, %v1707_v26  ;;  %v6323_v26 = vld [vmem:[#allocation141_spill] sm:$0xff] }
 0x420   :  { %3364 = vtanh.f32 %v1711_v20  ;;  %v1708_v20 = vadd.f32 %v1614_v16, %v6323_v26 }
 0x42a   :  { %v3361_v15 = vpop.eup %3360 }
 0x42b   :  { %v1716_v60 = vmul.f32 0.5, %v3361_v15  ;;  %v3363_v40 = vpop.eup %3362 }
 0x42d   :  { %v1719_v58 = vadd.f32 0.5, %v1716_v60  ;;  %v3365_v13 = vpop.eup %3364 }
 0x42e   :  { %v1717_v32 = vmul.f32 0.5, %v3365_v13 }
 0x42f   :  { %v1724_v1 = vmul.f32 %v3363_v40, %v1719_v58 }
 0x456   :  { %v1654_v27 = vpop.f32.mrf.mxu0  ;;  %v1695_v23 = vpop.f32.mrf.mxu1 }
 0x457   :  { %v1655_v10 = vadd.f32 %v1654_v27, %v6221_v47  ;;  %v1696_v27 = vadd.f32 %v1695_v23, %v4534_v48 }
 0x458   :  { %v1656_v21 = vpop.f32.mrf.mxu0  ;;  %v1697_v15 = vpop.f32.mrf.mxu1 }
 0x459   :  { %v1728_v25 = vmul.f32 0.5, %v1655_v10  ;;  %v1657_v11 = vadd.f32 %v1656_v21, %v4522_v7  ;;  %v1698_v49 = vadd.f32 %v1697_v15, %v4528_v56  ;;  %v1720_v10 = vadd.f32 0.5, %v1717_v32 }
 0x45a   :  { %v1658_v60 = vpop.f32.mrf.mxu0  ;;  %v1699_v17 = vpop.f32.mrf.mxu1  ;;  %v1712_v21 = vmul.f32 0.5, %v1708_v20 }
 0x45b   :  { %3366 = vtanh.f32 %v1728_v25  ;;  %v1729_v24 = vmul.f32 0.5, %v1657_v11  ;;  %v1730_v60 = vmul.f32 0.5, %v1696_v27  ;;  %v1723_v25 = vmul.f32 %v1720_v10, %v4698_v39  ;;  %v1750_v10 = vpop.permute.xlu1 %1749 }
 0x45c   :  { %v1659_v40 = vpop.f32.mrf.mxu0  ;;  %v1700_v58 = vpop.f32.mrf.mxu1  ;;  %vm1751_vm9 = vcmp.eq.s32.totalorder %v1750_v10, 1  ;;  %v6336_v10 = vld [vmem:[#allocation101_spill] sm:$0xff] }
 0x45d   :  { %3368 = vtanh.f32 %v1729_v24  ;;  %v4857_v58 = vadd.f32 %v1724_v1, %v1723_v25 }
 0x45e   :  { %3370 = vtanh.f32 %v1698_v49 }
 0x45f   :  { %3372 = vtanh.f32 %v1712_v21 }
 0x460   :  { %3374 = vtanh.f32 %v1730_v60 }
 0x461   :  { %3376 = vtanh.f32 %v4857_v58 }
 0x468   :  { %v3367_v17 = vpop.eup %3366 }
 0x469   :  { %v1734_v11 = vmul.f32 0.5, %v3367_v17 }
 0x46a   :  { %v3369_v40 = vpop.eup %3368 }
 0x46b   :  { %v1737_v24 = vadd.f32 0.5, %v1734_v11  ;;  %v1735_v15 = vmul.f32 0.5, %v3369_v40  ;;  %v3371_v13 = vpop.eup %3370 }
 0x46c   :  { %v3373_v39 = vpop.eup %3372 }
 0x46d   :  { %v1738_v53 = vadd.f32 0.5, %v1735_v15  ;;  %v1742_v16 = vmul.f32 %v3371_v13, %v1737_v24  ;;  %v3375_v32 = vpop.eup %3374  ;;  %v1718_v26 = vmul.f32 0.5, %v3373_v39  ;;  %v6325_v24 = vld [vmem:[#allocation90_spill] sm:$0xff]  ;;  %v6326_v15 = vld [vmem:[#allocation91_spill] sm:$0xff]  ;;  %v6328_v13 = vld [vmem:[#allocation93_spill] sm:$0xff] }
 0x46e   :  { %v1736_v20 = vmul.f32 0.5, %v3375_v32  ;;  %v3377_v27 = vpop.eup %3376  ;;  %v6331_v39 = vld [vmem:[#allocation96_spill] sm:$0xff]  ;;  %v6332_v32 = vld [vmem:[#allocation97_spill] sm:$0xff] }
 0x46f   :  { %v1741_v49 = vmul.f32 %v1738_v53, %v4702_v36  ;;  %v1721_v21 = vadd.f32 0.5, %v1718_v26  ;;  %v6327_v53 = vld [vmem:[#allocation92_spill] sm:$0xff]  ;;  %v6333_v26 = vld [vmem:[#allocation98_spill] sm:$0xff] }
 0x470   :  { %v1739_v1 = vadd.f32 0.5, %v1736_v20  ;;  %v6334_v20 = vld [vmem:[#allocation99_spill] sm:$0xff] }
 0x471   :  { %v4861_v23 = vadd.f32 %v1742_v16, %v1741_v49  ;;  %v1727_v17 = vmul.f32 %v3377_v27, %v1721_v21  ;;  %v6329_v49 = vld [vmem:[#allocation94_spill] sm:$0xff]  ;;  %v6330_v16 = vld [vmem:[#allocation95_spill] sm:$0xff]  ;;  %v6335_v27 = vld [vmem:[#allocation100_spill] sm:$0xff] }
 0x472   :  { %v6337_v21 = vld [vmem:[#allocation102_spill] sm:$0xff] }
 0x473   :  { %3378 = vtanh.f32 %v4861_v23  ;;  %v4867_v40 = vpack.c.bf16 %v1727_v17, %v1727_v17  ;;  %v6340_v17 = vld [vmem:[#allocation105_spill] sm:$0xff] }
 0x480   :  { %v3379_v60 = vpop.eup %3378 }
 0x481   :  { %v1745_v25 = vmul.f32 %v3379_v60, %v1739_v1  ;;  %v6338_v1 = vld [vmem:[#allocation103_spill] sm:$0xff]  ;;  %v6339_v60 = vld [vmem:[#allocation104_spill] sm:$0xff] }
 0x483   :  { %v4865_v36 = vsel %vm1751_vm9, %v1745_v25, %v4706_v42  ;;  %v1754_v11 = vpack.c.bf16 %v1745_v25, %v1745_v25  ;;  %v6324_v42 = vld [vmem:[#allocation89_spill] sm:$0xff] }
 0x484   :  { %v6341_v25 = vld [vmem:[#allocation125_spill] sm:$0xff] }
 0x485   :  { %1787 = vmatprep.mubr.bf16.mxu0 %v1754_v11  ;;  %1828 = vmatprep.mubr.bf16.mxu1 %v1754_v11 }
 0x486   :  { %1788 = vmatmul.mubr.bf16.vlgmr.msra.gmra.mxu0 %v4867_v40  ;;  %1829 = vmatmul.mubr.bf16.vlgmr.msra.gmra.mxu1 %v4867_v40 }
 0x487   :  { %1838 = vmatpush1.bf16.msra.mxu0 %v6124_v14  ;;  %1879 = vmatpush1.bf16.msra.mxu1 %v6125_v9 }
 0x488   :  { %1869 = vmatprep.mubr.bf16.mxu0 %v1754_v11  ;;  %1910 = vmatprep.mubr.bf16.mxu1 %v1754_v11  ;;  %v6342_v11 = vld [vmem:[#allocation126_spill] sm:$0xff] }
 0x489   :  { %1839 = vmatprep.subr.bf16.mxu0 %v6126_v12  ;;  %1880 = vmatprep.subr.bf16.mxu1 %v6127_v52 }
 0x48b   :  { %1840 = vmatpush1.bf16.msra.mxu0 %v6128_v57  ;;  %1881 = vmatpush1.bf16.msra.mxu1 %v6129_v19 }
 0x48c   :  { %1841 = vmatprep.subr.bf16.mxu0 %v6223_v31  ;;  %1882 = vmatprep.subr.bf16.mxu1 %v6224_v55 }
 0x48f   :  { %1842 = vmatpush1.bf16.msra.mxu0 %v6225_v22  ;;  %1883 = vmatpush1.bf16.msra.mxu1 %v6226_v44 }
 0x490   :  { %1843 = vmatprep.subr.bf16.mxu0 %v6227_v59  ;;  %1884 = vmatprep.subr.bf16.mxu1 %v6228_v2 }
 0x493   :  { %1844 = vmatpush1.bf16.msra.mxu0 %v6229_v37  ;;  %1885 = vmatpush1.bf16.msra.mxu1 %v6230_v45 }
 0x494   :  { %1845 = vmatprep.subr.bf16.mxu0 %v6324_v42  ;;  %1886 = vmatprep.subr.bf16.mxu1 %v6325_v24 }
 0x497   :  { %1846 = vmatpush1.bf16.msra.mxu0 %v6326_v15  ;;  %1887 = vmatpush1.bf16.msra.mxu1 %v6327_v53 }
 0x498   :  { %1847 = vmatprep.subr.bf16.mxu0 %v6328_v13  ;;  %1888 = vmatprep.subr.bf16.mxu1 %v6329_v49 }
 0x49b   :  { %1848 = vmatpush1.bf16.msra.mxu0 %v6330_v16  ;;  %1889 = vmatpush1.bf16.msra.mxu1 %v6331_v39 }
 0x49c   :  { %1849 = vmatprep.subr.bf16.mxu0 %v6332_v32  ;;  %1890 = vmatprep.subr.bf16.mxu1 %v6333_v26 }
 0x49f   :  { %1850 = vmatpush1.bf16.msra.mxu0 %v6334_v20  ;;  %1891 = vmatpush1.bf16.msra.mxu1 %v6335_v27 }
 0x4a0   :  { %1851 = vmatprep.subr.bf16.mxu0 %v6336_v10  ;;  %1892 = vmatprep.subr.bf16.mxu1 %v6337_v21 }
 0x4a3   :  { %1852 = vmatpush1.bf16.msra.mxu0 %v6338_v1  ;;  %1893 = vmatpush1.bf16.msra.mxu1 %v6339_v60 }
 0x4a4   :  { %1853 = vmatprep.subr.bf16.mxu0 %v6340_v17  ;;  %1894 = vmatprep.subr.bf16.mxu1 %v6248_v43 }
 0x4a7   :  { %1854 = vmatpush2.bf16.msra.mxu0 %v6249_v33  ;;  %1895 = vmatpush2.bf16.msra.mxu1 %v6250_v34 }
 0x4a8   :  { %1855 = vmatprep.subr.bf16.mxu0 %v6251_v28  ;;  %1896 = vmatprep.subr.bf16.mxu1 %v6252_v62 }
 0x4ab   :  { %1856 = vmatpush2.bf16.msra.mxu0 %v6253_v46  ;;  %1897 = vmatpush2.bf16.msra.mxu1 %v6254_v35 }
 0x4ac   :  { %1857 = vmatprep.subr.bf16.mxu0 %v6255_v51  ;;  %1898 = vmatprep.subr.bf16.mxu1 %v6256_v61  ;;  %v6420_v61 = vld [vmem:[#allocation146_spill] sm:$0xff] }
 0x4af   :  { %1858 = vmatpush2.bf16.msra.mxu0 %v6257_v54  ;;  %1899 = vmatpush2.bf16.msra.mxu1 %v6258_v29  ;;  %v6343_v29 = vld [vmem:[#allocation127_spill] sm:$0xff] }
 0x4b0   :  { %1859 = vmatprep.subr.bf16.mxu0 %v6166_v41  ;;  %1900 = vmatprep.subr.bf16.mxu1 %v6167_v6  ;;  %v6344_v41 = vld [vmem:[#allocation128_spill] sm:$0xff]  ;;  %v6345_v6 = vld [vmem:[#allocation129_spill] sm:$0xff] }
 0x4b3   :  { %1860 = vmatpush2.bf16.msra.mxu0 %v6168_v30  ;;  %1901 = vmatpush2.bf16.msra.mxu1 %v6169_v5  ;;  %v6346_v30 = vld [vmem:[#allocation130_spill] sm:$0xff]  ;;  %v6347_v5 = vld [vmem:[#allocation131_spill] sm:$0xff] }
 0x4b4   :  { %1861 = vmatprep.subr.bf16.mxu0 %v6170_v50  ;;  %1902 = vmatprep.subr.bf16.mxu1 %v6171_v18  ;;  %v6348_v50 = vld [vmem:[#allocation132_spill] sm:$0xff]  ;;  %v6349_v18 = vld [vmem:[#allocation133_spill] sm:$0xff] }
 0x4b7   :  { %1862 = vmatpush2.bf16.msra.mxu0 %v6172_v4  ;;  %1903 = vmatpush2.bf16.msra.mxu1 %v6173_v8  ;;  %v6350_v4 = vld [vmem:[#allocation134_spill] sm:$0xff]  ;;  %v6351_v8 = vld [vmem:[#allocation135_spill] sm:$0xff] }
 0x4b8   :  { %1863 = vmatprep.subr.bf16.mxu0 %v6341_v25  ;;  %1904 = vmatprep.subr.bf16.mxu1 %v6342_v11  ;;  %v6352_v25 = vld [vmem:[#allocation136_spill] sm:$0xff]  ;;  %v6353_v11 = vld [vmem:[#allocation3_spill] sm:$0xff] }
 0x4bb   :  { %1864 = vmatpush2.bf16.msra.mxu0 %v6343_v29  ;;  %1905 = vmatpush2.bf16.msra.mxu1 %v6344_v41  ;;  %v6354_v29 = vld [vmem:[#allocation5_spill] sm:$0xff] }
 0x4bc   :  { %1865 = vmatprep.subr.bf16.mxu0 %v6345_v6  ;;  %1906 = vmatprep.subr.bf16.mxu1 %v6346_v30  ;;  %v6355_v30 = vld [vmem:[#allocation4_spill] sm:$0xff]  ;;  %v6364_v6 = vld [vmem:[#allocation14_spill] sm:$0xff]  ;;  %v6419_v41 = vld [vmem:[#allocation73_spill] sm:$0xff] }
 0x4bf   :  { %1866 = vmatpush2.bf16.msra.mxu0 %v6347_v5  ;;  %1907 = vmatpush2.bf16.msra.mxu1 %v6348_v50  ;;  %v6356_v5 = vld [vmem:[#allocation6_spill] sm:$0xff]  ;;  %v6357_v50 = vld [vmem:[#allocation7_spill] sm:$0xff] }
 0x4c0   :  { %1867 = vmatprep.subr.bf16.mxu0 %v6349_v18  ;;  %1908 = vmatprep.subr.bf16.mxu1 %v6350_v4  ;;  %v6358_v18 = vld [vmem:[#allocation8_spill] sm:$0xff]  ;;  %v6359_v4 = vld [vmem:[#allocation9_spill] sm:$0xff] }
 0x4c3   :  { %1868 = vmatpush2.bf16.msra.mxu0 %v6351_v8  ;;  %1909 = vmatpush2.bf16.msra.mxu1 %v6352_v25  ;;  %v6360_v8 = vld [vmem:[#allocation10_spill] sm:$0xff]  ;;  %v6361_v25 = vld [vmem:[#allocation11_spill] sm:$0xff] }
 0x4c4   :  { %1972 = vmatprep.subr.bf16.mxu0 %v6353_v11  ;;  %2013 = vmatprep.subr.bf16.mxu1 %v6354_v29  ;;  %v6362_v11 = vld [vmem:[#allocation12_spill] sm:$0xff]  ;;  %v6363_v29 = vld [vmem:[#allocation13_spill] sm:$0xff] }
 0x4c6   :  { %1870 = vmatmul.mubr.bf16.vlgmr.msra.gmra.mxu0 %v4867_v40  ;;  %1911 = vmatmul.mubr.bf16.vlgmr.msra.gmra.mxu1 %v4867_v40  ;;  %v6365_v40 = vld [vmem:[#allocation15_spill] sm:$0xff] }
 0x4c7   :  { %1973 = vmatpush1.bf16.msra.mxu0 %v6355_v30  ;;  %2014 = vmatpush1.bf16.msra.mxu1 %v6356_v5  ;;  %v6366_v30 = vld [vmem:[#allocation16_spill] sm:$0xff]  ;;  %v6367_v5 = vld [vmem:[#allocation17_spill] sm:$0xff] }
 0x4c8   :  { %1974 = vmatprep.subr.bf16.mxu0 %v6357_v50  ;;  %2015 = vmatprep.subr.bf16.mxu1 %v6358_v18  ;;  %v6368_v50 = vld [vmem:[#allocation18_spill] sm:$0xff]  ;;  %v6369_v18 = vld [vmem:[#allocation19_spill] sm:$0xff] }
 0x4cb   :  { %1975 = vmatpush1.bf16.msra.mxu0 %v6359_v4  ;;  %2016 = vmatpush1.bf16.msra.mxu1 %v6360_v8  ;;  %v6370_v4 = vld [vmem:[#allocation20_spill] sm:$0xff]  ;;  %v6371_v8 = vld [vmem:[#allocation21_spill] sm:$0xff] }
 0x4cc   :  { %1976 = vmatprep.subr.bf16.mxu0 %v6361_v25  ;;  %2017 = vmatprep.subr.bf16.mxu1 %v6362_v11  ;;  %v6372_v25 = vld [vmem:[#allocation22_spill] sm:$0xff]  ;;  %v6373_v11 = vld [vmem:[#allocation23_spill] sm:$0xff] }
 0x4cf   :  { %1977 = vmatpush1.bf16.msra.mxu0 %v6363_v29  ;;  %2018 = vmatpush1.bf16.msra.mxu1 %v6364_v6  ;;  %v6374_v29 = vld [vmem:[#allocation24_spill] sm:$0xff]  ;;  %v6375_v6 = vld [vmem:[#allocation25_spill] sm:$0xff] }
 0x4d0   :  { %1978 = vmatprep.subr.bf16.mxu0 %v6365_v40  ;;  %2019 = vmatprep.subr.bf16.mxu1 %v6366_v30  ;;  %v6376_v40 = vld [vmem:[#allocation26_spill] sm:$0xff]  ;;  %v6377_v30 = vld [vmem:[#allocation27_spill] sm:$0xff] }
 0x4d3   :  { %1979 = vmatpush1.bf16.msra.mxu0 %v6367_v5  ;;  %2020 = vmatpush1.bf16.msra.mxu1 %v6368_v50  ;;  %v6378_v5 = vld [vmem:[#allocation28_spill] sm:$0xff]  ;;  %v6379_v50 = vld [vmem:[#allocation29_spill] sm:$0xff] }
 0x4d4   :  { %1980 = vmatprep.subr.bf16.mxu0 %v6369_v18  ;;  %2021 = vmatprep.subr.bf16.mxu1 %v6370_v4  ;;  %v6380_v18 = vld [vmem:[#allocation30_spill] sm:$0xff]  ;;  %v6381_v4 = vld [vmem:[#allocation31_spill] sm:$0xff] }
 0x4d7   :  { %1981 = vmatpush1.bf16.msra.mxu0 %v6371_v8  ;;  %2022 = vmatpush1.bf16.msra.mxu1 %v6372_v25  ;;  %v6382_v8 = vld [vmem:[#allocation32_spill] sm:$0xff]  ;;  %v6383_v25 = vld [vmem:[#allocation33_spill] sm:$0xff] }
 0x4d8   :  { %1982 = vmatprep.subr.bf16.mxu0 %v6373_v11  ;;  %2023 = vmatprep.subr.bf16.mxu1 %v6374_v29  ;;  %v6384_v11 = vld [vmem:[#allocation34_spill] sm:$0xff]  ;;  %v6385_v29 = vld [vmem:[#allocation35_spill] sm:$0xff] }
 0x4db   :  { %1983 = vmatpush1.bf16.msra.mxu0 %v6375_v6  ;;  %2024 = vmatpush1.bf16.msra.mxu1 %v6376_v40  ;;  %v6386_v6 = vld [vmem:[#allocation36_spill] sm:$0xff]  ;;  %v6387_v40 = vld [vmem:[#allocation37_spill] sm:$0xff] }
 0x4dc   :  { %1984 = vmatprep.subr.bf16.mxu0 %v6377_v30  ;;  %2025 = vmatprep.subr.bf16.mxu1 %v6378_v5  ;;  %v6388_v30 = vld [vmem:[#allocation38_spill] sm:$0xff]  ;;  %v6389_v5 = vld [vmem:[#allocation39_spill] sm:$0xff] }
 0x4df   :  { %1985 = vmatpush1.bf16.msra.mxu0 %v6379_v50  ;;  %2026 = vmatpush1.bf16.msra.mxu1 %v6380_v18  ;;  %v6390_v50 = vld [vmem:[#allocation40_spill] sm:$0xff]  ;;  %v6391_v18 = vld [vmem:[#allocation41_spill] sm:$0xff] }
 0x4e0   :  { %1986 = vmatprep.subr.bf16.mxu0 %v6381_v4  ;;  %2027 = vmatprep.subr.bf16.mxu1 %v6382_v8  ;;  %v6392_v4 = vld [vmem:[#allocation42_spill] sm:$0xff]  ;;  %v6393_v8 = vld [vmem:[#allocation43_spill] sm:$0xff] }
 0x4e3   :  { %1987 = vmatpush1.bf16.msra.mxu0 %v6383_v25  ;;  %2028 = vmatpush1.bf16.msra.mxu1 %v6384_v11  ;;  %v6394_v25 = vld [vmem:[#allocation44_spill] sm:$0xff]  ;;  %v6395_v11 = vld [vmem:[#allocation45_spill] sm:$0xff] }
 0x4e4   :  { %1988 = vmatprep.subr.bf16.mxu0 %v6385_v29  ;;  %2029 = vmatprep.subr.bf16.mxu1 %v6386_v6  ;;  %v6396_v29 = vld [vmem:[#allocation46_spill] sm:$0xff]  ;;  %v6397_v6 = vld [vmem:[#allocation47_spill] sm:$0xff] }
 0x4e7   :  { %1989 = vmatpush2.bf16.msra.mxu0 %v6387_v40  ;;  %2030 = vmatpush2.bf16.msra.mxu1 %v6388_v30  ;;  %v6398_v40 = vld [vmem:[#allocation48_spill] sm:$0xff]  ;;  %v6399_v30 = vld [vmem:[#allocation49_spill] sm:$0xff] }
 0x4e8   :  { %1990 = vmatprep.subr.bf16.mxu0 %v6389_v5  ;;  %2031 = vmatprep.subr.bf16.mxu1 %v6390_v50  ;;  %v6400_v5 = vld [vmem:[#allocation50_spill] sm:$0xff]  ;;  %v6401_v50 = vld [vmem:[#allocation51_spill] sm:$0xff] }
 0x4eb   :  { %1991 = vmatpush2.bf16.msra.mxu0 %v6391_v18  ;;  %2032 = vmatpush2.bf16.msra.mxu1 %v6392_v4  ;;  %v6402_v18 = vld [vmem:[#allocation52_spill] sm:$0xff]  ;;  %v6403_v4 = vld [vmem:[#allocation53_spill] sm:$0xff] }
 0x4ec   :  { %1992 = vmatprep.subr.bf16.mxu0 %v6393_v8  ;;  %2033 = vmatprep.subr.bf16.mxu1 %v6394_v25  ;;  %v6404_v8 = vld [vmem:[#allocation54_spill] sm:$0xff]  ;;  %v6405_v25 = vld [vmem:[#allocation55_spill] sm:$0xff] }
 0x4ef   :  { %1993 = vmatpush2.bf16.msra.mxu0 %v6395_v11  ;;  %2034 = vmatpush2.bf16.msra.mxu1 %v6396_v29  ;;  %v6406_v11 = vld [vmem:[#allocation56_spill] sm:$0xff]  ;;  %v6407_v29 = vld [vmem:[#allocation57_spill] sm:$0xff] }
 0x4f0   :  { %1994 = vmatprep.subr.bf16.mxu0 %v6397_v6  ;;  %2035 = vmatprep.subr.bf16.mxu1 %v6398_v40  ;;  %v6408_v6 = vld [vmem:[#allocation58_spill] sm:$0xff]  ;;  %v6409_v40 = vld [vmem:[#allocation59_spill] sm:$0xff] }
 0x4f3   :  { %1995 = vmatpush2.bf16.msra.mxu0 %v6399_v30  ;;  %2036 = vmatpush2.bf16.msra.mxu1 %v6400_v5  ;;  %v6410_v30 = vld [vmem:[#allocation60_spill] sm:$0xff]  ;;  %v6411_v5 = vld [vmem:[#allocation61_spill] sm:$0xff] }
 0x4f4   :  { %1996 = vmatprep.subr.bf16.mxu0 %v6401_v50  ;;  %2037 = vmatprep.subr.bf16.mxu1 %v6402_v18  ;;  %v6412_v50 = vld [vmem:[#allocation62_spill] sm:$0xff]  ;;  %v6413_v18 = vld [vmem:[#allocation63_spill] sm:$0xff] }
 0x4f7   :  { %1997 = vmatpush2.bf16.msra.mxu0 %v6403_v4  ;;  %2038 = vmatpush2.bf16.msra.mxu1 %v6404_v8  ;;  %v6414_v4 = vld [vmem:[#allocation64_spill] sm:$0xff]  ;;  %v6415_v8 = vld [vmem:[#allocation65_spill] sm:$0xff] }
 0x4f8   :  { %1998 = vmatprep.subr.bf16.mxu0 %v6405_v25  ;;  %2039 = vmatprep.subr.bf16.mxu1 %v6406_v11  ;;  %v6416_v25 = vld [vmem:[#allocation66_spill] sm:$0xff]  ;;  %v6417_v11 = vld [vmem:[#allocation67_spill] sm:$0xff] }
 0x4fb   :  { %1999 = vmatpush2.bf16.msra.mxu0 %v6407_v29  ;;  %2040 = vmatpush2.bf16.msra.mxu1 %v6408_v6  ;;  %v6418_v29 = vld [vmem:[#allocation68_spill] sm:$0xff] }
 0x4fc   :  { %2000 = vmatprep.subr.bf16.mxu0 %v6409_v40  ;;  %2041 = vmatprep.subr.bf16.mxu1 %v6410_v30 }
 0x4ff   :  { %2001 = vmatpush2.bf16.msra.mxu0 %v6411_v5  ;;  %2042 = vmatpush2.bf16.msra.mxu1 %v6412_v50 }
 0x500   :  { %2002 = vmatprep.subr.bf16.mxu0 %v6413_v18  ;;  %2043 = vmatprep.subr.bf16.mxu1 %v6414_v4 }
 0x503   :  { %2003 = vmatpush2.bf16.msra.mxu0 %v6415_v8  ;;  %2044 = vmatpush2.bf16.msra.mxu1 %v6416_v25  ;;  %v6421_v25 = vld [vmem:[#allocation147_spill] sm:$0xff] }
 0x504   :  { %2054 = vmatprep.subr.bf16.mxu0 %v6417_v11  ;;  %2095 = vmatprep.subr.bf16.mxu1 %v6418_v29 }
 0x546   :  { %v1789_v6 = vpop.f32.mrf.mxu0  ;;  %v1830_v40 = vpop.f32.mrf.mxu1 }
 0x547   :  { %v1790_v30 = vadd.f32 %v1789_v6, %v6419_v41 }
 0x548   :  { %v1791_v54 = vpop.f32.mrf.mxu0  ;;  %v1832_v5 = vpop.f32.mrf.mxu1 }
 0x549   :  { %v1923_v50 = vadd.f32 %v1790_v30, %v6420_v61  ;;  %v1833_v18 = vadd.f32 %v1832_v5, %v4013_v38  ;;  %v1792_v41 = vadd.f32 %v1791_v54, %v6116_v63  ;;  %v6422_v30 = vmov 0  }
 0x54a   :  { %v1793_v51 = vpop.f32.mrf.mxu0  ;;  %v1834_v4 = vpop.f32.mrf.mxu1  ;;  %v2181_v5 = vsel %vm2180_vm10, 1, %v6422_v30 }
 0x54b   :  { %v1927_v35 = vmul.f32 0.5, %v1923_v50  ;;  %v1926_v11 = vadd.f32 %v1833_v18, %v6421_v25  ;;  %v6423_v51 = vld [vmem:[#allocation148_spill] sm:$0xff]  ;;  %2183 = vperm.xlu0 %3262, %v2181_v5   ;;  %v1831_v5 = vadd.f32 %v1830_v40, %v4019_v3 }
 0x54c   :  { %v1794_v8 = vpop.f32.mrf.mxu0  ;;  %v1835_v46 = vpop.f32.mrf.mxu1  ;;  %v1924_v4 = vadd.f32 %v1792_v41, %v6423_v51 }
 0x54d   :  { %3380 = vtanh.f32 %v1927_v35 }
 0x54e   :  { %3382 = vtanh.f32 %v1926_v11  ;;  %v1928_v50 = vmul.f32 0.5, %v1924_v4  ;;  %v6424_v4 = vld [vmem:[#allocation145_spill] sm:$0xff] }
 0x550   :  { %3384 = vtanh.f32 %v1928_v50  ;;  %v1925_v50 = vadd.f32 %v1831_v5, %v6424_v4 }
 0x55a   :  { %v3381_v29 = vpop.eup %3380 }
 0x55b   :  { %v1933_v62 = vmul.f32 0.5, %v3381_v29  ;;  %v3383_v34 = vpop.eup %3382 }
 0x55d   :  { %v1936_v28 = vadd.f32 0.5, %v1933_v62  ;;  %v3385_v30 = vpop.eup %3384 }
 0x55e   :  { %v1934_v51 = vmul.f32 0.5, %v3385_v30 }
 0x55f   :  { %v1941_v6 = vmul.f32 %v3383_v34, %v1936_v28 }
 0x586   :  { %v1871_v8 = vpop.f32.mrf.mxu0  ;;  %v1912_v46 = vpop.f32.mrf.mxu1 }
 0x587   :  { %v1872_v18 = vadd.f32 %v1871_v8, %v6221_v47  ;;  %v1913_v8 = vadd.f32 %v1912_v46, %v4534_v48 }
 0x588   :  { %v1873_v35 = vpop.f32.mrf.mxu0  ;;  %v1914_v61 = vpop.f32.mrf.mxu1 }
 0x589   :  { %v1945_v29 = vmul.f32 0.5, %v1872_v18  ;;  %v1874_v34 = vadd.f32 %v1873_v35, %v4522_v7  ;;  %v1915_v41 = vadd.f32 %v1914_v61, %v4528_v56  ;;  %v1937_v18 = vadd.f32 0.5, %v1934_v51 }
 0x58a   :  { %v1875_v28 = vpop.f32.mrf.mxu0  ;;  %v1916_v54 = vpop.f32.mrf.mxu1  ;;  %v1929_v35 = vmul.f32 0.5, %v1925_v50 }
 0x58b   :  { %3386 = vtanh.f32 %v1945_v29  ;;  %v1946_v62 = vmul.f32 0.5, %v1874_v34  ;;  %v1947_v28 = vmul.f32 0.5, %v1913_v8  ;;  %v1940_v29 = vmul.f32 %v1937_v18, %v4857_v58  ;;  %v1967_v18 = vpop.permute.xlu1 %1966 }
 0x58c   :  { %v1876_v25 = vpop.f32.mrf.mxu0  ;;  %v1917_v11 = vpop.f32.mrf.mxu1  ;;  %vm1968_vm11 = vcmp.eq.s32.totalorder %v1967_v18, 1  ;;  %v6437_v18 = vld [vmem:[#allocation120_spill] sm:$0xff] }
 0x58d   :  { %3388 = vtanh.f32 %v1946_v62  ;;  %v5016_v11 = vadd.f32 %v1941_v6, %v1940_v29 }
 0x58e   :  { %3390 = vtanh.f32 %v1915_v41 }
 0x58f   :  { %3392 = vtanh.f32 %v1929_v35 }
 0x590   :  { %3394 = vtanh.f32 %v1947_v28 }
 0x591   :  { %3396 = vtanh.f32 %v5016_v11 }
 0x598   :  { %v3387_v54 = vpop.eup %3386 }
 0x599   :  { %v1951_v34 = vmul.f32 0.5, %v3387_v54 }
 0x59a   :  { %v3389_v25 = vpop.eup %3388 }
 0x59b   :  { %v1954_v62 = vadd.f32 0.5, %v1951_v34  ;;  %v1952_v61 = vmul.f32 0.5, %v3389_v25  ;;  %v3391_v30 = vpop.eup %3390 }
 0x59c   :  { %v3393_v58 = vpop.eup %3392 }
 0x59d   :  { %v1955_v40 = vadd.f32 0.5, %v1952_v61  ;;  %v1959_v5 = vmul.f32 %v3391_v30, %v1954_v62  ;;  %v3395_v51 = vpop.eup %3394  ;;  %v1935_v4 = vmul.f32 0.5, %v3393_v58  ;;  %v6426_v62 = vld [vmem:[#allocation109_spill] sm:$0xff]  ;;  %v6427_v61 = vld [vmem:[#allocation110_spill] sm:$0xff]  ;;  %v6429_v30 = vld [vmem:[#allocation112_spill] sm:$0xff] }
 0x59e   :  { %v1953_v50 = vmul.f32 0.5, %v3395_v51  ;;  %v3397_v8 = vpop.eup %3396  ;;  %v6432_v58 = vld [vmem:[#allocation115_spill] sm:$0xff]  ;;  %v6433_v51 = vld [vmem:[#allocation116_spill] sm:$0xff] }
 0x59f   :  { %v1958_v41 = vmul.f32 %v1955_v40, %v4861_v23  ;;  %v1938_v35 = vadd.f32 0.5, %v1935_v4  ;;  %v6428_v40 = vld [vmem:[#allocation111_spill] sm:$0xff]  ;;  %v6434_v4 = vld [vmem:[#allocation117_spill] sm:$0xff] }
 0x5a0   :  { %v1956_v6 = vadd.f32 0.5, %v1953_v50  ;;  %v6435_v50 = vld [vmem:[#allocation118_spill] sm:$0xff] }
 0x5a1   :  { %v5020_v46 = vadd.f32 %v1959_v5, %v1958_v41  ;;  %v1944_v54 = vmul.f32 %v3397_v8, %v1938_v35  ;;  %v6430_v41 = vld [vmem:[#allocation113_spill] sm:$0xff]  ;;  %v6431_v5 = vld [vmem:[#allocation114_spill] sm:$0xff]  ;;  %v6436_v8 = vld [vmem:[#allocation119_spill] sm:$0xff] }
 0x5a2   :  { %v6438_v35 = vld [vmem:[#allocation121_spill] sm:$0xff] }
 0x5a3   :  { %3398 = vtanh.f32 %v5020_v46  ;;  %v5026_v25 = vpack.c.bf16 %v1944_v54, %v1944_v54  ;;  %v6441_v54 = vld [vmem:[#allocation124_spill] sm:$0xff] }
 0x5b0   :  { %v3399_v28 = vpop.eup %3398 }
 0x5b1   :  { %v1962_v29 = vmul.f32 %v3399_v28, %v1956_v6  ;;  %v6439_v6 = vld [vmem:[#allocation122_spill] sm:$0xff]  ;;  %v6440_v28 = vld [vmem:[#allocation123_spill] sm:$0xff] }
 0x5b3   :  { %v5024_v23 = vsel %vm1968_vm11, %v1962_v29, %v4865_v36  ;;  %v1971_v34 = vpack.c.bf16 %v1962_v29, %v1962_v29  ;;  %v6425_v36 = vld [vmem:[#allocation108_spill] sm:$0xff]  ;;  %v6442_v29 = vld [vmem:[#allocation125_spill] sm:$0xff] }
 0x5b5   :  { %2004 = vmatprep.mubr.bf16.mxu0 %v1971_v34  ;;  %2045 = vmatprep.mubr.bf16.mxu1 %v1971_v34 }
 0x5b6   :  { %2005 = vmatmul.mubr.bf16.vlgmr.msra.gmra.mxu0 %v5026_v25  ;;  %2046 = vmatmul.mubr.bf16.vlgmr.msra.gmra.mxu1 %v5026_v25 }
 0x5b7   :  { %2055 = vmatpush1.bf16.msra.mxu0 %v6124_v14  ;;  %2096 = vmatpush1.bf16.msra.mxu1 %v6125_v9 }
 0x5b8   :  { %2086 = vmatprep.mubr.bf16.mxu0 %v1971_v34  ;;  %2127 = vmatprep.mubr.bf16.mxu1 %v1971_v34  ;;  %v6443_v34 = vld [vmem:[#allocation126_spill] sm:$0xff] }
 0x5b9   :  { %2056 = vmatprep.subr.bf16.mxu0 %v6126_v12  ;;  %2097 = vmatprep.subr.bf16.mxu1 %v6127_v52 }
 0x5bb   :  { %2057 = vmatpush1.bf16.msra.mxu0 %v6128_v57  ;;  %2098 = vmatpush1.bf16.msra.mxu1 %v6129_v19 }
 0x5bc   :  { %2058 = vmatprep.subr.bf16.mxu0 %v6223_v31  ;;  %2099 = vmatprep.subr.bf16.mxu1 %v6224_v55 }
 0x5bf   :  { %2059 = vmatpush1.bf16.msra.mxu0 %v6225_v22  ;;  %2100 = vmatpush1.bf16.msra.mxu1 %v6226_v44 }
 0x5c0   :  { %2060 = vmatprep.subr.bf16.mxu0 %v6227_v59  ;;  %2101 = vmatprep.subr.bf16.mxu1 %v6228_v2 }
 0x5c3   :  { %2061 = vmatpush1.bf16.msra.mxu0 %v6229_v37  ;;  %2102 = vmatpush1.bf16.msra.mxu1 %v6230_v45 }
 0x5c4   :  { %2062 = vmatprep.subr.bf16.mxu0 %v6324_v42  ;;  %2103 = vmatprep.subr.bf16.mxu1 %v6325_v24 }
 0x5c7   :  { %2063 = vmatpush1.bf16.msra.mxu0 %v6326_v15  ;;  %2104 = vmatpush1.bf16.msra.mxu1 %v6327_v53 }
 0x5c8   :  { %2064 = vmatprep.subr.bf16.mxu0 %v6328_v13  ;;  %2105 = vmatprep.subr.bf16.mxu1 %v6329_v49 }
 0x5cb   :  { %2065 = vmatpush1.bf16.msra.mxu0 %v6330_v16  ;;  %2106 = vmatpush1.bf16.msra.mxu1 %v6331_v39 }
 0x5cc   :  { %2066 = vmatprep.subr.bf16.mxu0 %v6332_v32  ;;  %2107 = vmatprep.subr.bf16.mxu1 %v6333_v26 }
 0x5cf   :  { %2067 = vmatpush1.bf16.msra.mxu0 %v6334_v20  ;;  %2108 = vmatpush1.bf16.msra.mxu1 %v6335_v27 }
 0x5d0   :  { %2068 = vmatprep.subr.bf16.mxu0 %v6336_v10  ;;  %2109 = vmatprep.subr.bf16.mxu1 %v6337_v21 }
 0x5d3   :  { %2069 = vmatpush1.bf16.msra.mxu0 %v6338_v1  ;;  %2110 = vmatpush1.bf16.msra.mxu1 %v6339_v60 }
 0x5d4   :  { %2070 = vmatprep.subr.bf16.mxu0 %v6340_v17  ;;  %2111 = vmatprep.subr.bf16.mxu1 %v6248_v43 }
 0x5d7   :  { %2071 = vmatpush2.bf16.msra.mxu0 %v6249_v33  ;;  %2112 = vmatpush2.bf16.msra.mxu1 %v6425_v36 }
 0x5d8   :  { %2072 = vmatprep.subr.bf16.mxu0 %v6426_v62  ;;  %2113 = vmatprep.subr.bf16.mxu1 %v6427_v61 }
 0x5db   :  { %2073 = vmatpush2.bf16.msra.mxu0 %v6428_v40  ;;  %2114 = vmatpush2.bf16.msra.mxu1 %v6429_v30 }
 0x5dc   :  { %2074 = vmatprep.subr.bf16.mxu0 %v6430_v41  ;;  %2115 = vmatprep.subr.bf16.mxu1 %v6431_v5  ;;  %v6521_v5 = vld [vmem:[#allocation150_spill] sm:$0xff] }
 0x5df   :  { %2075 = vmatpush2.bf16.msra.mxu0 %v6432_v58  ;;  %2116 = vmatpush2.bf16.msra.mxu1 %v6433_v51  ;;  %v6444_v51 = vld [vmem:[#allocation127_spill] sm:$0xff] }
 0x5e0   :  { %2076 = vmatprep.subr.bf16.mxu0 %v6434_v4  ;;  %2117 = vmatprep.subr.bf16.mxu1 %v6435_v50  ;;  %v6445_v4 = vld [vmem:[#allocation128_spill] sm:$0xff]  ;;  %v6446_v50 = vld [vmem:[#allocation129_spill] sm:$0xff] }
 0x5e3   :  { %2077 = vmatpush2.bf16.msra.mxu0 %v6436_v8  ;;  %2118 = vmatpush2.bf16.msra.mxu1 %v6437_v18  ;;  %v6447_v8 = vld [vmem:[#allocation130_spill] sm:$0xff]  ;;  %v6448_v18 = vld [vmem:[#allocation131_spill] sm:$0xff] }
 0x5e4   :  { %2078 = vmatprep.subr.bf16.mxu0 %v6438_v35  ;;  %2119 = vmatprep.subr.bf16.mxu1 %v6439_v6  ;;  %v6449_v35 = vld [vmem:[#allocation132_spill] sm:$0xff]  ;;  %v6450_v6 = vld [vmem:[#allocation133_spill] sm:$0xff] }
 0x5e7   :  { %2079 = vmatpush2.bf16.msra.mxu0 %v6440_v28  ;;  %2120 = vmatpush2.bf16.msra.mxu1 %v6441_v54  ;;  %v6451_v28 = vld [vmem:[#allocation134_spill] sm:$0xff]  ;;  %v6452_v54 = vld [vmem:[#allocation135_spill] sm:$0xff] }
 0x5e8   :  { %2080 = vmatprep.subr.bf16.mxu0 %v6442_v29  ;;  %2121 = vmatprep.subr.bf16.mxu1 %v6443_v34  ;;  %v6453_v29 = vld [vmem:[#allocation136_spill] sm:$0xff]  ;;  %v6454_v34 = vld [vmem:[#allocation3_spill] sm:$0xff] }
 0x5eb   :  { %2081 = vmatpush2.bf16.msra.mxu0 %v6444_v51  ;;  %2122 = vmatpush2.bf16.msra.mxu1 %v6445_v4  ;;  %v6455_v51 = vld [vmem:[#allocation5_spill] sm:$0xff] }
 0x5ec   :  { %2082 = vmatprep.subr.bf16.mxu0 %v6446_v50  ;;  %2123 = vmatprep.subr.bf16.mxu1 %v6447_v8  ;;  %v6456_v8 = vld [vmem:[#allocation4_spill] sm:$0xff]  ;;  %v6465_v50 = vld [vmem:[#allocation14_spill] sm:$0xff]  ;;  %v6520_v4 = vld [vmem:[#allocation73_spill] sm:$0xff] }
 0x5ef   :  { %2083 = vmatpush2.bf16.msra.mxu0 %v6448_v18  ;;  %2124 = vmatpush2.bf16.msra.mxu1 %v6449_v35  ;;  %v6457_v18 = vld [vmem:[#allocation6_spill] sm:$0xff]  ;;  %v6458_v35 = vld [vmem:[#allocation7_spill] sm:$0xff] }
 0x5f0   :  { %2084 = vmatprep.subr.bf16.mxu0 %v6450_v6  ;;  %2125 = vmatprep.subr.bf16.mxu1 %v6451_v28  ;;  %v6459_v6 = vld [vmem:[#allocation8_spill] sm:$0xff]  ;;  %v6460_v28 = vld [vmem:[#allocation9_spill] sm:$0xff] }
 0x5f3   :  { %2085 = vmatpush2.bf16.msra.mxu0 %v6452_v54  ;;  %2126 = vmatpush2.bf16.msra.mxu1 %v6453_v29  ;;  %v6461_v54 = vld [vmem:[#allocation10_spill] sm:$0xff]  ;;  %v6462_v29 = vld [vmem:[#allocation11_spill] sm:$0xff] }
 0x5f4   :  { %2189 = vmatprep.subr.bf16.mxu0 %v6454_v34  ;;  %2230 = vmatprep.subr.bf16.mxu1 %v6455_v51  ;;  %v6463_v34 = vld [vmem:[#allocation12_spill] sm:$0xff]  ;;  %v6464_v51 = vld [vmem:[#allocation13_spill] sm:$0xff] }
 0x5f6   :  { %2087 = vmatmul.mubr.bf16.vlgmr.msra.gmra.mxu0 %v5026_v25  ;;  %2128 = vmatmul.mubr.bf16.vlgmr.msra.gmra.mxu1 %v5026_v25  ;;  %v6466_v25 = vld [vmem:[#allocation15_spill] sm:$0xff] }
 0x5f7   :  { %2190 = vmatpush1.bf16.msra.mxu0 %v6456_v8  ;;  %2231 = vmatpush1.bf16.msra.mxu1 %v6457_v18  ;;  %v6467_v8 = vld [vmem:[#allocation16_spill] sm:$0xff]  ;;  %v6468_v18 = vld [vmem:[#allocation17_spill] sm:$0xff] }
 0x5f8   :  { %2191 = vmatprep.subr.bf16.mxu0 %v6458_v35  ;;  %2232 = vmatprep.subr.bf16.mxu1 %v6459_v6  ;;  %v6469_v35 = vld [vmem:[#allocation18_spill] sm:$0xff]  ;;  %v6470_v6 = vld [vmem:[#allocation19_spill] sm:$0xff] }
 0x5fb   :  { %2192 = vmatpush1.bf16.msra.mxu0 %v6460_v28  ;;  %2233 = vmatpush1.bf16.msra.mxu1 %v6461_v54  ;;  %v6471_v28 = vld [vmem:[#allocation20_spill] sm:$0xff]  ;;  %v6472_v54 = vld [vmem:[#allocation21_spill] sm:$0xff] }
 0x5fc   :  { %2193 = vmatprep.subr.bf16.mxu0 %v6462_v29  ;;  %2234 = vmatprep.subr.bf16.mxu1 %v6463_v34  ;;  %v6473_v29 = vld [vmem:[#allocation22_spill] sm:$0xff]  ;;  %v6474_v34 = vld [vmem:[#allocation23_spill] sm:$0xff] }
 0x5ff   :  { %2194 = vmatpush1.bf16.msra.mxu0 %v6464_v51  ;;  %2235 = vmatpush1.bf16.msra.mxu1 %v6465_v50  ;;  %v6475_v51 = vld [vmem:[#allocation24_spill] sm:$0xff]  ;;  %v6476_v50 = vld [vmem:[#allocation25_spill] sm:$0xff] }
 0x600   :  { %2195 = vmatprep.subr.bf16.mxu0 %v6466_v25  ;;  %2236 = vmatprep.subr.bf16.mxu1 %v6467_v8  ;;  %v6477_v25 = vld [vmem:[#allocation26_spill] sm:$0xff]  ;;  %v6478_v8 = vld [vmem:[#allocation27_spill] sm:$0xff] }
 0x603   :  { %2196 = vmatpush1.bf16.msra.mxu0 %v6468_v18  ;;  %2237 = vmatpush1.bf16.msra.mxu1 %v6469_v35  ;;  %v6479_v18 = vld [vmem:[#allocation28_spill] sm:$0xff]  ;;  %v6480_v35 = vld [vmem:[#allocation29_spill] sm:$0xff] }
 0x604   :  { %2197 = vmatprep.subr.bf16.mxu0 %v6470_v6  ;;  %2238 = vmatprep.subr.bf16.mxu1 %v6471_v28  ;;  %v6481_v6 = vld [vmem:[#allocation30_spill] sm:$0xff]  ;;  %v6482_v28 = vld [vmem:[#allocation31_spill] sm:$0xff] }
 0x607   :  { %2198 = vmatpush1.bf16.msra.mxu0 %v6472_v54  ;;  %2239 = vmatpush1.bf16.msra.mxu1 %v6473_v29  ;;  %v6483_v54 = vld [vmem:[#allocation32_spill] sm:$0xff]  ;;  %v6484_v29 = vld [vmem:[#allocation33_spill] sm:$0xff] }
 0x608   :  { %2199 = vmatprep.subr.bf16.mxu0 %v6474_v34  ;;  %2240 = vmatprep.subr.bf16.mxu1 %v6475_v51  ;;  %v6485_v34 = vld [vmem:[#allocation34_spill] sm:$0xff]  ;;  %v6486_v51 = vld [vmem:[#allocation35_spill] sm:$0xff] }
 0x60b   :  { %2200 = vmatpush1.bf16.msra.mxu0 %v6476_v50  ;;  %2241 = vmatpush1.bf16.msra.mxu1 %v6477_v25  ;;  %v6487_v50 = vld [vmem:[#allocation36_spill] sm:$0xff]  ;;  %v6488_v25 = vld [vmem:[#allocation37_spill] sm:$0xff] }
 0x60c   :  { %2201 = vmatprep.subr.bf16.mxu0 %v6478_v8  ;;  %2242 = vmatprep.subr.bf16.mxu1 %v6479_v18  ;;  %v6489_v8 = vld [vmem:[#allocation38_spill] sm:$0xff]  ;;  %v6490_v18 = vld [vmem:[#allocation39_spill] sm:$0xff] }
 0x60f   :  { %2202 = vmatpush1.bf16.msra.mxu0 %v6480_v35  ;;  %2243 = vmatpush1.bf16.msra.mxu1 %v6481_v6  ;;  %v6491_v35 = vld [vmem:[#allocation40_spill] sm:$0xff]  ;;  %v6492_v6 = vld [vmem:[#allocation41_spill] sm:$0xff] }
 0x610   :  { %2203 = vmatprep.subr.bf16.mxu0 %v6482_v28  ;;  %2244 = vmatprep.subr.bf16.mxu1 %v6483_v54  ;;  %v6493_v28 = vld [vmem:[#allocation42_spill] sm:$0xff]  ;;  %v6494_v54 = vld [vmem:[#allocation43_spill] sm:$0xff] }
 0x613   :  { %2204 = vmatpush1.bf16.msra.mxu0 %v6484_v29  ;;  %2245 = vmatpush1.bf16.msra.mxu1 %v6485_v34  ;;  %v6495_v29 = vld [vmem:[#allocation44_spill] sm:$0xff]  ;;  %v6496_v34 = vld [vmem:[#allocation45_spill] sm:$0xff] }
 0x614   :  { %2205 = vmatprep.subr.bf16.mxu0 %v6486_v51  ;;  %2246 = vmatprep.subr.bf16.mxu1 %v6487_v50  ;;  %v6497_v51 = vld [vmem:[#allocation46_spill] sm:$0xff]  ;;  %v6498_v50 = vld [vmem:[#allocation47_spill] sm:$0xff] }
 0x617   :  { %2206 = vmatpush2.bf16.msra.mxu0 %v6488_v25  ;;  %2247 = vmatpush2.bf16.msra.mxu1 %v6489_v8  ;;  %v6499_v25 = vld [vmem:[#allocation48_spill] sm:$0xff]  ;;  %v6500_v8 = vld [vmem:[#allocation49_spill] sm:$0xff] }
 0x618   :  { %2207 = vmatprep.subr.bf16.mxu0 %v6490_v18  ;;  %2248 = vmatprep.subr.bf16.mxu1 %v6491_v35  ;;  %v6501_v18 = vld [vmem:[#allocation50_spill] sm:$0xff]  ;;  %v6502_v35 = vld [vmem:[#allocation51_spill] sm:$0xff] }
 0x61b   :  { %2208 = vmatpush2.bf16.msra.mxu0 %v6492_v6  ;;  %2249 = vmatpush2.bf16.msra.mxu1 %v6493_v28  ;;  %v6503_v6 = vld [vmem:[#allocation52_spill] sm:$0xff]  ;;  %v6504_v28 = vld [vmem:[#allocation53_spill] sm:$0xff] }
 0x61c   :  { %2209 = vmatprep.subr.bf16.mxu0 %v6494_v54  ;;  %2250 = vmatprep.subr.bf16.mxu1 %v6495_v29  ;;  %v6505_v54 = vld [vmem:[#allocation54_spill] sm:$0xff]  ;;  %v6506_v29 = vld [vmem:[#allocation55_spill] sm:$0xff] }
 0x61f   :  { %2210 = vmatpush2.bf16.msra.mxu0 %v6496_v34  ;;  %2251 = vmatpush2.bf16.msra.mxu1 %v6497_v51  ;;  %v6507_v34 = vld [vmem:[#allocation56_spill] sm:$0xff]  ;;  %v6508_v51 = vld [vmem:[#allocation57_spill] sm:$0xff] }
 0x620   :  { %2211 = vmatprep.subr.bf16.mxu0 %v6498_v50  ;;  %2252 = vmatprep.subr.bf16.mxu1 %v6499_v25  ;;  %v6509_v50 = vld [vmem:[#allocation58_spill] sm:$0xff]  ;;  %v6510_v25 = vld [vmem:[#allocation59_spill] sm:$0xff] }
 0x623   :  { %2212 = vmatpush2.bf16.msra.mxu0 %v6500_v8  ;;  %2253 = vmatpush2.bf16.msra.mxu1 %v6501_v18  ;;  %v6511_v8 = vld [vmem:[#allocation60_spill] sm:$0xff]  ;;  %v6512_v18 = vld [vmem:[#allocation61_spill] sm:$0xff] }
 0x624   :  { %2213 = vmatprep.subr.bf16.mxu0 %v6502_v35  ;;  %2254 = vmatprep.subr.bf16.mxu1 %v6503_v6  ;;  %v6513_v35 = vld [vmem:[#allocation62_spill] sm:$0xff]  ;;  %v6514_v6 = vld [vmem:[#allocation63_spill] sm:$0xff] }
 0x627   :  { %2214 = vmatpush2.bf16.msra.mxu0 %v6504_v28  ;;  %2255 = vmatpush2.bf16.msra.mxu1 %v6505_v54  ;;  %v6515_v28 = vld [vmem:[#allocation64_spill] sm:$0xff]  ;;  %v6516_v54 = vld [vmem:[#allocation65_spill] sm:$0xff] }
 0x628   :  { %2215 = vmatprep.subr.bf16.mxu0 %v6506_v29  ;;  %2256 = vmatprep.subr.bf16.mxu1 %v6507_v34  ;;  %v6517_v29 = vld [vmem:[#allocation66_spill] sm:$0xff]  ;;  %v6518_v34 = vld [vmem:[#allocation67_spill] sm:$0xff] }
 0x62b   :  { %2216 = vmatpush2.bf16.msra.mxu0 %v6508_v51  ;;  %2257 = vmatpush2.bf16.msra.mxu1 %v6509_v50  ;;  %v6519_v51 = vld [vmem:[#allocation68_spill] sm:$0xff] }
 0x62c   :  { %2217 = vmatprep.subr.bf16.mxu0 %v6510_v25  ;;  %2258 = vmatprep.subr.bf16.mxu1 %v6511_v8 }
 0x62f   :  { %2218 = vmatpush2.bf16.msra.mxu0 %v6512_v18  ;;  %2259 = vmatpush2.bf16.msra.mxu1 %v6513_v35 }
 0x630   :  { %2219 = vmatprep.subr.bf16.mxu0 %v6514_v6  ;;  %2260 = vmatprep.subr.bf16.mxu1 %v6515_v28 }
 0x633   :  { %2220 = vmatpush2.bf16.msra.mxu0 %v6516_v54  ;;  %2261 = vmatpush2.bf16.msra.mxu1 %v6517_v29  ;;  %v6522_v29 = vld [vmem:[#allocation151_spill] sm:$0xff] }
 0x634   :  { %2271 = vmatprep.subr.bf16.mxu0 %v6518_v34  ;;  %2312 = vmatprep.subr.bf16.mxu1 %v6519_v51 }
 0x676   :  { %v2006_v50 = vpop.f32.mrf.mxu0  ;;  %v2047_v25 = vpop.f32.mrf.mxu1 }
 0x677   :  { %v2007_v8 = vadd.f32 %v2006_v50, %v6520_v4 }
 0x678   :  { %v2008_v58 = vpop.f32.mrf.mxu0  ;;  %v2049_v18 = vpop.f32.mrf.mxu1 }
 0x679   :  { %v2140_v35 = vadd.f32 %v2007_v8, %v6521_v5  ;;  %v2050_v6 = vadd.f32 %v2049_v18, %v4013_v38  ;;  %v2009_v4 = vadd.f32 %v2008_v58, %v6116_v63  ;;  %v6523_v5 = vmov 0  }
 0x67a   :  { %v2010_v41 = vpop.f32.mrf.mxu0  ;;  %v2051_v28 = vpop.f32.mrf.mxu1  ;;  %v2398_v8 = vsel %vm2397_vm12, 1, %v6523_v5 }
 0x67b   :  { %v2144_v30 = vmul.f32 0.5, %v2140_v35  ;;  %v2143_v34 = vadd.f32 %v2050_v6, %v6522_v29  ;;  %v6524_v41 = vld [vmem:[#allocation152_spill] sm:$0xff]  ;;  %2400 = vperm.xlu1 %3263, %v2398_v8   ;;  %v2048_v8 = vadd.f32 %v2047_v25, %v4019_v3 }
 0x67c   :  { %v2011_v54 = vpop.f32.mrf.mxu0  ;;  %v2052_v40 = vpop.f32.mrf.mxu1  ;;  %v2141_v18 = vadd.f32 %v2009_v4, %v6524_v41 }
 0x67d   :  { %3400 = vtanh.f32 %v2144_v30 }
 0x67e   :  { %3402 = vtanh.f32 %v2143_v34  ;;  %v2145_v35 = vmul.f32 0.5, %v2141_v18  ;;  %v6525_v18 = vld [vmem:[#allocation149_spill] sm:$0xff] }
 0x680   :  { %3404 = vtanh.f32 %v2145_v35  ;;  %v2142_v35 = vadd.f32 %v2048_v8, %v6525_v18 }
 0x68a   :  { %v3401_v51 = vpop.eup %3400 }
 0x68b   :  { %v2150_v61 = vmul.f32 0.5, %v3401_v51  ;;  %v3403_v36 = vpop.eup %3402 }
 0x68d   :  { %v2153_v62 = vadd.f32 0.5, %v2150_v61  ;;  %v3405_v5 = vpop.eup %3404 }
 0x68e   :  { %v2151_v41 = vmul.f32 0.5, %v3405_v5 }
 0x68f   :  { %v2158_v50 = vmul.f32 %v3403_v36, %v2153_v62 }
 0x6b6   :  { %v2088_v40 = vpop.f32.mrf.mxu0  ;;  %v2129_v30 = vpop.f32.mrf.mxu1 }
 0x6b7   :  { %v2089_v6 = vadd.f32 %v2088_v40, %v6221_v47  ;;  %v2130_v40 = vadd.f32 %v2129_v30, %v4534_v48 }
 0x6b8   :  { %v2090_v28 = vpop.f32.mrf.mxu0  ;;  %v2131_v51 = vpop.f32.mrf.mxu1 }
 0x6b9   :  { %v2162_v61 = vmul.f32 0.5, %v2089_v6  ;;  %v2091_v36 = vadd.f32 %v2090_v28, %v4522_v7  ;;  %v2132_v4 = vadd.f32 %v2131_v51, %v4528_v56  ;;  %v2154_v6 = vadd.f32 0.5, %v2151_v41 }
 0x6ba   :  { %v2092_v62 = vpop.f32.mrf.mxu0  ;;  %v2133_v58 = vpop.f32.mrf.mxu1  ;;  %v2146_v28 = vmul.f32 0.5, %v2142_v35 }
 0x6bb   :  { %3406 = vtanh.f32 %v2162_v61  ;;  %v2163_v54 = vmul.f32 0.5, %v2091_v36  ;;  %v2164_v62 = vmul.f32 0.5, %v2130_v40  ;;  %v2157_v61 = vmul.f32 %v2154_v6, %v5016_v11  ;;  %v2184_v6 = vpop.permute.xlu0 %2183 }
 0x6bc   :  { %v2093_v29 = vpop.f32.mrf.mxu0  ;;  %v2134_v34 = vpop.f32.mrf.mxu1  ;;  %vm2185_vm13 = vcmp.eq.s32.totalorder %v2184_v6, 1  ;;  %v6538_v6 = vld [vmem:[#allocation120_spill] sm:$0xff] }
 0x6bd   :  { %3408 = vtanh.f32 %v2163_v54  ;;  %v5175_v34 = vadd.f32 %v2158_v50, %v2157_v61 }
 0x6be   :  { %3410 = vtanh.f32 %v2132_v4 }
 0x6bf   :  { %3412 = vtanh.f32 %v2146_v28 }
 0x6c0   :  { %3414 = vtanh.f32 %v2164_v62 }
 0x6c1   :  { %3416 = vtanh.f32 %v5175_v34 }
 0x6c8   :  { %v3407_v58 = vpop.eup %3406 }
 0x6c9   :  { %v2168_v36 = vmul.f32 0.5, %v3407_v58 }
 0x6ca   :  { %v3409_v29 = vpop.eup %3408 }
 0x6cb   :  { %v2171_v54 = vadd.f32 0.5, %v2168_v36  ;;  %v2169_v51 = vmul.f32 0.5, %v3409_v29  ;;  %v3411_v5 = vpop.eup %3410 }
 0x6cc   :  { %v3413_v11 = vpop.eup %3412 }
 0x6cd   :  { %v2172_v25 = vadd.f32 0.5, %v2169_v51  ;;  %v2176_v8 = vmul.f32 %v3411_v5, %v2171_v54  ;;  %v3415_v41 = vpop.eup %3414  ;;  %v2152_v18 = vmul.f32 0.5, %v3413_v11  ;;  %v6527_v54 = vld [vmem:[#allocation109_spill] sm:$0xff]  ;;  %v6528_v51 = vld [vmem:[#allocation110_spill] sm:$0xff]  ;;  %v6530_v5 = vld [vmem:[#allocation112_spill] sm:$0xff] }
 0x6ce   :  { %v2170_v35 = vmul.f32 0.5, %v3415_v41  ;;  %v3417_v40 = vpop.eup %3416  ;;  %v6533_v11 = vld [vmem:[#allocation115_spill] sm:$0xff]  ;;  %v6534_v41 = vld [vmem:[#allocation116_spill] sm:$0xff] }
 0x6cf   :  { %v2175_v4 = vmul.f32 %v2172_v25, %v5020_v46  ;;  %v2155_v28 = vadd.f32 0.5, %v2152_v18  ;;  %v6529_v25 = vld [vmem:[#allocation111_spill] sm:$0xff]  ;;  %v6535_v18 = vld [vmem:[#allocation117_spill] sm:$0xff] }
 0x6d0   :  { %v2173_v50 = vadd.f32 0.5, %v2170_v35  ;;  %v6536_v35 = vld [vmem:[#allocation118_spill] sm:$0xff] }
 0x6d1   :  { %v5179_v30 = vadd.f32 %v2176_v8, %v2175_v4  ;;  %v2161_v58 = vmul.f32 %v3417_v40, %v2155_v28  ;;  %v6531_v4 = vld [vmem:[#allocation113_spill] sm:$0xff]  ;;  %v6532_v8 = vld [vmem:[#allocation114_spill] sm:$0xff]  ;;  %v6537_v40 = vld [vmem:[#allocation119_spill] sm:$0xff] }
 0x6d2   :  { %v6539_v28 = vld [vmem:[#allocation121_spill] sm:$0xff] }
 0x6d3   :  { %3418 = vtanh.f32 %v5179_v30  ;;  %v5185_v29 = vpack.c.bf16 %v2161_v58, %v2161_v58  ;;  %v6542_v58 = vld [vmem:[#allocation124_spill] sm:$0xff] }
 0x6e0   :  { %v3419_v62 = vpop.eup %3418 }
 0x6e1   :  { %v2179_v61 = vmul.f32 %v3419_v62, %v2173_v50  ;;  %v6540_v50 = vld [vmem:[#allocation122_spill] sm:$0xff]  ;;  %v6541_v62 = vld [vmem:[#allocation123_spill] sm:$0xff] }
 0x6e3   :  { %v5183_v46 = vsel %vm2185_vm13, %v2179_v61, %v5024_v23  ;;  %v2188_v36 = vpack.c.bf16 %v2179_v61, %v2179_v61  ;;  %v6526_v23 = vld [vmem:[#allocation108_spill] sm:$0xff]  ;;  %v6543_v61 = vld [vmem:[#allocation125_spill] sm:$0xff] }
 0x6e5   :  { %2221 = vmatprep.mubr.bf16.mxu0 %v2188_v36  ;;  %2262 = vmatprep.mubr.bf16.mxu1 %v2188_v36 }
 0x6e6   :  { %2222 = vmatmul.mubr.bf16.vlgmr.msra.gmra.mxu0 %v5185_v29  ;;  %2263 = vmatmul.mubr.bf16.vlgmr.msra.gmra.mxu1 %v5185_v29 }
 0x6e7   :  { %2272 = vmatpush1.bf16.msra.mxu0 %v6124_v14  ;;  %2313 = vmatpush1.bf16.msra.mxu1 %v6125_v9 }
 0x6e8   :  { %2303 = vmatprep.mubr.bf16.mxu0 %v2188_v36  ;;  %2344 = vmatprep.mubr.bf16.mxu1 %v2188_v36  ;;  %v6544_v36 = vld [vmem:[#allocation126_spill] sm:$0xff] }
 0x6e9   :  { %2273 = vmatprep.subr.bf16.mxu0 %v6126_v12  ;;  %2314 = vmatprep.subr.bf16.mxu1 %v6127_v52 }
 0x6eb   :  { %2274 = vmatpush1.bf16.msra.mxu0 %v6128_v57  ;;  %2315 = vmatpush1.bf16.msra.mxu1 %v6129_v19 }
 0x6ec   :  { %2275 = vmatprep.subr.bf16.mxu0 %v6223_v31  ;;  %2316 = vmatprep.subr.bf16.mxu1 %v6224_v55 }
 0x6ef   :  { %2276 = vmatpush1.bf16.msra.mxu0 %v6225_v22  ;;  %2317 = vmatpush1.bf16.msra.mxu1 %v6226_v44 }
 0x6f0   :  { %2277 = vmatprep.subr.bf16.mxu0 %v6227_v59  ;;  %2318 = vmatprep.subr.bf16.mxu1 %v6228_v2 }
 0x6f3   :  { %2278 = vmatpush1.bf16.msra.mxu0 %v6229_v37  ;;  %2319 = vmatpush1.bf16.msra.mxu1 %v6230_v45 }
 0x6f4   :  { %2279 = vmatprep.subr.bf16.mxu0 %v6324_v42  ;;  %2320 = vmatprep.subr.bf16.mxu1 %v6325_v24 }
 0x6f7   :  { %2280 = vmatpush1.bf16.msra.mxu0 %v6326_v15  ;;  %2321 = vmatpush1.bf16.msra.mxu1 %v6327_v53 }
 0x6f8   :  { %2281 = vmatprep.subr.bf16.mxu0 %v6328_v13  ;;  %2322 = vmatprep.subr.bf16.mxu1 %v6329_v49 }
 0x6fb   :  { %2282 = vmatpush1.bf16.msra.mxu0 %v6330_v16  ;;  %2323 = vmatpush1.bf16.msra.mxu1 %v6331_v39 }
 0x6fc   :  { %2283 = vmatprep.subr.bf16.mxu0 %v6332_v32  ;;  %2324 = vmatprep.subr.bf16.mxu1 %v6333_v26 }
 0x6ff   :  { %2284 = vmatpush1.bf16.msra.mxu0 %v6334_v20  ;;  %2325 = vmatpush1.bf16.msra.mxu1 %v6335_v27 }
 0x700   :  { %2285 = vmatprep.subr.bf16.mxu0 %v6336_v10  ;;  %2326 = vmatprep.subr.bf16.mxu1 %v6337_v21 }
 0x703   :  { %2286 = vmatpush1.bf16.msra.mxu0 %v6338_v1  ;;  %2327 = vmatpush1.bf16.msra.mxu1 %v6339_v60 }
 0x704   :  { %2287 = vmatprep.subr.bf16.mxu0 %v6340_v17  ;;  %2328 = vmatprep.subr.bf16.mxu1 %v6248_v43 }
 0x707   :  { %2288 = vmatpush2.bf16.msra.mxu0 %v6249_v33  ;;  %2329 = vmatpush2.bf16.msra.mxu1 %v6526_v23 }
 0x708   :  { %2289 = vmatprep.subr.bf16.mxu0 %v6527_v54  ;;  %2330 = vmatprep.subr.bf16.mxu1 %v6528_v51 }
 0x70b   :  { %2290 = vmatpush2.bf16.msra.mxu0 %v6529_v25  ;;  %2331 = vmatpush2.bf16.msra.mxu1 %v6530_v5 }
 0x70c   :  { %2291 = vmatprep.subr.bf16.mxu0 %v6531_v4  ;;  %2332 = vmatprep.subr.bf16.mxu1 %v6532_v8  ;;  %v6622_v8 = vld [vmem:[#allocation154_spill] sm:$0xff] }
 0x70f   :  { %2292 = vmatpush2.bf16.msra.mxu0 %v6533_v11  ;;  %2333 = vmatpush2.bf16.msra.mxu1 %v6534_v41  ;;  %v6545_v41 = vld [vmem:[#allocation127_spill] sm:$0xff] }
 0x710   :  { %2293 = vmatprep.subr.bf16.mxu0 %v6535_v18  ;;  %2334 = vmatprep.subr.bf16.mxu1 %v6536_v35  ;;  %v6546_v18 = vld [vmem:[#allocation128_spill] sm:$0xff]  ;;  %v6547_v35 = vld [vmem:[#allocation129_spill] sm:$0xff] }
 0x713   :  { %2294 = vmatpush2.bf16.msra.mxu0 %v6537_v40  ;;  %2335 = vmatpush2.bf16.msra.mxu1 %v6538_v6  ;;  %v6548_v40 = vld [vmem:[#allocation130_spill] sm:$0xff]  ;;  %v6549_v6 = vld [vmem:[#allocation131_spill] sm:$0xff] }
 0x714   :  { %2295 = vmatprep.subr.bf16.mxu0 %v6539_v28  ;;  %2336 = vmatprep.subr.bf16.mxu1 %v6540_v50  ;;  %v6550_v28 = vld [vmem:[#allocation132_spill] sm:$0xff]  ;;  %v6551_v50 = vld [vmem:[#allocation133_spill] sm:$0xff] }
 0x717   :  { %2296 = vmatpush2.bf16.msra.mxu0 %v6541_v62  ;;  %2337 = vmatpush2.bf16.msra.mxu1 %v6542_v58  ;;  %v6552_v62 = vld [vmem:[#allocation134_spill] sm:$0xff]  ;;  %v6553_v58 = vld [vmem:[#allocation135_spill] sm:$0xff] }
 0x718   :  { %2297 = vmatprep.subr.bf16.mxu0 %v6543_v61  ;;  %2338 = vmatprep.subr.bf16.mxu1 %v6544_v36  ;;  %v6554_v61 = vld [vmem:[#allocation136_spill] sm:$0xff]  ;;  %v6555_v36 = vld [vmem:[#allocation3_spill] sm:$0xff] }
 0x71b   :  { %2298 = vmatpush2.bf16.msra.mxu0 %v6545_v41  ;;  %2339 = vmatpush2.bf16.msra.mxu1 %v6546_v18  ;;  %v6556_v41 = vld [vmem:[#allocation5_spill] sm:$0xff] }
 0x71c   :  { %2299 = vmatprep.subr.bf16.mxu0 %v6547_v35  ;;  %2340 = vmatprep.subr.bf16.mxu1 %v6548_v40  ;;  %v6557_v40 = vld [vmem:[#allocation4_spill] sm:$0xff]  ;;  %v6566_v35 = vld [vmem:[#allocation14_spill] sm:$0xff]  ;;  %v6621_v18 = vld [vmem:[#allocation73_spill] sm:$0xff] }
 0x71f   :  { %2300 = vmatpush2.bf16.msra.mxu0 %v6549_v6  ;;  %2341 = vmatpush2.bf16.msra.mxu1 %v6550_v28  ;;  %v6558_v6 = vld [vmem:[#allocation6_spill] sm:$0xff]  ;;  %v6559_v28 = vld [vmem:[#allocation7_spill] sm:$0xff] }
 0x720   :  { %2301 = vmatprep.subr.bf16.mxu0 %v6551_v50  ;;  %2342 = vmatprep.subr.bf16.mxu1 %v6552_v62  ;;  %v6560_v50 = vld [vmem:[#allocation8_spill] sm:$0xff]  ;;  %v6561_v62 = vld [vmem:[#allocation9_spill] sm:$0xff] }
 0x723   :  { %2302 = vmatpush2.bf16.msra.mxu0 %v6553_v58  ;;  %2343 = vmatpush2.bf16.msra.mxu1 %v6554_v61  ;;  %v6562_v58 = vld [vmem:[#allocation10_spill] sm:$0xff]  ;;  %v6563_v61 = vld [vmem:[#allocation11_spill] sm:$0xff] }
 0x724   :  { %2406 = vmatprep.subr.bf16.mxu0 %v6555_v36  ;;  %2447 = vmatprep.subr.bf16.mxu1 %v6556_v41  ;;  %v6564_v36 = vld [vmem:[#allocation12_spill] sm:$0xff]  ;;  %v6565_v41 = vld [vmem:[#allocation13_spill] sm:$0xff] }
 0x726   :  { %2304 = vmatmul.mubr.bf16.vlgmr.msra.gmra.mxu0 %v5185_v29  ;;  %2345 = vmatmul.mubr.bf16.vlgmr.msra.gmra.mxu1 %v5185_v29  ;;  %v6567_v29 = vld [vmem:[#allocation15_spill] sm:$0xff] }
 0x727   :  { %2407 = vmatpush1.bf16.msra.mxu0 %v6557_v40  ;;  %2448 = vmatpush1.bf16.msra.mxu1 %v6558_v6  ;;  %v6568_v40 = vld [vmem:[#allocation16_spill] sm:$0xff]  ;;  %v6569_v6 = vld [vmem:[#allocation17_spill] sm:$0xff] }
 0x728   :  { %2408 = vmatprep.subr.bf16.mxu0 %v6559_v28  ;;  %2449 = vmatprep.subr.bf16.mxu1 %v6560_v50  ;;  %v6570_v28 = vld [vmem:[#allocation18_spill] sm:$0xff]  ;;  %v6571_v50 = vld [vmem:[#allocation19_spill] sm:$0xff] }
 0x72b   :  { %2409 = vmatpush1.bf16.msra.mxu0 %v6561_v62  ;;  %2450 = vmatpush1.bf16.msra.mxu1 %v6562_v58  ;;  %v6572_v62 = vld [vmem:[#allocation20_spill] sm:$0xff]  ;;  %v6573_v58 = vld [vmem:[#allocation21_spill] sm:$0xff] }
 0x72c   :  { %2410 = vmatprep.subr.bf16.mxu0 %v6563_v61  ;;  %2451 = vmatprep.subr.bf16.mxu1 %v6564_v36  ;;  %v6574_v61 = vld [vmem:[#allocation22_spill] sm:$0xff]  ;;  %v6575_v36 = vld [vmem:[#allocation23_spill] sm:$0xff] }
 0x72f   :  { %2411 = vmatpush1.bf16.msra.mxu0 %v6565_v41  ;;  %2452 = vmatpush1.bf16.msra.mxu1 %v6566_v35  ;;  %v6576_v41 = vld [vmem:[#allocation24_spill] sm:$0xff]  ;;  %v6577_v35 = vld [vmem:[#allocation25_spill] sm:$0xff] }
 0x730   :  { %2412 = vmatprep.subr.bf16.mxu0 %v6567_v29  ;;  %2453 = vmatprep.subr.bf16.mxu1 %v6568_v40  ;;  %v6578_v29 = vld [vmem:[#allocation26_spill] sm:$0xff]  ;;  %v6579_v40 = vld [vmem:[#allocation27_spill] sm:$0xff] }
 0x733   :  { %2413 = vmatpush1.bf16.msra.mxu0 %v6569_v6  ;;  %2454 = vmatpush1.bf16.msra.mxu1 %v6570_v28  ;;  %v6580_v6 = vld [vmem:[#allocation28_spill] sm:$0xff]  ;;  %v6581_v28 = vld [vmem:[#allocation29_spill] sm:$0xff] }
 0x734   :  { %2414 = vmatprep.subr.bf16.mxu0 %v6571_v50  ;;  %2455 = vmatprep.subr.bf16.mxu1 %v6572_v62  ;;  %v6582_v50 = vld [vmem:[#allocation30_spill] sm:$0xff]  ;;  %v6583_v62 = vld [vmem:[#allocation31_spill] sm:$0xff] }
 0x737   :  { %2415 = vmatpush1.bf16.msra.mxu0 %v6573_v58  ;;  %2456 = vmatpush1.bf16.msra.mxu1 %v6574_v61  ;;  %v6584_v58 = vld [vmem:[#allocation32_spill] sm:$0xff]  ;;  %v6585_v61 = vld [vmem:[#allocation33_spill] sm:$0xff] }
 0x738   :  { %2416 = vmatprep.subr.bf16.mxu0 %v6575_v36  ;;  %2457 = vmatprep.subr.bf16.mxu1 %v6576_v41  ;;  %v6586_v36 = vld [vmem:[#allocation34_spill] sm:$0xff]  ;;  %v6587_v41 = vld [vmem:[#allocation35_spill] sm:$0xff] }
 0x73b   :  { %2417 = vmatpush1.bf16.msra.mxu0 %v6577_v35  ;;  %2458 = vmatpush1.bf16.msra.mxu1 %v6578_v29  ;;  %v6588_v35 = vld [vmem:[#allocation36_spill] sm:$0xff]  ;;  %v6589_v29 = vld [vmem:[#allocation37_spill] sm:$0xff] }
 0x73c   :  { %2418 = vmatprep.subr.bf16.mxu0 %v6579_v40  ;;  %2459 = vmatprep.subr.bf16.mxu1 %v6580_v6  ;;  %v6590_v40 = vld [vmem:[#allocation38_spill] sm:$0xff]  ;;  %v6591_v6 = vld [vmem:[#allocation39_spill] sm:$0xff] }
 0x73f   :  { %2419 = vmatpush1.bf16.msra.mxu0 %v6581_v28  ;;  %2460 = vmatpush1.bf16.msra.mxu1 %v6582_v50  ;;  %v6592_v28 = vld [vmem:[#allocation40_spill] sm:$0xff]  ;;  %v6593_v50 = vld [vmem:[#allocation41_spill] sm:$0xff] }
 0x740   :  { %2420 = vmatprep.subr.bf16.mxu0 %v6583_v62  ;;  %2461 = vmatprep.subr.bf16.mxu1 %v6584_v58  ;;  %v6594_v62 = vld [vmem:[#allocation42_spill] sm:$0xff]  ;;  %v6595_v58 = vld [vmem:[#allocation43_spill] sm:$0xff] }
 0x743   :  { %2421 = vmatpush1.bf16.msra.mxu0 %v6585_v61  ;;  %2462 = vmatpush1.bf16.msra.mxu1 %v6586_v36  ;;  %v6596_v61 = vld [vmem:[#allocation44_spill] sm:$0xff]  ;;  %v6597_v36 = vld [vmem:[#allocation45_spill] sm:$0xff] }
 0x744   :  { %2422 = vmatprep.subr.bf16.mxu0 %v6587_v41  ;;  %2463 = vmatprep.subr.bf16.mxu1 %v6588_v35  ;;  %v6598_v41 = vld [vmem:[#allocation46_spill] sm:$0xff]  ;;  %v6599_v35 = vld [vmem:[#allocation47_spill] sm:$0xff] }
 0x747   :  { %2423 = vmatpush2.bf16.msra.mxu0 %v6589_v29  ;;  %2464 = vmatpush2.bf16.msra.mxu1 %v6590_v40  ;;  %v6600_v29 = vld [vmem:[#allocation48_spill] sm:$0xff]  ;;  %v6601_v40 = vld [vmem:[#allocation49_spill] sm:$0xff] }
 0x748   :  { %2424 = vmatprep.subr.bf16.mxu0 %v6591_v6  ;;  %2465 = vmatprep.subr.bf16.mxu1 %v6592_v28  ;;  %v6602_v6 = vld [vmem:[#allocation50_spill] sm:$0xff]  ;;  %v6603_v28 = vld [vmem:[#allocation51_spill] sm:$0xff] }
 0x74b   :  { %2425 = vmatpush2.bf16.msra.mxu0 %v6593_v50  ;;  %2466 = vmatpush2.bf16.msra.mxu1 %v6594_v62  ;;  %v6604_v50 = vld [vmem:[#allocation52_spill] sm:$0xff]  ;;  %v6605_v62 = vld [vmem:[#allocation53_spill] sm:$0xff] }
 0x74c   :  { %2426 = vmatprep.subr.bf16.mxu0 %v6595_v58  ;;  %2467 = vmatprep.subr.bf16.mxu1 %v6596_v61  ;;  %v6606_v58 = vld [vmem:[#allocation54_spill] sm:$0xff]  ;;  %v6607_v61 = vld [vmem:[#allocation55_spill] sm:$0xff] }
 0x74f   :  { %2427 = vmatpush2.bf16.msra.mxu0 %v6597_v36  ;;  %2468 = vmatpush2.bf16.msra.mxu1 %v6598_v41  ;;  %v6608_v36 = vld [vmem:[#allocation56_spill] sm:$0xff]  ;;  %v6609_v41 = vld [vmem:[#allocation57_spill] sm:$0xff] }
 0x750   :  { %2428 = vmatprep.subr.bf16.mxu0 %v6599_v35  ;;  %2469 = vmatprep.subr.bf16.mxu1 %v6600_v29  ;;  %v6610_v35 = vld [vmem:[#allocation58_spill] sm:$0xff]  ;;  %v6611_v29 = vld [vmem:[#allocation59_spill] sm:$0xff] }
 0x753   :  { %2429 = vmatpush2.bf16.msra.mxu0 %v6601_v40  ;;  %2470 = vmatpush2.bf16.msra.mxu1 %v6602_v6  ;;  %v6612_v40 = vld [vmem:[#allocation60_spill] sm:$0xff]  ;;  %v6613_v6 = vld [vmem:[#allocation61_spill] sm:$0xff] }
 0x754   :  { %2430 = vmatprep.subr.bf16.mxu0 %v6603_v28  ;;  %2471 = vmatprep.subr.bf16.mxu1 %v6604_v50  ;;  %v6614_v28 = vld [vmem:[#allocation62_spill] sm:$0xff]  ;;  %v6615_v50 = vld [vmem:[#allocation63_spill] sm:$0xff] }
 0x757   :  { %2431 = vmatpush2.bf16.msra.mxu0 %v6605_v62  ;;  %2472 = vmatpush2.bf16.msra.mxu1 %v6606_v58  ;;  %v6616_v62 = vld [vmem:[#allocation64_spill] sm:$0xff]  ;;  %v6617_v58 = vld [vmem:[#allocation65_spill] sm:$0xff] }
 0x758   :  { %2432 = vmatprep.subr.bf16.mxu0 %v6607_v61  ;;  %2473 = vmatprep.subr.bf16.mxu1 %v6608_v36  ;;  %v6618_v61 = vld [vmem:[#allocation66_spill] sm:$0xff]  ;;  %v6619_v36 = vld [vmem:[#allocation67_spill] sm:$0xff] }
 0x75b   :  { %2433 = vmatpush2.bf16.msra.mxu0 %v6609_v41  ;;  %2474 = vmatpush2.bf16.msra.mxu1 %v6610_v35  ;;  %v6620_v41 = vld [vmem:[#allocation68_spill] sm:$0xff] }
 0x75c   :  { %2434 = vmatprep.subr.bf16.mxu0 %v6611_v29  ;;  %2475 = vmatprep.subr.bf16.mxu1 %v6612_v40 }
 0x75f   :  { %2435 = vmatpush2.bf16.msra.mxu0 %v6613_v6  ;;  %2476 = vmatpush2.bf16.msra.mxu1 %v6614_v28 }
 0x760   :  { %2436 = vmatprep.subr.bf16.mxu0 %v6615_v50  ;;  %2477 = vmatprep.subr.bf16.mxu1 %v6616_v62 }
 0x763   :  { %2437 = vmatpush2.bf16.msra.mxu0 %v6617_v58  ;;  %2478 = vmatpush2.bf16.msra.mxu1 %v6618_v61  ;;  %v6623_v61 = vld [vmem:[#allocation155_spill] sm:$0xff] }
 0x764   :  { %2488 = vmatprep.subr.bf16.mxu0 %v6619_v36  ;;  %2529 = vmatprep.subr.bf16.mxu1 %v6620_v41 }
 0x7a6   :  { %v2223_v35 = vpop.f32.mrf.mxu0  ;;  %v2264_v29 = vpop.f32.mrf.mxu1 }
 0x7a7   :  { %v2224_v40 = vadd.f32 %v2223_v35, %v6621_v18 }
 0x7a8   :  { %v2225_v11 = vpop.f32.mrf.mxu0  ;;  %v2266_v6 = vpop.f32.mrf.mxu1 }
 0x7a9   :  { %v2357_v28 = vadd.f32 %v2224_v40, %v6622_v8  ;;  %v2267_v50 = vadd.f32 %v2266_v6, %v4013_v38  ;;  %v2226_v18 = vadd.f32 %v2225_v11, %v6116_v63  ;;  %v6624_v8 = vmov 0   ;;  %v6657_v63 = vld [vmem:[#allocation135_spill] sm:$0xff] }
 0x7aa   :  { %v2227_v4 = vpop.f32.mrf.mxu0  ;;  %v2268_v62 = vpop.f32.mrf.mxu1  ;;  %v2615_v40 = vsel %vm2614_vm14, 1, %v6624_v8  ;;  %v6658_v8 = vld [vmem:[#allocation136_spill] sm:$0xff] }
 0x7ab   :  { %v2361_v5 = vmul.f32 0.5, %v2357_v28  ;;  %v2360_v36 = vadd.f32 %v2267_v50, %v6623_v61  ;;  %v6625_v4 = vld [vmem:[#allocation156_spill] sm:$0xff]  ;;  %2617 = vperm.xlu0 %3262, %v2615_v40   ;;  %v2265_v40 = vadd.f32 %v2264_v29, %v4019_v3  ;;  %v6656_v3 = vld [vmem:[#allocation134_spill] sm:$0xff] }
 0x7ac   :  { %v2228_v58 = vpop.f32.mrf.mxu0  ;;  %v2269_v25 = vpop.f32.mrf.mxu1  ;;  %v2358_v6 = vadd.f32 %v2226_v18, %v6625_v4 }
 0x7ad   :  { %3420 = vtanh.f32 %v2361_v5 }
 0x7ae   :  { %3422 = vtanh.f32 %v2360_v36  ;;  %v2362_v28 = vmul.f32 0.5, %v2358_v6  ;;  %v6626_v6 = vld [vmem:[#allocation153_spill] sm:$0xff] }
 0x7b0   :  { %3424 = vtanh.f32 %v2362_v28  ;;  %v2359_v28 = vadd.f32 %v2265_v40, %v6626_v6 }
 0x7ba   :  { %v3421_v41 = vpop.eup %3420 }
 0x7bb   :  { %v2367_v51 = vmul.f32 0.5, %v3421_v41  ;;  %v3423_v23 = vpop.eup %3422 }
 0x7bd   :  { %v2370_v54 = vadd.f32 0.5, %v2367_v51  ;;  %v3425_v38 = vpop.eup %3424 }
 0x7be   :  { %v2368_v4 = vmul.f32 0.5, %v3425_v38 }
 0x7bf   :  { %v2375_v35 = vmul.f32 %v3423_v23, %v2370_v54 }
 0x7e6   :  { %v2305_v25 = vpop.f32.mrf.mxu0  ;;  %v2346_v5 = vpop.f32.mrf.mxu1 }
 0x7e7   :  { %v2306_v36 = vadd.f32 %v2305_v25, %v6221_v47  ;;  %v2347_v25 = vadd.f32 %v2346_v5, %v4534_v48  ;;  %v6651_v48 = vld [vmem:[#allocation129_spill] sm:$0xff]  ;;  %v6654_v47 = vld [vmem:[#allocation132_spill] sm:$0xff] }
 0x7e8   :  { %v2307_v50 = vpop.f32.mrf.mxu0  ;;  %v2348_v41 = vpop.f32.mrf.mxu1 }
 0x7e9   :  { %v2379_v51 = vmul.f32 0.5, %v2306_v36  ;;  %v2308_v23 = vadd.f32 %v2307_v50, %v4522_v7  ;;  %v2349_v18 = vadd.f32 %v2348_v41, %v4528_v56  ;;  %v2371_v36 = vadd.f32 0.5, %v2368_v4  ;;  %v6652_v56 = vld [vmem:[#allocation130_spill] sm:$0xff]  ;;  %v6653_v7 = vld [vmem:[#allocation131_spill] sm:$0xff] }
 0x7ea   :  { %v2309_v54 = vpop.f32.mrf.mxu0  ;;  %v2350_v11 = vpop.f32.mrf.mxu1  ;;  %v2363_v50 = vmul.f32 0.5, %v2359_v28 }
 0x7eb   :  { %3426 = vtanh.f32 %v2379_v51  ;;  %v2380_v62 = vmul.f32 0.5, %v2308_v23  ;;  %v2381_v54 = vmul.f32 0.5, %v2347_v25  ;;  %v2374_v51 = vmul.f32 %v2371_v36, %v5175_v34  ;;  %v2401_v36 = vpop.permute.xlu1 %2400 }
 0x7ec   :  { %v2310_v58 = vpop.f32.mrf.mxu0  ;;  %v2351_v61 = vpop.f32.mrf.mxu1  ;;  %vm2402_vm15 = vcmp.eq.s32.totalorder %v2401_v36, 1  ;;  %v6642_v36 = vld [vmem:[#allocation120_spill] sm:$0xff] }
 0x7ed   :  { %3428 = vtanh.f32 %v2380_v62  ;;  %v5334_v61 = vadd.f32 %v2375_v35, %v2374_v51 }
 0x7ee   :  { %3430 = vtanh.f32 %v2349_v18 }
 0x7ef   :  { %3432 = vtanh.f32 %v2363_v50  ;;  %6627 = vst [vmem:[#allocation69_spill] sm:$0xff] %v5334_v61 }
 0x7f0   :  { %3434 = vtanh.f32 %v2381_v54 }
 0x7f1   :  { %3436 = vtanh.f32 %v5334_v61  ;;  %v6655_v61 = vld [vmem:[#allocation133_spill] sm:$0xff] }
 0x7f8   :  { %v3427_v11 = vpop.eup %3426 }
 0x7f9   :  { %v2385_v23 = vmul.f32 0.5, %v3427_v11 }
 0x7fa   :  { %v3429_v58 = vpop.eup %3428 }
 0x7fb   :  { %v2388_v62 = vadd.f32 0.5, %v2385_v23  ;;  %v2386_v41 = vmul.f32 0.5, %v3429_v58  ;;  %v3431_v29 = vpop.eup %3430 }
 0x7fc   :  { %v3433_v34 = vpop.eup %3432 }
 0x7fd   :  { %v2389_v38 = vadd.f32 0.5, %v2386_v41  ;;  %v2393_v40 = vmul.f32 %v3431_v29, %v2388_v62  ;;  %v3435_v4 = vpop.eup %3434  ;;  %v2369_v6 = vmul.f32 0.5, %v3433_v34  ;;  %v6631_v62 = vld [vmem:[#allocation109_spill] sm:$0xff]  ;;  %v6632_v41 = vld [vmem:[#allocation110_spill] sm:$0xff]  ;;  %v6634_v29 = vld [vmem:[#allocation112_spill] sm:$0xff] }
 0x7fe   :  { %v2387_v28 = vmul.f32 0.5, %v3435_v4  ;;  %v3437_v25 = vpop.eup %3436  ;;  %v6637_v34 = vld [vmem:[#allocation115_spill] sm:$0xff]  ;;  %v6638_v4 = vld [vmem:[#allocation116_spill] sm:$0xff] }
 0x7ff   :  { %v2392_v18 = vmul.f32 %v2389_v38, %v5179_v30  ;;  %v2372_v50 = vadd.f32 0.5, %v2369_v6  ;;  %v6633_v38 = vld [vmem:[#allocation111_spill] sm:$0xff]  ;;  %v6639_v6 = vld [vmem:[#allocation117_spill] sm:$0xff] }
 0x800   :  { %v2390_v35 = vadd.f32 0.5, %v2387_v28  ;;  %v6640_v28 = vld [vmem:[#allocation118_spill] sm:$0xff] }
 0x801   :  { %v5338_v5 = vadd.f32 %v2393_v40, %v2392_v18  ;;  %v2378_v11 = vmul.f32 %v3437_v25, %v2372_v50  ;;  %v6635_v18 = vld [vmem:[#allocation113_spill] sm:$0xff]  ;;  %v6636_v40 = vld [vmem:[#allocation114_spill] sm:$0xff]  ;;  %v6641_v25 = vld [vmem:[#allocation119_spill] sm:$0xff] }
 0x802   :  { %v6643_v50 = vld [vmem:[#allocation121_spill] sm:$0xff] }
 0x803   :  { %6628 = vst [vmem:[#allocation70_spill] sm:$0xff] %v5338_v5  ;;  %3438 = vtanh.f32 %v5338_v5  ;;  %v5344_v58 = vpack.c.bf16 %v2378_v11, %v2378_v11  ;;  %v6646_v11 = vld [vmem:[#allocation124_spill] sm:$0xff] }
 0x804   :  { %v6650_v5 = vld [vmem:[#allocation128_spill] sm:$0xff] }
 0x810   :  { %v3439_v54 = vpop.eup %3438 }
 0x811   :  { %v2396_v51 = vmul.f32 %v3439_v54, %v2390_v35  ;;  %v6644_v35 = vld [vmem:[#allocation122_spill] sm:$0xff]  ;;  %v6645_v54 = vld [vmem:[#allocation123_spill] sm:$0xff] }
 0x813   :  { %v5342_v30 = vsel %vm2402_vm15, %v2396_v51, %v5183_v46  ;;  %v2405_v23 = vpack.c.bf16 %v2396_v51, %v2396_v51  ;;  %v6630_v46 = vld [vmem:[#allocation108_spill] sm:$0xff]  ;;  %v6647_v51 = vld [vmem:[#allocation125_spill] sm:$0xff] }
 0x814   :  { %6629 = vst [vmem:[#allocation77_spill] sm:$0xff] %v5342_v30  ;;  %v6649_v30 = vld [vmem:[#allocation127_spill] sm:$0xff] }
 0x815   :  { %2438 = vmatprep.mubr.bf16.mxu0 %v2405_v23  ;;  %2479 = vmatprep.mubr.bf16.mxu1 %v2405_v23 }
 0x816   :  { %2439 = vmatmul.mubr.bf16.vlgmr.msra.gmra.mxu0 %v5344_v58  ;;  %2480 = vmatmul.mubr.bf16.vlgmr.msra.gmra.mxu1 %v5344_v58 }
 0x817   :  { %2489 = vmatpush1.bf16.msra.mxu0 %v6124_v14  ;;  %2530 = vmatpush1.bf16.msra.mxu1 %v6125_v9 }
 0x818   :  { %2520 = vmatprep.mubr.bf16.mxu0 %v2405_v23  ;;  %2561 = vmatprep.mubr.bf16.mxu1 %v2405_v23  ;;  %v6648_v23 = vld [vmem:[#allocation126_spill] sm:$0xff] }
 0x819   :  { %2490 = vmatprep.subr.bf16.mxu0 %v6126_v12  ;;  %2531 = vmatprep.subr.bf16.mxu1 %v6127_v52 }
 0x81b   :  { %2491 = vmatpush1.bf16.msra.mxu0 %v6128_v57  ;;  %2532 = vmatpush1.bf16.msra.mxu1 %v6129_v19 }
 0x81c   :  { %2492 = vmatprep.subr.bf16.mxu0 %v6223_v31  ;;  %2533 = vmatprep.subr.bf16.mxu1 %v6224_v55 }
 0x81f   :  { %2493 = vmatpush1.bf16.msra.mxu0 %v6225_v22  ;;  %2534 = vmatpush1.bf16.msra.mxu1 %v6226_v44 }
 0x820   :  { %2494 = vmatprep.subr.bf16.mxu0 %v6227_v59  ;;  %2535 = vmatprep.subr.bf16.mxu1 %v6228_v2 }
 0x823   :  { %2495 = vmatpush1.bf16.msra.mxu0 %v6229_v37  ;;  %2536 = vmatpush1.bf16.msra.mxu1 %v6230_v45 }
 0x824   :  { %2496 = vmatprep.subr.bf16.mxu0 %v6324_v42  ;;  %2537 = vmatprep.subr.bf16.mxu1 %v6325_v24 }
 0x827   :  { %2497 = vmatpush1.bf16.msra.mxu0 %v6326_v15  ;;  %2538 = vmatpush1.bf16.msra.mxu1 %v6327_v53 }
 0x828   :  { %2498 = vmatprep.subr.bf16.mxu0 %v6328_v13  ;;  %2539 = vmatprep.subr.bf16.mxu1 %v6329_v49 }
 0x82b   :  { %2499 = vmatpush1.bf16.msra.mxu0 %v6330_v16  ;;  %2540 = vmatpush1.bf16.msra.mxu1 %v6331_v39 }
 0x82c   :  { %2500 = vmatprep.subr.bf16.mxu0 %v6332_v32  ;;  %2541 = vmatprep.subr.bf16.mxu1 %v6333_v26 }
 0x82f   :  { %2501 = vmatpush1.bf16.msra.mxu0 %v6334_v20  ;;  %2542 = vmatpush1.bf16.msra.mxu1 %v6335_v27 }
 0x830   :  { %2502 = vmatprep.subr.bf16.mxu0 %v6336_v10  ;;  %2543 = vmatprep.subr.bf16.mxu1 %v6337_v21 }
 0x833   :  { %2503 = vmatpush1.bf16.msra.mxu0 %v6338_v1  ;;  %2544 = vmatpush1.bf16.msra.mxu1 %v6339_v60 }
 0x834   :  { %2504 = vmatprep.subr.bf16.mxu0 %v6340_v17  ;;  %2545 = vmatprep.subr.bf16.mxu1 %v6248_v43 }
 0x837   :  { %2505 = vmatpush2.bf16.msra.mxu0 %v6249_v33  ;;  %2546 = vmatpush2.bf16.msra.mxu1 %v6630_v46 }
 0x838   :  { %2506 = vmatprep.subr.bf16.mxu0 %v6631_v62  ;;  %2547 = vmatprep.subr.bf16.mxu1 %v6632_v41 }
 0x83b   :  { %2507 = vmatpush2.bf16.msra.mxu0 %v6633_v38  ;;  %2548 = vmatpush2.bf16.msra.mxu1 %v6634_v29 }
 0x83c   :  { %2508 = vmatprep.subr.bf16.mxu0 %v6635_v18  ;;  %2549 = vmatprep.subr.bf16.mxu1 %v6636_v40 }
 0x83f   :  { %2509 = vmatpush2.bf16.msra.mxu0 %v6637_v34  ;;  %2550 = vmatpush2.bf16.msra.mxu1 %v6638_v4 }
 0x840   :  { %2510 = vmatprep.subr.bf16.mxu0 %v6639_v6  ;;  %2551 = vmatprep.subr.bf16.mxu1 %v6640_v28 }
 0x843   :  { %2511 = vmatpush2.bf16.msra.mxu0 %v6641_v25  ;;  %2552 = vmatpush2.bf16.msra.mxu1 %v6642_v36 }
 0x844   :  { %2512 = vmatprep.subr.bf16.mxu0 %v6643_v50  ;;  %2553 = vmatprep.subr.bf16.mxu1 %v6644_v35 }
 0x847   :  { %2513 = vmatpush2.bf16.msra.mxu0 %v6645_v54  ;;  %2554 = vmatpush2.bf16.msra.mxu1 %v6646_v11 }
 0x848   :  { %2514 = vmatprep.subr.bf16.mxu0 %v6647_v51  ;;  %2555 = vmatprep.subr.bf16.mxu1 %v6648_v23 }
 0x84b   :  { %2515 = vmatpush2.bf16.msra.mxu0 %v6649_v30  ;;  %2556 = vmatpush2.bf16.msra.mxu1 %v6650_v5  ;;  %v6660_v30 = vld [vmem:[#allocation68_spill] sm:$0xff] }
 0x84c   :  { %2516 = vmatprep.subr.bf16.mxu0 %v6651_v48  ;;  %2557 = vmatprep.subr.bf16.mxu1 %v6652_v56 }
 0x84f   :  { %2517 = vmatpush2.bf16.msra.mxu0 %v6653_v7  ;;  %2558 = vmatpush2.bf16.msra.mxu1 %v6654_v47 }
 0x850   :  { %2518 = vmatprep.subr.bf16.mxu0 %v6655_v61  ;;  %2559 = vmatprep.subr.bf16.mxu1 %v6656_v3 }
 0x853   :  { %2519 = vmatpush2.bf16.msra.mxu0 %v6657_v63  ;;  %2560 = vmatpush2.bf16.msra.mxu1 %v6658_v8 }
 0x854   :  { %2623 = vmatprep.subr.bf16.mxu0 %v6659_v0  ;;  %2664 = vmatprep.subr.bf16.mxu1 %v6660_v30 }
 0x856   :  { %2521 = vmatmul.mubr.bf16.vlgmr.msra.gmra.mxu0 %v5344_v58  ;;  %2562 = vmatmul.mubr.bf16.vlgmr.msra.gmra.mxu1 %v5344_v58 }
 0x857   :  { %2624 = vmatpush1.bf16.msra.mxu0 %v6124_v14  ;;  %2665 = vmatpush1.bf16.msra.mxu1 %v6125_v9  ;;  %v6661_v14 = vld [vmem:[#allocation127_spill] sm:$0xff]  ;;  %v6662_v9 = vld [vmem:[#allocation72_spill] sm:$0xff] }
 0x858   :  { %2625 = vmatprep.subr.bf16.mxu0 %v6126_v12  ;;  %2666 = vmatprep.subr.bf16.mxu1 %v6127_v52  ;;  %vm2723_vm0 = vcmp.eq.s32.totalorder %v6662_v9, 7  ;;  %v6663_v12 = vmov 0  }
 0x859   :  { %v2724_v52 = vsel %vm2723_vm0, 1, %v6663_v12 }
 0x85a   :  { %2726 = vperm.xlu1 %3263, %v2724_v52  }
 0x85b   :  { %2626 = vmatpush1.bf16.msra.mxu0 %v6128_v57  ;;  %2667 = vmatpush1.bf16.msra.mxu1 %v6129_v19 }
 0x85c   :  { %2627 = vmatprep.subr.bf16.mxu0 %v6223_v31  ;;  %2668 = vmatprep.subr.bf16.mxu1 %v6224_v55  ;;  %v6666_v55 = vld [vmem:[#allocation74_spill] sm:$0xff] }
 0x85f   :  { %2628 = vmatpush1.bf16.msra.mxu0 %v6225_v22  ;;  %2669 = vmatpush1.bf16.msra.mxu1 %v6226_v44 }
 0x860   :  { %2629 = vmatprep.subr.bf16.mxu0 %v6227_v59  ;;  %2670 = vmatprep.subr.bf16.mxu1 %v6228_v2 }
 0x863   :  { %2630 = vmatpush1.bf16.msra.mxu0 %v6229_v37  ;;  %2671 = vmatpush1.bf16.msra.mxu1 %v6230_v45  ;;  %v6668_v37 = vld [vmem:[#allocation160_spill] sm:$0xff] }
 0x864   :  { %2631 = vmatprep.subr.bf16.mxu0 %v6324_v42  ;;  %2672 = vmatprep.subr.bf16.mxu1 %v6325_v24  ;;  %v6669_v24 = vld [vmem:[#allocation159_spill] sm:$0xff] }
 0x867   :  { %2632 = vmatpush1.bf16.msra.mxu0 %v6326_v15  ;;  %2673 = vmatpush1.bf16.msra.mxu1 %v6327_v53  ;;  %v6670_v53 = vld [vmem:[#allocation76_spill] sm:$0xff] }
 0x868   :  { %2633 = vmatprep.subr.bf16.mxu0 %v6328_v13  ;;  %2674 = vmatprep.subr.bf16.mxu1 %v6329_v49  ;;  %v6671_v49 = vld [vmem:[#allocation157_spill] sm:$0xff] }
 0x86b   :  { %2634 = vmatpush1.bf16.msra.mxu0 %v6330_v16  ;;  %2675 = vmatpush1.bf16.msra.mxu1 %v6331_v39 }
 0x86c   :  { %2635 = vmatprep.subr.bf16.mxu0 %v6332_v32  ;;  %2676 = vmatprep.subr.bf16.mxu1 %v6333_v26 }
 0x86f   :  { %2636 = vmatpush1.bf16.msra.mxu0 %v6334_v20  ;;  %2677 = vmatpush1.bf16.msra.mxu1 %v6335_v27 }
 0x870   :  { %2637 = vmatprep.subr.bf16.mxu0 %v6336_v10  ;;  %2678 = vmatprep.subr.bf16.mxu1 %v6337_v21 }
 0x873   :  { %2638 = vmatpush1.bf16.msra.mxu0 %v6338_v1  ;;  %2679 = vmatpush1.bf16.msra.mxu1 %v6339_v60 }
 0x874   :  { %2639 = vmatprep.subr.bf16.mxu0 %v6340_v17  ;;  %2680 = vmatprep.subr.bf16.mxu1 %v6248_v43  ;;  %v6672_v17 = vld [vmem:[#allocation69_spill] sm:$0xff] }
 0x877   :  { %2640 = vmatpush2.bf16.msra.mxu0 %v6249_v33  ;;  %2681 = vmatpush2.bf16.msra.mxu1 %v6630_v46 }
 0x878   :  { %2641 = vmatprep.subr.bf16.mxu0 %v6631_v62  ;;  %2682 = vmatprep.subr.bf16.mxu1 %v6632_v41 }
 0x87b   :  { %2642 = vmatpush2.bf16.msra.mxu0 %v6633_v38  ;;  %2683 = vmatpush2.bf16.msra.mxu1 %v6634_v29  ;;  %v6673_v29 = vld [vmem:[#allocation161_spill] sm:$0xff] }
 0x87c   :  { %2643 = vmatprep.subr.bf16.mxu0 %v6635_v18  ;;  %2684 = vmatprep.subr.bf16.mxu1 %v6636_v40 }
 0x87f   :  { %2644 = vmatpush2.bf16.msra.mxu0 %v6637_v34  ;;  %2685 = vmatpush2.bf16.msra.mxu1 %v6638_v4 }
 0x880   :  { %2645 = vmatprep.subr.bf16.mxu0 %v6639_v6  ;;  %2686 = vmatprep.subr.bf16.mxu1 %v6640_v28  ;;  %v6674_v6 = vld [vmem:[#allocation162_spill] sm:$0xff] }
 0x883   :  { %2646 = vmatpush2.bf16.msra.mxu0 %v6641_v25  ;;  %2687 = vmatpush2.bf16.msra.mxu1 %v6642_v36 }
 0x884   :  { %2647 = vmatprep.subr.bf16.mxu0 %v6643_v50  ;;  %2688 = vmatprep.subr.bf16.mxu1 %v6644_v35 }
 0x887   :  { %2648 = vmatpush2.bf16.msra.mxu0 %v6645_v54  ;;  %2689 = vmatpush2.bf16.msra.mxu1 %v6646_v11  ;;  %v6675_v11 = vld [vmem:[#allocation163_spill] sm:$0xff] }
 0x888   :  { %2649 = vmatprep.subr.bf16.mxu0 %v6647_v51  ;;  %2690 = vmatprep.subr.bf16.mxu1 %v6648_v23  ;;  %v6676_v23 = vld [vmem:[#allocation164_spill] sm:$0xff] }
 0x88b   :  { %2650 = vmatpush2.bf16.msra.mxu0 %v6661_v14  ;;  %2691 = vmatpush2.bf16.msra.mxu1 %v6650_v5 }
 0x88c   :  { %2651 = vmatprep.subr.bf16.mxu0 %v6651_v48  ;;  %2692 = vmatprep.subr.bf16.mxu1 %v6652_v56  ;;  %v6664_v56 = vld [vmem:[#allocation73_spill] sm:$0xff] }
 0x88f   :  { %2652 = vmatpush2.bf16.msra.mxu0 %v6653_v7  ;;  %2693 = vmatpush2.bf16.msra.mxu1 %v6654_v47  ;;  %v6665_v47 = vld [vmem:[#allocation158_spill] sm:$0xff] }
 0x890   :  { %2653 = vmatprep.subr.bf16.mxu0 %v6655_v61  ;;  %2694 = vmatprep.subr.bf16.mxu1 %v6656_v3  ;;  %v6667_v3 = vld [vmem:[#allocation75_spill] sm:$0xff] }
 0x893   :  { %2654 = vmatpush2.bf16.msra.mxu0 %v6657_v63  ;;  %2695 = vmatpush2.bf16.msra.mxu1 %v6658_v8 }
 0x8d6   :  { %v2440_v48 = vpop.f32.mrf.mxu0  ;;  %v2481_v57 = vpop.f32.mrf.mxu1 }
 0x8d7   :  { %v2441_v19 = vadd.f32 %v2440_v48, %v6664_v56  ;;  %v2482_v13 = vadd.f32 %v2481_v57, %v6670_v53  ;;  %v3275_v53 = vld [vmem:[%s5619_s5 + $0x64] ss:$8 sps:$4 sm:$0xff]  }
 0x8d8   :  { %v2442_v7 = vpop.f32.mrf.mxu0  ;;  %v2483_v0 = vpop.f32.mrf.mxu1 }
 0x8d9   :  { %v2574_v31 = vadd.f32 %v2441_v19, %v6665_v47  ;;  %v2443_v22 = vadd.f32 %v2442_v7, %v6666_v55  ;;  %v2484_v44 = vadd.f32 %v2483_v0, %v6667_v3  ;;  %v2576_v16 = vadd.f32 %v2482_v13, %v6671_v49  ;;  %v6677_v47 = vld [vmem:[#allocation70_spill] sm:$0xff]  ;;  %v3273_v13 = vld [vmem:[%s5619_s5 + $0x60] ss:$8 sps:$4 sm:$0xff]  }
 0x8da   :  { %v2444_v63 = vpop.f32.mrf.mxu0  ;;  %v2485_v59 = vpop.f32.mrf.mxu1  ;;  %v3276_v49 = vld [vmem:[%s5619_s5 + $0x50] ss:$8 sps:$4 sm:$0xff]  }
 0x8db   :  { %v2578_v2 = vmul.f32 0.5, %v2574_v31  ;;  %v2575_v45 = vadd.f32 %v2443_v22, %v6668_v37  ;;  %v2577_v15 = vadd.f32 %v2484_v44, %v6669_v24  ;;  %v2580_v39 = vmul.f32 0.5, %v2576_v16  ;;  %v2618_v63 = vpop.permute.xlu0 %2617  ;;  %v3272_v24 = vld [vmem:[%s5619_s5 + $0x74] ss:$8 sps:$4 sm:$0xff]   ;;  %v3279_v16 = vld [vmem:[%s5619_s5 + $0x40] ss:$8 sps:$4 sm:$0xff]  }
 0x8dc   :  { %v2445_v43 = vpop.f32.mrf.mxu0  ;;  %v2486_v33 = vpop.f32.mrf.mxu1  ;;  %vm2619_vm1 = vcmp.eq.s32.totalorder %v2618_v63, 1  ;;  %2839 = vmatprep.subr.bf16.mxu0 %v3272_v24  ;;  %v3308_v24 = vld [vmem:[%s5620_s7 + $0x40] sm:$0xff]  }
 0x8dd   :  { %3440 = vtanh.f32 %v2578_v2  ;;  %v2579_v42 = vmul.f32 0.5, %v2575_v45  ;;  %v6678_v45 = vld [vmem:[#allocation77_spill] sm:$0xff] }
 0x8df   :  { %3442 = vtanh.f32 %v2579_v42 }
 0x8e0   :  { %3444 = vtanh.f32 %v2577_v15  ;;  %v3270_v15 = vld [vmem:[%s5619_s5 + $0x70] ss:$8 sps:$4 sm:$0xff]  }
 0x8e1   :  { %3446 = vtanh.f32 %v2580_v39  ;;  %v3281_v39 = vld [vmem:[%s5619_s5 + $0x44] ss:$8 sps:$4 sm:$0xff]  }
 0x8ea   :  { %v3441_v32 = vpop.eup %3440 }
 0x8eb   :  { %v2584_v26 = vmul.f32 0.5, %v3441_v32  ;;  %v3284_v32 = vld [vmem:[%s5619_s5 + $0x34] ss:$8 sps:$4 sm:$0xff]  }
 0x8ec   :  { %v3443_v20 = vpop.eup %3442 }
 0x8ed   :  { %v2587_v27 = vadd.f32 0.5, %v2584_v26  ;;  %v2585_v10 = vmul.f32 0.5, %v3443_v20  ;;  %v3445_v21 = vpop.eup %3444  ;;  %v3282_v26 = vld [vmem:[%s5619_s5 + $0x30] ss:$8 sps:$4 sm:$0xff]   ;;  %v3287_v20 = vld [vmem:[%s5619_s5 + $0x24] ss:$8 sps:$4 sm:$0xff]  }
 0x8ee   :  { %v3447_v5 = vpop.eup %3446 }
 0x8ef   :  { %v2588_v1 = vadd.f32 0.5, %v2585_v10  ;;  %v2592_v60 = vmul.f32 %v3445_v21, %v2587_v27  ;;  %v2586_v30 = vmul.f32 0.5, %v3447_v5  ;;  %v3285_v27 = vld [vmem:[%s5619_s5 + $0x20] ss:$8 sps:$4 sm:$0xff]   ;;  %v3290_v10 = vld [vmem:[%s5619_s5 + $0x14] ss:$8 sps:$4 sm:$0xff]  }
 0x8f0   :  { %v3288_v21 = vld [vmem:[%s5619_s5 + $0x10] ss:$8 sps:$4 sm:$0xff]  }
 0x8f1   :  { %v2591_v8 = vmul.f32 %v2588_v1, %v6672_v17  ;;  %v2589_v58 = vadd.f32 0.5, %v2586_v30  ;;  %v3293_v1 = vld [vmem:[%s5619_s5 + $0x4] ss:$8 sps:$4 sm:$0xff]   ;;  %v3294_v17 = vld [vmem:[%s5620_s7 + $0x78] sm:$0xff]   ;;  %v3297_v5 = vld [vmem:[%s5620_s7 + $0x30] sm:$0xff]  }
 0x8f2   :  { %3238 = vmatprep.subr.bf16.mxu1 %v3294_v17  ;;  %v3298_v30 = vld [vmem:[%s5620_s7 + $0x68] sm:$0xff]  }
 0x8f3   :  { %v2593_v61 = vadd.f32 %v2592_v60, %v2591_v8  ;;  %v3291_v60 = vld [vmem:[%s5619_s5] ss:$8 sps:$4 sm:$0xff]   ;;  %v3295_v8 = vld [vmem:[%s5620_s7 + $0x38] sm:$0xff]  }
 0x8f5   :  { %3448 = vtanh.f32 %v2593_v61  ;;  %v3296_v61 = vld [vmem:[%s5620_s7 + $0x70] sm:$0xff]  }
 0x902   :  { %v3449_v46 = vpop.eup %3448 }
 0x903   :  { %v2595_v62 = vmul.f32 %v3449_v46, %v2589_v58  ;;  %v3299_v58 = vld [vmem:[%s5620_s7 + $0x28] sm:$0xff]   ;;  %v3300_v46 = vld [vmem:[%s5620_s7 + $0x60] sm:$0xff]  }
 0x905   :  { %v2621_v42 = vpack.c.bf16 %v2595_v62, %v2595_v62  ;;  %v3301_v62 = vld [vmem:[%s5620_s7 + $0x20] sm:$0xff]  }
 0x916   :  { %v2522_v41 = vpop.f32.mrf.mxu0  ;;  %v2563_v38 = vpop.f32.mrf.mxu1 }
 0x917   :  { %v2523_v18 = vadd.f32 %v2522_v41, %v6673_v29  ;;  %v2564_v14 = vadd.f32 %v2563_v38, %v6676_v23  ;;  %v3302_v41 = vld [vmem:[%s5620_s7 + $0x58] sm:$0xff]  }
 0x918   :  { %v2524_v40 = vpop.f32.mrf.mxu0  ;;  %v2565_v34 = vpop.f32.mrf.mxu1  ;;  %v3303_v38 = vld [vmem:[%s5620_s7 + $0x18] sm:$0xff]  }
 0x919   :  { %v2596_v4 = vmul.f32 0.5, %v2523_v18  ;;  %v2525_v28 = vadd.f32 %v2524_v40, %v6674_v6  ;;  %v2566_v51 = vadd.f32 %v2565_v34, %v6675_v11  ;;  %v2598_v9 = vmul.f32 0.5, %v2564_v14  ;;  %v3304_v18 = vld [vmem:[%s5620_s7 + $0x50] sm:$0xff]  }
 0x91a   :  { %v2526_v25 = vpop.f32.mrf.mxu0  ;;  %v2567_v36 = vpop.f32.mrf.mxu1  ;;  %v3305_v40 = vld [vmem:[%s5620_s7 + $0x10] sm:$0xff]  }
 0x91b   :  { %3450 = vtanh.f32 %v2596_v4  ;;  %v2597_v50 = vmul.f32 0.5, %v2525_v28 }
 0x91c   :  { %v2527_v35 = vpop.f32.mrf.mxu0  ;;  %v2568_v54 = vpop.f32.mrf.mxu1 }
 0x91d   :  { %3452 = vtanh.f32 %v2597_v50 }
 0x91e   :  { %3454 = vtanh.f32 %v2566_v51 }
 0x91f   :  { %3456 = vtanh.f32 %v2598_v9 }
 0x928   :  { %v3451_v52 = vpop.eup %3450 }
 0x929   :  { %v2602_v48 = vmul.f32 0.5, %v3451_v52 }
 0x92a   :  { %v3453_v57 = vpop.eup %3452 }
 0x92b   :  { %v2605_v56 = vadd.f32 0.5, %v2602_v48  ;;  %v2603_v19 = vmul.f32 0.5, %v3453_v57  ;;  %v3455_v0 = vpop.eup %3454 }
 0x92c   :  { %v3457_v3 = vpop.eup %3456 }
 0x92d   :  { %v2606_v7 = vadd.f32 0.5, %v2603_v19  ;;  %v2610_v55 = vmul.f32 %v3455_v0, %v2605_v56  ;;  %v2604_v44 = vmul.f32 0.5, %v3457_v3 }
 0x92f   :  { %v2609_v31 = vmul.f32 %v2606_v7, %v6677_v47  ;;  %v2607_v59 = vadd.f32 0.5, %v2604_v44 }
 0x931   :  { %v5492_v22 = vadd.f32 %v2610_v55, %v2609_v31 }
 0x933   :  { %3458 = vtanh.f32 %v5492_v22 }
 0x940   :  { %v3459_v2 = vpop.eup %3458 }
 0x941   :  { %v2613_v37 = vmul.f32 %v3459_v2, %v2607_v59  ;;  %v2727_v2 = vpop.permute.xlu1 %2726 }
 0x942   :  { %vm2728_vm2 = vcmp.eq.s32.totalorder %v2727_v2, 1 }
 0x943   :  { %v5496_v43 = vsel %vm2619_vm1, %v2613_v37, %v6678_v45  ;;  %v2622_v33 = vpack.c.bf16 %v2613_v37, %v2613_v37 }
 0x945   :  { %2655 = vmatprep.mubr.bf16.mxu0 %v2622_v33  ;;  %2696 = vmatprep.mubr.bf16.mxu1 %v2622_v33 }
 0x946   :  { %2656 = vmatmul.mubr.bf16.vlgmr.msra.gmra.mxu0 %v2621_v42  ;;  %2697 = vmatmul.mubr.bf16.vlgmr.msra.gmra.mxu1 %v2621_v42  ;;  %v3306_v42 = vld [vmem:[%s5620_s7 + $0x48] sm:$0xff]  }
 0x947   :  { %2871 = vmatprep.mubr.bf16.mxu0 %v6663_v12  ;;  %2840 = vmatpush1.bf16.msra.mxu0 %v3270_v15  ;;  %v3278_v12 = vld [vmem:[%s5619_s5 + $0x54] ss:$8 sps:$4 sm:$0xff]   ;;  %v2747_v15 = vld [vmem:[%s5621_s6] sm:$0x3] }
 0x948   :  { %2841 = vmatprep.subr.bf16.mxu0 %v3275_v53  ;;  %3239 = vmatpush3.bf16.msra.mxu1 %v3295_v8  ;;  %v6679_v53 = vld [vmem:[#allocation71_spill] sm:$0xff] }
 0x949   :  { %3240 = vmatprep.subr.bf16.mxu1 %v3296_v61  ;;  %v3221_v61 = vld [vmem:[%s5622_s8] ss:$0 sm:$0xff] }
 0x94b   :  { %2842 = vmatpush1.bf16.msra.mxu0 %v3273_v13  ;;  %v6680_v13 = vsub.s32 0, %v6679_v53 }
 0x94c   :  { %2843 = vmatprep.subr.bf16.mxu0 %v3278_v12  ;;  %3241 = vmatpush3.bf16.msra.mxu1 %v3297_v5 }
 0x94d   :  { %3242 = vmatprep.subr.bf16.mxu1 %v3298_v30  ;;  %v2752_v12 = vrot.slane %v2747_v15, %v6680_v13 }
 0x94f   :  { %2844 = vmatpush1.bf16.msra.mxu0 %v3276_v49  ;;  %v6681_v49 = vsub.s32 1, %v6679_v53 }
 0x950   :  { %2845 = vmatprep.subr.bf16.mxu0 %v3281_v39  ;;  %3243 = vmatpush3.bf16.msra.mxu1 %v3299_v58 }
 0x951   :  { %3244 = vmatprep.subr.bf16.mxu1 %v3300_v46 }
 0x953   :  { %2846 = vmatpush1.bf16.msra.mxu0 %v3279_v16  ;;  %v2756_v16 = vrot.slane %v2747_v15, %v6681_v49 }
 0x954   :  { %2847 = vmatprep.subr.bf16.mxu0 %v3284_v32  ;;  %3245 = vmatpush3.bf16.msra.mxu1 %v3301_v62 }
 0x955   :  { %3246 = vmatprep.subr.bf16.mxu1 %v3302_v41 }
 0x957   :  { %2848 = vmatpush1.bf16.msra.mxu0 %v3282_v26 }
 0x958   :  { %2849 = vmatprep.subr.bf16.mxu0 %v3287_v20  ;;  %3247 = vmatpush3.bf16.msra.mxu1 %v3303_v38 }
 0x959   :  { %3248 = vmatprep.subr.bf16.mxu1 %v3304_v18 }
 0x95b   :  { %2850 = vmatpush1.bf16.msra.mxu0 %v3285_v27 }
 0x95c   :  { %2851 = vmatprep.subr.bf16.mxu0 %v3290_v10  ;;  %3249 = vmatpush3.bf16.msra.mxu1 %v3305_v40 }
 0x95d   :  { %3250 = vmatprep.subr.bf16.mxu1 %v3306_v42 }
 0x95f   :  { %2852 = vmatpush1.bf16.msra.mxu0 %v3288_v21 }
 0x960   :  { %2853 = vmatprep.subr.bf16.mxu0 %v3293_v1 }
 0x963   :  { %2854 = vmatpush1.bf16.msra.mxu0 %v3291_v60 }
 0xa06   :  { %v2657_v34 = vpop.f32.mrf.mxu0  ;;  %v2698_v4 = vpop.f32.mrf.mxu1 }
 0xa07   :  { %v2658_v28 = vadd.f32 %v2657_v34, %v6673_v29  ;;  %v2699_v57 = vadd.f32 %v2698_v4, %v6676_v23 }
 0xa08   :  { %v2659_v25 = vpop.f32.mrf.mxu0  ;;  %v2700_v36 = vpop.f32.mrf.mxu1 }
 0xa09   :  { %v2705_v50 = vmul.f32 0.5, %v2658_v28  ;;  %v2660_v35 = vadd.f32 %v2659_v25, %v6674_v6  ;;  %v2701_v48 = vadd.f32 %v2700_v36, %v6675_v11  ;;  %v2707_v56 = vmul.f32 0.5, %v2699_v57 }
 0xa0a   :  { %v2661_v54 = vpop.f32.mrf.mxu0  ;;  %v2702_v51 = vpop.f32.mrf.mxu1 }
 0xa0b   :  { %3460 = vtanh.f32 %v2705_v50  ;;  %v2706_v14 = vmul.f32 0.5, %v2660_v35 }
 0xa0c   :  { %v2662_v9 = vpop.f32.mrf.mxu0  ;;  %v2703_v52 = vpop.f32.mrf.mxu1 }
 0xa0d   :  { %3462 = vtanh.f32 %v2706_v14 }
 0xa0e   :  { %3464 = vtanh.f32 %v2701_v48 }
 0xa0f   :  { %3466 = vtanh.f32 %v2707_v56 }
 0xa18   :  { %v3461_v19 = vpop.eup %3460 }
 0xa19   :  { %v2711_v29 = vmul.f32 0.5, %v3461_v19 }
 0xa1a   :  { %v3463_v7 = vpop.eup %3462 }
 0xa1b   :  { %v2714_v0 = vadd.f32 0.5, %v2711_v29  ;;  %v2712_v47 = vmul.f32 0.5, %v3463_v7  ;;  %v3465_v31 = vpop.eup %3464 }
 0xa1c   :  { %v3467_v63 = vpop.eup %3466 }
 0xa1d   :  { %v2715_v6 = vadd.f32 0.5, %v2712_v47  ;;  %v2719_v3 = vmul.f32 %v3465_v31, %v2714_v0  ;;  %v2713_v59 = vmul.f32 0.5, %v3467_v63 }
 0xa1f   :  { %v2718_v55 = vmul.f32 %v2715_v6, %v5492_v22  ;;  %v2716_v11 = vadd.f32 0.5, %v2713_v59  ;;  %v3307_v22 = vld [vmem:[%s5620_s7 + $0x8] sm:$0xff]  }
 0xa20   :  { %3251 = vmatpush3.bf16.msra.mxu1 %v3307_v22 }
 0xa21   :  { %v2720_v44 = vadd.f32 %v2719_v3, %v2718_v55  ;;  %3252 = vmatprep.subr.bf16.mxu1 %v3308_v24 }
 0xa23   :  { %3468 = vtanh.f32 %v2720_v44 }
 0xa30   :  { %v3469_v37 = vpop.eup %3468 }
 0xa31   :  { %v2722_v23 = vmul.f32 %v3469_v37, %v2716_v11 }
 0xa33   :  { %v2729_v45 = vsel %vm2728_vm2, %v2722_v23, %v5496_v43  ;;  %v3309_v43 = vld [vmem:[%s5620_s7] sm:$0xff]  }
 0xa34   :  { %v2730_v33 = vpack.c.bf16 %v2729_v45, %v2729_v45  ;;  %3253 = vmatpush3.bf16.msra.mxu1 %v3309_v43 }
 0xa36   :  { %2872 = vmatmul.mubr.bf16.vlgmr.msra.gmra.mxu0 %v2730_v33 }
 0xaf6   :  { %v2873_v39 = vpop.f32.mrf.mxu0 }
 0xaf7   :  { %v2874_v32 = vadd.f32 %v2873_v39, %v2752_v12 }
 0xaf8   :  { %v2875_v26 = vpop.f32.mrf.mxu0 }
 0xaf9   :  { %v2876_v20 = vadd.f32 %v2875_v26, %v2756_v16  ;;  %v2880_v27 = vmax.f32 %v2874_v32, 0.0 }
 0xafa   :  { %v2877_v10 = vpop.f32.mrf.mxu0 }
 0xafb   :  { %v2881_v21 = vmax.f32 %v2876_v20, 0.0  ;;  %v2882_v17 = vpack.c.bf16 %v2880_v27, %v2880_v27 }
 0xafc   :  { %v2878_v1 = vpop.f32.mrf.mxu0 }
 0xafd   :  { %v2883_v60 = vpack.c.bf16 %v2881_v21, %v2881_v21 }
 0xaff   :  { %3051 = vmatprep.mubr.bf16.mxu1 %v2883_v60 }
 0xb00   :  { %3052 = vmatmul.mubr.bf16.vlgmr.msra.gmra.mxu1 %v2882_v17 }
 0xbc0   :  { %v3254_v8 = vpop.f32.mrf.mxu1 }
 0xbc2   :  { %v3255_v5 = vpop.f32.mrf.mxu1 }
 0xbc3   :  { %v3256_v30 = vadd.f32 %v3255_v5, %v3254_v8 }
 0xbc4   :  { %v3257_v58 = vpop.f32.mrf.mxu1 }
 0xbc5   :  { %v3054_v46 = vadd.f32 %v3256_v30, %v3221_v61 }
 0xbc6   :  { %v3258_v62 = vpop.f32.mrf.mxu1 }
 0xbc7   :  { %3059 = vst [vmem:[%s5623_s9] sm:$0xff] %v3054_v46 }

</bundles_post_ra>
